<compile_context>
chip_gen: v6e
topology: v6e:2x2x1
jax: 0.10.0
libtpu: 0.0.40
codegen_flags: <defaults>
</compile_context>

<pallas_src>
import functools

import jax
import jax.numpy as jnp
import numpy as np
from jax.experimental import pallas as pl
from jax.experimental.pallas import tpu as pltpu

_M5_OFF = 0      # first 25 mask rows: 5x5 (merged 3x3/5x5/1x1) feature-conv taps
_M7_OFF = 25     # next 49 mask rows: shared 7x7 spatial-attention taps


def _csfa_kernel(x_ref, wfeat_ref, bfeat_ref, fc3_ref, fcb3_ref,
                 pool_ref, expand_ref, mean_ref, wsp_ref, erow_ref,
                 wfold_ref, mask_ref, o_ref, xs_ref, sp_ref, *, C, W):
    f32 = jnp.float32
    x = x_ref[0]                               # (C, NBHW) — nb images folded into lanes
    nbhw = x.shape[1]
    nb = pool_ref.shape[1]

    # ---------------- FeatureExtraction: 1x1 + 3x3 + 5x5 fused ------------------
    # Stack the 25 shifted+masked copies of x into VMEM scratch, then ONE big
    # (3C, 25C) x (25C, NBHW) MXU matmul produces all three branches at once.
    for dh in range(5):
        for dw in range(5):
            tap = dh * 5 + dw
            d = (dh - 2) * W + (dw - 2)
            if d == 0:
                xs_ref[tap * C:(tap + 1) * C, :] = x
            else:
                xs_ref[tap * C:(tap + 1) * C, :] = (
                    jnp.roll(x, -d, axis=1)
                    * mask_ref[_M5_OFF + tap:_M5_OFF + tap + 1, :])
    f_all = jax.nn.sigmoid(
        jnp.dot(wfeat_ref[...], xs_ref[...], preferred_element_type=f32)
        + bfeat_ref[...])                      # (3C, NBHW), rows [L | M | S]

    # ---------------- ChannelAttention (shared fc, 3 branches at once) ----------
    if nb == 1:
        pooled = jnp.mean(f_all, axis=1, keepdims=True)                  # (3C, 1)
        ca = jax.nn.sigmoid(
            jnp.dot(fc3_ref[...], pooled, preferred_element_type=f32) + fcb3_ref[...])
        g_all = f_all * ca
    else:
        # per-image GAP / broadcast via tiny host-built matrices (no reshapes)
        pooled = jnp.dot(f_all, pool_ref[...], preferred_element_type=f32)   # (3C, nb)
        ca = jax.nn.sigmoid(
            jnp.dot(fc3_ref[...], pooled, preferred_element_type=f32) + fcb3_ref[...])
        g_all = f_all * jnp.dot(ca, expand_ref[...], preferred_element_type=f32)

    # ---------------- SpatialAttention (shared 7x7, 3 branches batched) ---------
    mean3 = jnp.dot(mean_ref[...], g_all, preferred_element_type=f32)    # (3, NBHW)
    max_l = jnp.max(g_all[0:C], axis=0, keepdims=True)
    max_m = jnp.max(g_all[C:2 * C], axis=0, keepdims=True)
    max_s = jnp.max(g_all[2 * C:3 * C], axis=0, keepdims=True)
    mm8 = jnp.concatenate(
        [mean3, max_l, max_m, max_s, jnp.zeros((2, nbhw), f32)], axis=0)  # (8, NBHW)
    for dh in range(7):
        for dw in range(7):
            tap = dh * 7 + dw
            d = (dh - 3) * W + (dw - 3)
            if d == 0:
                sp_ref[tap * 8:(tap + 1) * 8, :] = mm8
            else:
                sp_ref[tap * 8:(tap + 1) * 8, :] = (
                    jnp.roll(mm8, -d, axis=1)
                    * mask_ref[_M7_OFF + tap:_M7_OFF + tap + 1, :])
    sa = jax.nn.sigmoid(
        jnp.dot(wsp_ref[...], sp_ref[...], preferred_element_type=f32))  # (3, NBHW): L,M,S

    # ---------------- Weight module (ww @ wc folded on host) + final sigmoid ----
    sa_rep = jnp.dot(erow_ref[...], sa, preferred_element_type=f32)      # (3C, NBHW)
    a_all = g_all * sa_rep                                               # rows [L | M | S]
    wlog = jnp.dot(wfold_ref[...], a_all, preferred_element_type=f32)    # (3, NBHW): S,M,L
    mx = jnp.max(wlog, axis=0, keepdims=True)
    e = jnp.exp(wlog - mx)
    # exact divide (pl.reciprocal(approx=True) would risk the 2e-4 tolerance)
    wn = e / jnp.sum(e, axis=0, keepdims=True)
    out = (wn[0:1, :] * a_all[2 * C:3 * C]
           + wn[1:2, :] * a_all[C:2 * C]
           + wn[2:3, :] * a_all[0:C])
    o_ref[0] = jax.nn.sigmoid(out).astype(o_ref.dtype)


def _tap_masks(H, W, k):
    """(k*k, H*W) f32 validity masks for roll-based conv taps (zero-pad emulation)."""
    p = (k - 1) // 2
    r = np.arange(H).reshape(H, 1)
    s = np.arange(W).reshape(1, W)
    rows = []
    for dh in range(k):
        for dw in range(k):
            dy, dx = dh - p, dw - p
            ok = ((r + dy >= 0) & (r + dy < H) &
                  (s + dx >= 0) & (s + dx < W))
            rows.append(ok.astype(np.float32).reshape(H * W))
    return np.stack(rows, axis=0)


def _pick_batch_block(N, C, HW, vmem_budget_bytes=24 << 20):
    """Images folded into the lane axis per grid step.  Capped at N//2 so the grid
    has length >= 2 (keeps both TensorCores busy on v7x); sized against a ~24 MiB
    working-set budget (safe on v7x's 64 MiB / 32 MiB-scoped VMEM)."""
    per_image = (4 * C + 25 * C + 49 * 8 + 74) * HW * 4   # blocks + scratch + masks
    cap = N // 2 if N >= 2 else 1
    nb = int(max(1, min(cap, 8, vmem_budget_bytes // max(per_image, 1))))
    while N % nb:
        nb -= 1
    return nb


def csfa_pallas(x_nchw, p):
    """x_nchw: (N, C, H, W) f32; p: dict of PyTorch-shaped CSFA parameters."""
    N, C, H, W = x_nchw.shape
    assert C % 8 == 0, "C must be a multiple of 8 (sublane-aligned branch blocks)"
    HW = H * W
    CR = int(np.asarray(p["wc1_w"]).shape[0])
    f32 = jnp.float32

    nb = _pick_batch_block(N, C, HW)
    G = N // nb
    nbhw = nb * HW

    # ---- fused feature conv weights: (3C, 25C), rows [L | M | S] ----
    wL = np.asarray(p["fL_w"], np.float32).reshape(C, C)
    wM = np.asarray(p["fM_w"], np.float32)
    wS = np.asarray(p["fS_w"], np.float32)
    wfeat = np.zeros((3 * C, 25 * C), np.float32)
    for dh in range(5):
        for dw in range(5):
            tap = dh * 5 + dw
            cols = slice(tap * C, (tap + 1) * C)
            if dh == 2 and dw == 2:
                wfeat[0:C, cols] = wL                       # 1x1 L folded into center tap
            if 1 <= dh <= 3 and 1 <= dw <= 3:
                wfeat[C:2 * C, cols] = wM[:, :, dh - 1, dw - 1]
            wfeat[2 * C:3 * C, cols] = wS[:, :, dh, dw]
    bfeat = np.concatenate([np.asarray(p["fL_b"], np.float32),
                            np.asarray(p["fM_b"], np.float32),
                            np.asarray(p["fS_b"], np.float32)]).reshape(3 * C, 1)

    # ---- shared channel attention: block-diagonal over the 3 branches ----
    fcw = np.asarray(p["ca_w"], np.float32).reshape(C, C)
    fcb = np.asarray(p["ca_b"], np.float32).reshape(C, 1)
    fc3 = np.zeros((3 * C, 3 * C), np.float32)
    for br in range(3):
        fc3[br * C:(br + 1) * C, br * C:(br + 1) * C] = fcw
    fcb3 = np.tile(fcb, (3, 1))

    # ---- per-image GAP / broadcast matrices (batch folded into lanes) ----
    pool = np.zeros((nbhw, nb), np.float32)
    expand = np.zeros((nb, nbhw), np.float32)
    for n in range(nb):
        pool[n * HW:(n + 1) * HW, n] = 1.0 / HW
        expand[n, n * HW:(n + 1) * HW] = 1.0

    # ---- per-branch channel-mean matrix for SpatialAttention ----
    mean_mat = np.zeros((3, 3 * C), np.float32)
    for br in range(3):
        mean_mat[br, br * C:(br + 1) * C] = 1.0 / C

    # ---- shared 7x7 spatial conv, stacked (3, 49*8) over 8-row tap blocks ----
    saw = np.asarray(p["sa_w"], np.float32).reshape(2, 7, 7)
    wsp = np.zeros((3, 49 * 8), np.float32)
    for dh in range(7):
        for dw in range(7):
            tap = dh * 7 + dw
            for br in range(3):
                wsp[br, tap * 8 + br] = saw[0, dh, dw]          # channel-mean weight
                wsp[br, tap * 8 + 3 + br] = saw[1, dh, dw]      # channel-max weight

    # ---- sublane expansion of the (3, HW) spatial gate to (3C, HW) ----
    erow = np.zeros((3 * C, 3), np.float32)
    for br in range(3):
        erow[br * C:(br + 1) * C, br] = 1.0

    # ---- Weight module: ww @ wc folded on host (exact) -> (3, 3C) over [L|M|S] ----
    folds = []
    for kc, kw in (("wc1_w", "ww1_w"), ("wc2_w", "ww2_w"), ("wc3_w", "ww3_w")):
        folds.append(np.asarray(p[kw], np.float32).reshape(1, CR)
                     @ np.asarray(p[kc], np.float32).reshape(CR, C))
    wfold = np.zeros((3, 3 * C), np.float32)
    wfold[0, 2 * C:3 * C] = folds[0]    # S logit from a_S block
    wfold[1, C:2 * C] = folds[1]        # M logit from a_M block
    wfold[2, 0:C] = folds[2]            # L logit from a_L block

    # ---- roll-tap validity masks, tiled across the batch fold (also kills
    #      cross-image bleed from lane rolls) ----
    masks = np.tile(
        np.concatenate([_tap_masks(H, W, 5), _tap_masks(H, W, 7)], axis=0), (1, nb))

    # fold nb images into the lane axis: (G, C, nb*HW), lane-dense output slab
    x_lanes = (jnp.asarray(x_nchw, f32).reshape(G, nb, C, HW)
               .transpose(0, 2, 1, 3).reshape(G, C, nbhw))

    out = pl.pallas_call(
        functools.partial(_csfa_kernel, C=C, W=W),
        out_shape=jax.ShapeDtypeStruct((G, C, nbhw), f32),
        grid_spec=pltpu.PrefetchScalarGridSpec(
            num_scalar_prefetch=0,
            grid=(G,),
            in_specs=[
                pl.BlockSpec((1, C, nbhw), lambda b: (b, 0, 0)),       # x
                pl.BlockSpec((3 * C, 25 * C), lambda b: (0, 0)),       # wfeat
                pl.BlockSpec((3 * C, 1), lambda b: (0, 0)),            # bfeat
                pl.BlockSpec((3 * C, 3 * C), lambda b: (0, 0)),        # fc3
                pl.BlockSpec((3 * C, 1), lambda b: (0, 0)),            # fcb3
                pl.BlockSpec((nbhw, nb), lambda b: (0, 0)),            # pool
                pl.BlockSpec((nb, nbhw), lambda b: (0, 0)),            # expand
                pl.BlockSpec((3, 3 * C), lambda b: (0, 0)),            # mean_mat
                pl.BlockSpec((3, 49 * 8), lambda b: (0, 0)),           # wsp
                pl.BlockSpec((3 * C, 3), lambda b: (0, 0)),            # erow
                pl.BlockSpec((3, 3 * C), lambda b: (0, 0)),            # wfold
                pl.BlockSpec((25 + 49, nbhw), lambda b: (0, 0)),       # masks
            ],
            out_specs=pl.BlockSpec((1, C, nbhw), lambda b: (b, 0, 0)),
            scratch_shapes=[
                pltpu.VMEM((25 * C, nbhw), f32),     # stacked feature-conv taps
                pltpu.VMEM((49 * 8, nbhw), f32),     # stacked 7x7 spatial taps
            ],
        ),
        compiler_params=pltpu.CompilerParams(
            dimension_semantics=("parallel",),
            vmem_limit_bytes=32 << 20),
    )(x_lanes, jnp.asarray(wfeat), jnp.asarray(bfeat), jnp.asarray(fc3),
      jnp.asarray(fcb3), jnp.asarray(pool), jnp.asarray(expand),
      jnp.asarray(mean_mat), jnp.asarray(wsp), jnp.asarray(erow),
      jnp.asarray(wfold), jnp.asarray(masks))

    return (out.reshape(G, C, nb, HW).transpose(0, 2, 1, 3)
            .reshape(N, C, H, W))


# ----------------------------- pure-JAX reference -----------------------------
def _conv_nchw(x, w, b=None, pad=0):
    y = jax.lax.conv_general_dilated(
        x, w, window_strides=(1, 1), padding=((pad, pad), (pad, pad)),
        dimension_numbers=("NCHW", "OIHW", "NCHW"))
    if b is not None:
        y = y + b[None, :, None, None]
    return y


def csfa_reference(x, p):
    def feature(xx, w, b):
        k = w.shape[-1]
        return jax.nn.sigmoid(_conv_nchw(xx, w, b, (k - 1) // 2))

    def channel_attention(xx):
        pooled = jnp.mean(xx, axis=(2, 3), keepdims=True)
        return xx * jax.nn.sigmoid(_conv_nchw(pooled, p["ca_w"], p["ca_b"]))

    def spatial_attention(xx):
        mc = jnp.mean(xx, axis=1, keepdims=True)
        xc = jnp.max(xx, axis=1, keepdims=True)
        s = _conv_nchw(jnp.concatenate([mc, xc], axis=1), p["sa_w"], None, 3)
        return xx * jax.nn.sigmoid(s)

    def branch(w, b):
        return spatial_attention(channel_attention(feature(x, w, b)))

    x_L = branch(p["fL_w"], p["fL_b"])
    x_M = branch(p["fM_w"], p["fM_b"])
    x_S = branch(p["fS_w"], p["fS_b"])

    r1 = _conv_nchw(x_S, p["wc1_w"])
    r2 = _conv_nchw(x_M, p["wc2_w"])
    r3 = _conv_nchw(x_L, p["wc3_w"])
    w1 = _conv_nchw(r1, p["ww1_w"])
    w2 = _conv_nchw(r2, p["ww2_w"])
    w3 = _conv_nchw(r3, p["ww3_w"])
    wt = jax.nn.softmax(jnp.concatenate([w1, w2, w3], axis=1), axis=1)
    out = wt[:, 0:1] * x_S + wt[:, 1:2] * x_M + wt[:, 2:3] * x_L
    return jax.nn.sigmoid(out)


if __name__ == "__main__":
    # C must be a multiple of 8 so the Weight module's C // reduction_ratio >= 1.
    N, C, H, W = 2, 8, 16, 16
    CR = C // 8

    key = jax.random.PRNGKey(0)
    keys = jax.random.split(key, 16)

    def rnd(k, shape, scale=0.25):
        return scale * jax.random.normal(k, shape, jnp.float32)

    x = jax.random.normal(keys[0], (N, C, H, W), jnp.float32)

    params = {
        "fL_w": rnd(keys[1], (C, C, 1, 1)),
        "fL_b": rnd(keys[2], (C,), 0.1),
        "fM_w": rnd(keys[3], (C, C, 3, 3)),
        "fM_b": rnd(keys[4], (C,), 0.1),
        "fS_w": rnd(keys[5], (C, C, 5, 5), 0.1),
        "fS_b": rnd(keys[6], (C,), 0.1),
        "ca_w": rnd(keys[7], (C, C, 1, 1)),
        "ca_b": rnd(keys[8], (C,), 0.1),
        "sa_w": rnd(keys[9], (1, 2, 7, 7), 0.1),
        "wc1_w": rnd(keys[10], (CR, C, 1, 1)),
        "wc2_w": rnd(keys[11], (CR, C, 1, 1)),
        "wc3_w": rnd(keys[12], (CR, C, 1, 1)),
        "ww1_w": rnd(keys[13], (1, CR, 1, 1)),
        "ww2_w": rnd(keys[14], (1, CR, 1, 1)),
        "ww3_w": rnd(keys[15], (1, CR, 1, 1)),
    }

    out = csfa_pallas(x, params)
    out = jax.block_until_ready(out)

    ref = csfa_reference(x, params)
    assert out.shape == (N, C, H, W)
    err = float(jnp.max(jnp.abs(out - ref)))
    assert jnp.allclose(out, ref, rtol=2e-4, atol=2e-4), f"max abs err = {err}"

    print("KERNEL_OK")
</pallas_src>

<mosaic_0001>
module attributes {stable_mosaic.version = 11 : i64} {
  func.func @_csfa_kernel(%arg0: i32, %arg1: memref<1x8x256xf32, #tpu.memory_space<vmem>>, %arg2: memref<24x200xf32, #tpu.memory_space<vmem>>, %arg3: memref<24x1xf32, #tpu.memory_space<vmem>>, %arg4: memref<24x24xf32, #tpu.memory_space<vmem>>, %arg5: memref<24x1xf32, #tpu.memory_space<vmem>>, %arg6: memref<256x1xf32, #tpu.memory_space<vmem>>, %arg7: memref<1x256xf32, #tpu.memory_space<vmem>>, %arg8: memref<3x24xf32, #tpu.memory_space<vmem>>, %arg9: memref<3x392xf32, #tpu.memory_space<vmem>>, %arg10: memref<24x3xf32, #tpu.memory_space<vmem>>, %arg11: memref<3x24xf32, #tpu.memory_space<vmem>>, %arg12: memref<74x256xf32, #tpu.memory_space<vmem>>, %arg13: memref<1x8x256xf32, #tpu.memory_space<vmem>>, %arg14: memref<200x256xf32, #tpu.memory_space<vmem>>, %arg15: memref<392x256xf32, #tpu.memory_space<vmem>>) attributes {dimension_semantics = [#tpu.dimension_semantics<parallel>], iteration_bounds = array<i64: 2>, scalar_prefetch = 0 : i64, scratch_operands = 2 : i64, tpu.core_type = #tpu.core_type<tc>, window_params = [{transform_indices = @transform_0, window_bounds = array<i64: 1, 8, 256>}, {pipeline_mode = #tpu.pipeline_mode<synchronous>, transform_indices = @transform_1, window_bounds = array<i64: 24, 200>}, {pipeline_mode = #tpu.pipeline_mode<synchronous>, transform_indices = @transform_2, window_bounds = array<i64: 24, 1>}, {pipeline_mode = #tpu.pipeline_mode<synchronous>, transform_indices = @transform_3, window_bounds = array<i64: 24, 24>}, {pipeline_mode = #tpu.pipeline_mode<synchronous>, transform_indices = @transform_4, window_bounds = array<i64: 24, 1>}, {pipeline_mode = #tpu.pipeline_mode<synchronous>, transform_indices = @transform_5, window_bounds = array<i64: 256, 1>}, {pipeline_mode = #tpu.pipeline_mode<synchronous>, transform_indices = @transform_6, window_bounds = array<i64: 1, 256>}, {pipeline_mode = #tpu.pipeline_mode<synchronous>, transform_indices = @transform_7, window_bounds = array<i64: 3, 24>}, {pipeline_mode = #tpu.pipeline_mode<synchronous>, transform_indices = @transform_8, window_bounds = array<i64: 3, 392>}, {pipeline_mode = #tpu.pipeline_mode<synchronous>, transform_indices = @transform_9, window_bounds = array<i64: 24, 3>}, {pipeline_mode = #tpu.pipeline_mode<synchronous>, transform_indices = @transform_10, window_bounds = array<i64: 3, 24>}, {pipeline_mode = #tpu.pipeline_mode<synchronous>, transform_indices = @transform_11, window_bounds = array<i64: 74, 256>}, {transform_indices = @transform_12, window_bounds = array<i64: 1, 8, 256>}]} {
    %c0 = arith.constant 0 : index
    %c0_0 = arith.constant 0 : index
    %c0_1 = arith.constant 0 : index
    %0 = vector.load %arg1[%c0, %c0_0, %c0_1] : memref<1x8x256xf32, #tpu.memory_space<vmem>>, vector<1x8x256xf32>
    %1 = vector.shape_cast %0 : vector<1x8x256xf32> to vector<8x256xf32>
    %2 = vector.extract_strided_slice %1 {offsets = [0, 222], sizes = [8, 34], strides = [1, 1]} : vector<8x256xf32> to vector<8x34xf32>
    %3 = vector.extract_strided_slice %1 {offsets = [0, 0], sizes = [8, 222], strides = [1, 1]} : vector<8x256xf32> to vector<8x222xf32>
    %4 = tpu.concatenate %2, %3 in 1 : vector<8x34xf32>, vector<8x222xf32> -> vector<8x256xf32>
    %c0_2 = arith.constant 0 : index
    %c0_3 = arith.constant 0 : index
    %5 = vector.load %arg12[%c0_2, %c0_3] : memref<74x256xf32, #tpu.memory_space<vmem>>, vector<1x256xf32>
    %6 = vector.broadcast %5 : vector<1x256xf32> to vector<8x256xf32>
    %7 = arith.mulf %4, %6 : vector<8x256xf32>
    %c0_4 = arith.constant 0 : index
    %c0_5 = arith.constant 0 : index
    %8 = vector.load %arg14[%c0_4, %c0_5] : memref<200x256xf32, #tpu.memory_space<vmem>>, vector<8x256xf32>
    tpu.vector_store %arg14[%c0_4, %c0_5], %7 {strides = array<i32>} : memref<200x256xf32, #tpu.memory_space<vmem>>, vector<8x256xf32>,
    %9 = vector.extract_strided_slice %1 {offsets = [0, 223], sizes = [8, 33], strides = [1, 1]} : vector<8x256xf32> to vector<8x33xf32>
    %10 = vector.extract_strided_slice %1 {offsets = [0, 0], sizes = [8, 223], strides = [1, 1]} : vector<8x256xf32> to vector<8x223xf32>
    %11 = tpu.concatenate %9, %10 in 1 : vector<8x33xf32>, vector<8x223xf32> -> vector<8x256xf32>
    %c1 = arith.constant 1 : index
    %c0_6 = arith.constant 0 : index
    %12 = vector.load %arg12[%c1, %c0_6] : memref<74x256xf32, #tpu.memory_space<vmem>>, vector<1x256xf32>
    %13 = vector.broadcast %12 : vector<1x256xf32> to vector<8x256xf32>
    %14 = arith.mulf %11, %13 : vector<8x256xf32>
    %c8 = arith.constant 8 : index
    %c0_7 = arith.constant 0 : index
    %15 = vector.load %arg14[%c8, %c0_7] : memref<200x256xf32, #tpu.memory_space<vmem>>, vector<8x256xf32>
    tpu.vector_store %arg14[%c8, %c0_7], %14 {strides = array<i32>} : memref<200x256xf32, #tpu.memory_space<vmem>>, vector<8x256xf32>,
    %16 = vector.extract_strided_slice %1 {offsets = [0, 224], sizes = [8, 32], strides = [1, 1]} : vector<8x256xf32> to vector<8x32xf32>
    %17 = vector.extract_strided_slice %1 {offsets = [0, 0], sizes = [8, 224], strides = [1, 1]} : vector<8x256xf32> to vector<8x224xf32>
    %18 = tpu.concatenate %16, %17 in 1 : vector<8x32xf32>, vector<8x224xf32> -> vector<8x256xf32>
    %c2 = arith.constant 2 : index
    %c0_8 = arith.constant 0 : index
    %19 = vector.load %arg12[%c2, %c0_8] : memref<74x256xf32, #tpu.memory_space<vmem>>, vector<1x256xf32>
    %20 = vector.broadcast %19 : vector<1x256xf32> to vector<8x256xf32>
    %21 = arith.mulf %18, %20 : vector<8x256xf32>
    %c16 = arith.constant 16 : index
    %c0_9 = arith.constant 0 : index
    %22 = vector.load %arg14[%c16, %c0_9] : memref<200x256xf32, #tpu.memory_space<vmem>>, vector<8x256xf32>
    tpu.vector_store %arg14[%c16, %c0_9], %21 {strides = array<i32>} : memref<200x256xf32, #tpu.memory_space<vmem>>, vector<8x256xf32>,
    %23 = vector.extract_strided_slice %1 {offsets = [0, 225], sizes = [8, 31], strides = [1, 1]} : vector<8x256xf32> to vector<8x31xf32>
    %24 = vector.extract_strided_slice %1 {offsets = [0, 0], sizes = [8, 225], strides = [1, 1]} : vector<8x256xf32> to vector<8x225xf32>
    %25 = tpu.concatenate %23, %24 in 1 : vector<8x31xf32>, vector<8x225xf32> -> vector<8x256xf32>
    %c3 = arith.constant 3 : index
    %c0_10 = arith.constant 0 : index
    %26 = vector.load %arg12[%c3, %c0_10] : memref<74x256xf32, #tpu.memory_space<vmem>>, vector<1x256xf32>
    %27 = vector.broadcast %26 : vector<1x256xf32> to vector<8x256xf32>
    %28 = arith.mulf %25, %27 : vector<8x256xf32>
    %c24 = arith.constant 24 : index
    %c0_11 = arith.constant 0 : index
    %29 = vector.load %arg14[%c24, %c0_11] : memref<200x256xf32, #tpu.memory_space<vmem>>, vector<8x256xf32>
    tpu.vector_store %arg14[%c24, %c0_11], %28 {strides = array<i32>} : memref<200x256xf32, #tpu.memory_space<vmem>>, vector<8x256xf32>,
    %30 = vector.extract_strided_slice %1 {offsets = [0, 226], sizes = [8, 30], strides = [1, 1]} : vector<8x256xf32> to vector<8x30xf32>
    %31 = vector.extract_strided_slice %1 {offsets = [0, 0], sizes = [8, 226], strides = [1, 1]} : vector<8x256xf32> to vector<8x226xf32>
    %32 = tpu.concatenate %30, %31 in 1 : vector<8x30xf32>, vector<8x226xf32> -> vector<8x256xf32>
    %c4 = arith.constant 4 : index
    %c0_12 = arith.constant 0 : index
    %33 = vector.load %arg12[%c4, %c0_12] : memref<74x256xf32, #tpu.memory_space<vmem>>, vector<1x256xf32>
    %34 = vector.broadcast %33 : vector<1x256xf32> to vector<8x256xf32>
    %35 = arith.mulf %32, %34 : vector<8x256xf32>
    %c32 = arith.constant 32 : index
    %c0_13 = arith.constant 0 : index
    %36 = vector.load %arg14[%c32, %c0_13] : memref<200x256xf32, #tpu.memory_space<vmem>>, vector<8x256xf32>
    tpu.vector_store %arg14[%c32, %c0_13], %35 {strides = array<i32>} : memref<200x256xf32, #tpu.memory_space<vmem>>, vector<8x256xf32>,
    %37 = vector.extract_strided_slice %1 {offsets = [0, 238], sizes = [8, 18], strides = [1, 1]} : vector<8x256xf32> to vector<8x18xf32>
    %38 = vector.extract_strided_slice %1 {offsets = [0, 0], sizes = [8, 238], strides = [1, 1]} : vector<8x256xf32> to vector<8x238xf32>
    %39 = tpu.concatenate %37, %38 in 1 : vector<8x18xf32>, vector<8x238xf32> -> vector<8x256xf32>
    %c5 = arith.constant 5 : index
    %c0_14 = arith.constant 0 : index
    %40 = vector.load %arg12[%c5, %c0_14] : memref<74x256xf32, #tpu.memory_space<vmem>>, vector<1x256xf32>
    %41 = vector.broadcast %40 : vector<1x256xf32> to vector<8x256xf32>
    %42 = arith.mulf %39, %41 : vector<8x256xf32>
    %c40 = arith.constant 40 : index
    %c0_15 = arith.constant 0 : index
    %43 = vector.load %arg14[%c40, %c0_15] : memref<200x256xf32, #tpu.memory_space<vmem>>, vector<8x256xf32>
    tpu.vector_store %arg14[%c40, %c0_15], %42 {strides = array<i32>} : memref<200x256xf32, #tpu.memory_space<vmem>>, vector<8x256xf32>,
    %44 = vector.extract_strided_slice %1 {offsets = [0, 239], sizes = [8, 17], strides = [1, 1]} : vector<8x256xf32> to vector<8x17xf32>
    %45 = vector.extract_strided_slice %1 {offsets = [0, 0], sizes = [8, 239], strides = [1, 1]} : vector<8x256xf32> to vector<8x239xf32>
    %46 = tpu.concatenate %44, %45 in 1 : vector<8x17xf32>, vector<8x239xf32> -> vector<8x256xf32>
    %c6 = arith.constant 6 : index
    %c0_16 = arith.constant 0 : index
    %47 = vector.load %arg12[%c6, %c0_16] : memref<74x256xf32, #tpu.memory_space<vmem>>, vector<1x256xf32>
    %48 = vector.broadcast %47 : vector<1x256xf32> to vector<8x256xf32>
    %49 = arith.mulf %46, %48 : vector<8x256xf32>
    %c48 = arith.constant 48 : index
    %c0_17 = arith.constant 0 : index
    %50 = vector.load %arg14[%c48, %c0_17] : memref<200x256xf32, #tpu.memory_space<vmem>>, vector<8x256xf32>
    tpu.vector_store %arg14[%c48, %c0_17], %49 {strides = array<i32>} : memref<200x256xf32, #tpu.memory_space<vmem>>, vector<8x256xf32>,
    %51 = vector.extract_strided_slice %1 {offsets = [0, 240], sizes = [8, 16], strides = [1, 1]} : vector<8x256xf32> to vector<8x16xf32>
    %52 = vector.extract_strided_slice %1 {offsets = [0, 0], sizes = [8, 240], strides = [1, 1]} : vector<8x256xf32> to vector<8x240xf32>
    %53 = tpu.concatenate %51, %52 in 1 : vector<8x16xf32>, vector<8x240xf32> -> vector<8x256xf32>
    %c7 = arith.constant 7 : index
    %c0_18 = arith.constant 0 : index
    %54 = vector.load %arg12[%c7, %c0_18] : memref<74x256xf32, #tpu.memory_space<vmem>>, vector<1x256xf32>
    %55 = vector.broadcast %54 : vector<1x256xf32> to vector<8x256xf32>
    %56 = arith.mulf %53, %55 : vector<8x256xf32>
    %c56 = arith.constant 56 : index
    %c0_19 = arith.constant 0 : index
    %57 = vector.load %arg14[%c56, %c0_19] : memref<200x256xf32, #tpu.memory_space<vmem>>, vector<8x256xf32>
    tpu.vector_store %arg14[%c56, %c0_19], %56 {strides = array<i32>} : memref<200x256xf32, #tpu.memory_space<vmem>>, vector<8x256xf32>,
    %58 = vector.extract_strided_slice %1 {offsets = [0, 241], sizes = [8, 15], strides = [1, 1]} : vector<8x256xf32> to vector<8x15xf32>
    %59 = vector.extract_strided_slice %1 {offsets = [0, 0], sizes = [8, 241], strides = [1, 1]} : vector<8x256xf32> to vector<8x241xf32>
    %60 = tpu.concatenate %58, %59 in 1 : vector<8x15xf32>, vector<8x241xf32> -> vector<8x256xf32>
    %c8_20 = arith.constant 8 : index
    %c0_21 = arith.constant 0 : index
    %61 = vector.load %arg12[%c8_20, %c0_21] : memref<74x256xf32, #tpu.memory_space<vmem>>, vector<1x256xf32>
    %62 = vector.broadcast %61 : vector<1x256xf32> to vector<8x256xf32>
    %63 = arith.mulf %60, %62 : vector<8x256xf32>
    %c64 = arith.constant 64 : index
    %c0_22 = arith.constant 0 : index
    %64 = vector.load %arg14[%c64, %c0_22] : memref<200x256xf32, #tpu.memory_space<vmem>>, vector<8x256xf32>
    tpu.vector_store %arg14[%c64, %c0_22], %63 {strides = array<i32>} : memref<200x256xf32, #tpu.memory_space<vmem>>, vector<8x256xf32>,
    %65 = vector.extract_strided_slice %1 {offsets = [0, 242], sizes = [8, 14], strides = [1, 1]} : vector<8x256xf32> to vector<8x14xf32>
    %66 = vector.extract_strided_slice %1 {offsets = [0, 0], sizes = [8, 242], strides = [1, 1]} : vector<8x256xf32> to vector<8x242xf32>
    %67 = tpu.concatenate %65, %66 in 1 : vector<8x14xf32>, vector<8x242xf32> -> vector<8x256xf32>
    %c9 = arith.constant 9 : index
    %c0_23 = arith.constant 0 : index
    %68 = vector.load %arg12[%c9, %c0_23] : memref<74x256xf32, #tpu.memory_space<vmem>>, vector<1x256xf32>
    %69 = vector.broadcast %68 : vector<1x256xf32> to vector<8x256xf32>
    %70 = arith.mulf %67, %69 : vector<8x256xf32>
    %c72 = arith.constant 72 : index
    %c0_24 = arith.constant 0 : index
    %71 = vector.load %arg14[%c72, %c0_24] : memref<200x256xf32, #tpu.memory_space<vmem>>, vector<8x256xf32>
    tpu.vector_store %arg14[%c72, %c0_24], %70 {strides = array<i32>} : memref<200x256xf32, #tpu.memory_space<vmem>>, vector<8x256xf32>,
    %72 = vector.extract_strided_slice %1 {offsets = [0, 254], sizes = [8, 2], strides = [1, 1]} : vector<8x256xf32> to vector<8x2xf32>
    %73 = vector.extract_strided_slice %1 {offsets = [0, 0], sizes = [8, 254], strides = [1, 1]} : vector<8x256xf32> to vector<8x254xf32>
    %74 = tpu.concatenate %72, %73 in 1 : vector<8x2xf32>, vector<8x254xf32> -> vector<8x256xf32>
    %c10 = arith.constant 10 : index
    %c0_25 = arith.constant 0 : index
    %75 = vector.load %arg12[%c10, %c0_25] : memref<74x256xf32, #tpu.memory_space<vmem>>, vector<1x256xf32>
    %76 = vector.broadcast %75 : vector<1x256xf32> to vector<8x256xf32>
    %77 = arith.mulf %74, %76 : vector<8x256xf32>
    %c80 = arith.constant 80 : index
    %c0_26 = arith.constant 0 : index
    %78 = vector.load %arg14[%c80, %c0_26] : memref<200x256xf32, #tpu.memory_space<vmem>>, vector<8x256xf32>
    tpu.vector_store %arg14[%c80, %c0_26], %77 {strides = array<i32>} : memref<200x256xf32, #tpu.memory_space<vmem>>, vector<8x256xf32>,
    %79 = vector.extract_strided_slice %1 {offsets = [0, 255], sizes = [8, 1], strides = [1, 1]} : vector<8x256xf32> to vector<8x1xf32>
    %80 = vector.extract_strided_slice %1 {offsets = [0, 0], sizes = [8, 255], strides = [1, 1]} : vector<8x256xf32> to vector<8x255xf32>
    %81 = tpu.concatenate %79, %80 in 1 : vector<8x1xf32>, vector<8x255xf32> -> vector<8x256xf32>
    %c11 = arith.constant 11 : index
    %c0_27 = arith.constant 0 : index
    %82 = vector.load %arg12[%c11, %c0_27] : memref<74x256xf32, #tpu.memory_space<vmem>>, vector<1x256xf32>
    %83 = vector.broadcast %82 : vector<1x256xf32> to vector<8x256xf32>
    %84 = arith.mulf %81, %83 : vector<8x256xf32>
    %c88 = arith.constant 88 : index
    %c0_28 = arith.constant 0 : index
    %85 = vector.load %arg14[%c88, %c0_28] : memref<200x256xf32, #tpu.memory_space<vmem>>, vector<8x256xf32>
    tpu.vector_store %arg14[%c88, %c0_28], %84 {strides = array<i32>} : memref<200x256xf32, #tpu.memory_space<vmem>>, vector<8x256xf32>,
    %c96 = arith.constant 96 : index
    %c0_29 = arith.constant 0 : index
    %86 = vector.load %arg14[%c96, %c0_29] : memref<200x256xf32, #tpu.memory_space<vmem>>, vector<8x256xf32>
    tpu.vector_store %arg14[%c96, %c0_29], %1 {strides = array<i32>} : memref<200x256xf32, #tpu.memory_space<vmem>>, vector<8x256xf32>,
    %87 = vector.extract_strided_slice %1 {offsets = [0, 1], sizes = [8, 255], strides = [1, 1]} : vector<8x256xf32> to vector<8x255xf32>
    %88 = vector.extract_strided_slice %1 {offsets = [0, 0], sizes = [8, 1], strides = [1, 1]} : vector<8x256xf32> to vector<8x1xf32>
    %89 = tpu.concatenate %87, %88 in 1 : vector<8x255xf32>, vector<8x1xf32> -> vector<8x256xf32>
    %c13 = arith.constant 13 : index
    %c0_30 = arith.constant 0 : index
    %90 = vector.load %arg12[%c13, %c0_30] : memref<74x256xf32, #tpu.memory_space<vmem>>, vector<1x256xf32>
    %91 = vector.broadcast %90 : vector<1x256xf32> to vector<8x256xf32>
    %92 = arith.mulf %89, %91 : vector<8x256xf32>
    %c104 = arith.constant 104 : index
    %c0_31 = arith.constant 0 : index
    %93 = vector.load %arg14[%c104, %c0_31] : memref<200x256xf32, #tpu.memory_space<vmem>>, vector<8x256xf32>
    tpu.vector_store %arg14[%c104, %c0_31], %92 {strides = array<i32>} : memref<200x256xf32, #tpu.memory_space<vmem>>, vector<8x256xf32>,
    %94 = vector.extract_strided_slice %1 {offsets = [0, 2], sizes = [8, 254], strides = [1, 1]} : vector<8x256xf32> to vector<8x254xf32>
    %95 = vector.extract_strided_slice %1 {offsets = [0, 0], sizes = [8, 2], strides = [1, 1]} : vector<8x256xf32> to vector<8x2xf32>
    %96 = tpu.concatenate %94, %95 in 1 : vector<8x254xf32>, vector<8x2xf32> -> vector<8x256xf32>
    %c14 = arith.constant 14 : index
    %c0_32 = arith.constant 0 : index
    %97 = vector.load %arg12[%c14, %c0_32] : memref<74x256xf32, #tpu.memory_space<vmem>>, vector<1x256xf32>
    %98 = vector.broadcast %97 : vector<1x256xf32> to vector<8x256xf32>
    %99 = arith.mulf %96, %98 : vector<8x256xf32>
    %c112 = arith.constant 112 : index
    %c0_33 = arith.constant 0 : index
    %100 = vector.load %arg14[%c112, %c0_33] : memref<200x256xf32, #tpu.memory_space<vmem>>, vector<8x256xf32>
    tpu.vector_store %arg14[%c112, %c0_33], %99 {strides = array<i32>} : memref<200x256xf32, #tpu.memory_space<vmem>>, vector<8x256xf32>,
    %101 = vector.extract_strided_slice %1 {offsets = [0, 14], sizes = [8, 242], strides = [1, 1]} : vector<8x256xf32> to vector<8x242xf32>
    %102 = vector.extract_strided_slice %1 {offsets = [0, 0], sizes = [8, 14], strides = [1, 1]} : vector<8x256xf32> to vector<8x14xf32>
    %103 = tpu.concatenate %101, %102 in 1 : vector<8x242xf32>, vector<8x14xf32> -> vector<8x256xf32>
    %c15 = arith.constant 15 : index
    %c0_34 = arith.constant 0 : index
    %104 = vector.load %arg12[%c15, %c0_34] : memref<74x256xf32, #tpu.memory_space<vmem>>, vector<1x256xf32>
    %105 = vector.broadcast %104 : vector<1x256xf32> to vector<8x256xf32>
    %106 = arith.mulf %103, %105 : vector<8x256xf32>
    %c120 = arith.constant 120 : index
    %c0_35 = arith.constant 0 : index
    %107 = vector.load %arg14[%c120, %c0_35] : memref<200x256xf32, #tpu.memory_space<vmem>>, vector<8x256xf32>
    tpu.vector_store %arg14[%c120, %c0_35], %106 {strides = array<i32>} : memref<200x256xf32, #tpu.memory_space<vmem>>, vector<8x256xf32>,
    %108 = vector.extract_strided_slice %1 {offsets = [0, 15], sizes = [8, 241], strides = [1, 1]} : vector<8x256xf32> to vector<8x241xf32>
    %109 = vector.extract_strided_slice %1 {offsets = [0, 0], sizes = [8, 15], strides = [1, 1]} : vector<8x256xf32> to vector<8x15xf32>
    %110 = tpu.concatenate %108, %109 in 1 : vector<8x241xf32>, vector<8x15xf32> -> vector<8x256xf32>
    %c16_36 = arith.constant 16 : index
    %c0_37 = arith.constant 0 : index
    %111 = vector.load %arg12[%c16_36, %c0_37] : memref<74x256xf32, #tpu.memory_space<vmem>>, vector<1x256xf32>
    %112 = vector.broadcast %111 : vector<1x256xf32> to vector<8x256xf32>
    %113 = arith.mulf %110, %112 : vector<8x256xf32>
    %c128 = arith.constant 128 : index
    %c0_38 = arith.constant 0 : index
    %114 = vector.load %arg14[%c128, %c0_38] : memref<200x256xf32, #tpu.memory_space<vmem>>, vector<8x256xf32>
    tpu.vector_store %arg14[%c128, %c0_38], %113 {strides = array<i32>} : memref<200x256xf32, #tpu.memory_space<vmem>>, vector<8x256xf32>,
    %115 = vector.extract_strided_slice %1 {offsets = [0, 16], sizes = [8, 240], strides = [1, 1]} : vector<8x256xf32> to vector<8x240xf32>
    %116 = vector.extract_strided_slice %1 {offsets = [0, 0], sizes = [8, 16], strides = [1, 1]} : vector<8x256xf32> to vector<8x16xf32>
    %117 = tpu.concatenate %115, %116 in 1 : vector<8x240xf32>, vector<8x16xf32> -> vector<8x256xf32>
    %c17 = arith.constant 17 : index
    %c0_39 = arith.constant 0 : index
    %118 = vector.load %arg12[%c17, %c0_39] : memref<74x256xf32, #tpu.memory_space<vmem>>, vector<1x256xf32>
    %119 = vector.broadcast %118 : vector<1x256xf32> to vector<8x256xf32>
    %120 = arith.mulf %117, %119 : vector<8x256xf32>
    %c136 = arith.constant 136 : index
    %c0_40 = arith.constant 0 : index
    %121 = vector.load %arg14[%c136, %c0_40] : memref<200x256xf32, #tpu.memory_space<vmem>>, vector<8x256xf32>
    tpu.vector_store %arg14[%c136, %c0_40], %120 {strides = array<i32>} : memref<200x256xf32, #tpu.memory_space<vmem>>, vector<8x256xf32>,
    %122 = vector.extract_strided_slice %1 {offsets = [0, 17], sizes = [8, 239], strides = [1, 1]} : vector<8x256xf32> to vector<8x239xf32>
    %123 = vector.extract_strided_slice %1 {offsets = [0, 0], sizes = [8, 17], strides = [1, 1]} : vector<8x256xf32> to vector<8x17xf32>
    %124 = tpu.concatenate %122, %123 in 1 : vector<8x239xf32>, vector<8x17xf32> -> vector<8x256xf32>
    %c18 = arith.constant 18 : index
    %c0_41 = arith.constant 0 : index
    %125 = vector.load %arg12[%c18, %c0_41] : memref<74x256xf32, #tpu.memory_space<vmem>>, vector<1x256xf32>
    %126 = vector.broadcast %125 : vector<1x256xf32> to vector<8x256xf32>
    %127 = arith.mulf %124, %126 : vector<8x256xf32>
    %c144 = arith.constant 144 : index
    %c0_42 = arith.constant 0 : index
    %128 = vector.load %arg14[%c144, %c0_42] : memref<200x256xf32, #tpu.memory_space<vmem>>, vector<8x256xf32>
    tpu.vector_store %arg14[%c144, %c0_42], %127 {strides = array<i32>} : memref<200x256xf32, #tpu.memory_space<vmem>>, vector<8x256xf32>,
    %129 = vector.extract_strided_slice %1 {offsets = [0, 18], sizes = [8, 238], strides = [1, 1]} : vector<8x256xf32> to vector<8x238xf32>
    %130 = vector.extract_strided_slice %1 {offsets = [0, 0], sizes = [8, 18], strides = [1, 1]} : vector<8x256xf32> to vector<8x18xf32>
    %131 = tpu.concatenate %129, %130 in 1 : vector<8x238xf32>, vector<8x18xf32> -> vector<8x256xf32>
    %c19 = arith.constant 19 : index
    %c0_43 = arith.constant 0 : index
    %132 = vector.load %arg12[%c19, %c0_43] : memref<74x256xf32, #tpu.memory_space<vmem>>, vector<1x256xf32>
    %133 = vector.broadcast %132 : vector<1x256xf32> to vector<8x256xf32>
    %134 = arith.mulf %131, %133 : vector<8x256xf32>
    %c152 = arith.constant 152 : index
    %c0_44 = arith.constant 0 : index
    %135 = vector.load %arg14[%c152, %c0_44] : memref<200x256xf32, #tpu.memory_space<vmem>>, vector<8x256xf32>
    tpu.vector_store %arg14[%c152, %c0_44], %134 {strides = array<i32>} : memref<200x256xf32, #tpu.memory_space<vmem>>, vector<8x256xf32>,
    %136 = vector.extract_strided_slice %1 {offsets = [0, 30], sizes = [8, 226], strides = [1, 1]} : vector<8x256xf32> to vector<8x226xf32>
    %137 = vector.extract_strided_slice %1 {offsets = [0, 0], sizes = [8, 30], strides = [1, 1]} : vector<8x256xf32> to vector<8x30xf32>
    %138 = tpu.concatenate %136, %137 in 1 : vector<8x226xf32>, vector<8x30xf32> -> vector<8x256xf32>
    %c20 = arith.constant 20 : index
    %c0_45 = arith.constant 0 : index
    %139 = vector.load %arg12[%c20, %c0_45] : memref<74x256xf32, #tpu.memory_space<vmem>>, vector<1x256xf32>
    %140 = vector.broadcast %139 : vector<1x256xf32> to vector<8x256xf32>
    %141 = arith.mulf %138, %140 : vector<8x256xf32>
    %c160 = arith.constant 160 : index
    %c0_46 = arith.constant 0 : index
    %142 = vector.load %arg14[%c160, %c0_46] : memref<200x256xf32, #tpu.memory_space<vmem>>, vector<8x256xf32>
    tpu.vector_store %arg14[%c160, %c0_46], %141 {strides = array<i32>} : memref<200x256xf32, #tpu.memory_space<vmem>>, vector<8x256xf32>,
    %143 = vector.extract_strided_slice %1 {offsets = [0, 31], sizes = [8, 225], strides = [1, 1]} : vector<8x256xf32> to vector<8x225xf32>
    %144 = vector.extract_strided_slice %1 {offsets = [0, 0], sizes = [8, 31], strides = [1, 1]} : vector<8x256xf32> to vector<8x31xf32>
    %145 = tpu.concatenate %143, %144 in 1 : vector<8x225xf32>, vector<8x31xf32> -> vector<8x256xf32>
    %c21 = arith.constant 21 : index
    %c0_47 = arith.constant 0 : index
    %146 = vector.load %arg12[%c21, %c0_47] : memref<74x256xf32, #tpu.memory_space<vmem>>, vector<1x256xf32>
    %147 = vector.broadcast %146 : vector<1x256xf32> to vector<8x256xf32>
    %148 = arith.mulf %145, %147 : vector<8x256xf32>
    %c168 = arith.constant 168 : index
    %c0_48 = arith.constant 0 : index
    %149 = vector.load %arg14[%c168, %c0_48] : memref<200x256xf32, #tpu.memory_space<vmem>>, vector<8x256xf32>
    tpu.vector_store %arg14[%c168, %c0_48], %148 {strides = array<i32>} : memref<200x256xf32, #tpu.memory_space<vmem>>, vector<8x256xf32>,
    %150 = vector.extract_strided_slice %1 {offsets = [0, 32], sizes = [8, 224], strides = [1, 1]} : vector<8x256xf32> to vector<8x224xf32>
    %151 = vector.extract_strided_slice %1 {offsets = [0, 0], sizes = [8, 32], strides = [1, 1]} : vector<8x256xf32> to vector<8x32xf32>
    %152 = tpu.concatenate %150, %151 in 1 : vector<8x224xf32>, vector<8x32xf32> -> vector<8x256xf32>
    %c22 = arith.constant 22 : index
    %c0_49 = arith.constant 0 : index
    %153 = vector.load %arg12[%c22, %c0_49] : memref<74x256xf32, #tpu.memory_space<vmem>>, vector<1x256xf32>
    %154 = vector.broadcast %153 : vector<1x256xf32> to vector<8x256xf32>
    %155 = arith.mulf %152, %154 : vector<8x256xf32>
    %c176 = arith.constant 176 : index
    %c0_50 = arith.constant 0 : index
    %156 = vector.load %arg14[%c176, %c0_50] : memref<200x256xf32, #tpu.memory_space<vmem>>, vector<8x256xf32>
    tpu.vector_store %arg14[%c176, %c0_50], %155 {strides = array<i32>} : memref<200x256xf32, #tpu.memory_space<vmem>>, vector<8x256xf32>,
    %157 = vector.extract_strided_slice %1 {offsets = [0, 33], sizes = [8, 223], strides = [1, 1]} : vector<8x256xf32> to vector<8x223xf32>
    %158 = vector.extract_strided_slice %1 {offsets = [0, 0], sizes = [8, 33], strides = [1, 1]} : vector<8x256xf32> to vector<8x33xf32>
    %159 = tpu.concatenate %157, %158 in 1 : vector<8x223xf32>, vector<8x33xf32> -> vector<8x256xf32>
    %c23 = arith.constant 23 : index
    %c0_51 = arith.constant 0 : index
    %160 = vector.load %arg12[%c23, %c0_51] : memref<74x256xf32, #tpu.memory_space<vmem>>, vector<1x256xf32>
    %161 = vector.broadcast %160 : vector<1x256xf32> to vector<8x256xf32>
    %162 = arith.mulf %159, %161 : vector<8x256xf32>
    %c184 = arith.constant 184 : index
    %c0_52 = arith.constant 0 : index
    %163 = vector.load %arg14[%c184, %c0_52] : memref<200x256xf32, #tpu.memory_space<vmem>>, vector<8x256xf32>
    tpu.vector_store %arg14[%c184, %c0_52], %162 {strides = array<i32>} : memref<200x256xf32, #tpu.memory_space<vmem>>, vector<8x256xf32>,
    %164 = vector.extract_strided_slice %1 {offsets = [0, 34], sizes = [8, 222], strides = [1, 1]} : vector<8x256xf32> to vector<8x222xf32>
    %165 = vector.extract_strided_slice %1 {offsets = [0, 0], sizes = [8, 34], strides = [1, 1]} : vector<8x256xf32> to vector<8x34xf32>
    %166 = tpu.concatenate %164, %165 in 1 : vector<8x222xf32>, vector<8x34xf32> -> vector<8x256xf32>
    %c24_53 = arith.constant 24 : index
    %c0_54 = arith.constant 0 : index
    %167 = vector.load %arg12[%c24_53, %c0_54] : memref<74x256xf32, #tpu.memory_space<vmem>>, vector<1x256xf32>
    %168 = vector.broadcast %167 : vector<1x256xf32> to vector<8x256xf32>
    %169 = arith.mulf %166, %168 : vector<8x256xf32>
    %c192 = arith.constant 192 : index
    %c0_55 = arith.constant 0 : index
    %170 = vector.load %arg14[%c192, %c0_55] : memref<200x256xf32, #tpu.memory_space<vmem>>, vector<8x256xf32>
    tpu.vector_store %arg14[%c192, %c0_55], %169 {strides = array<i32>} : memref<200x256xf32, #tpu.memory_space<vmem>>, vector<8x256xf32>,
    %c0_56 = arith.constant 0 : index
    %c0_57 = arith.constant 0 : index
    %171 = vector.load %arg2[%c0_56, %c0_57] : memref<24x200xf32, #tpu.memory_space<vmem>>, vector<24x200xf32>
    %c0_58 = arith.constant 0 : index
    %c0_59 = arith.constant 0 : index
    %172 = vector.load %arg14[%c0_58, %c0_59] : memref<200x256xf32, #tpu.memory_space<vmem>>, vector<200x256xf32>
    %cst = arith.constant dense<0.000000e+00> : vector<24x256xf32>
    %173 = tpu.matmul %171, %172, %cst {dimension_numbers = #tpu.dot_dimension_numbers<[1], [0], [0], [1], [0, 0, 1, 1], [], []>} : vector<24x200xf32>, vector<200x256xf32>, vector<24x256xf32> -> vector<24x256xf32>
    %c0_60 = arith.constant 0 : index
    %c0_61 = arith.constant 0 : index
    %174 = vector.load %arg3[%c0_60, %c0_61] : memref<24x1xf32, #tpu.memory_space<vmem>>, vector<24x1xf32>
    %175 = vector.broadcast %174 : vector<24x1xf32> to vector<24x256xf32>
    %176 = arith.addf %173, %175 : vector<24x256xf32>
    %177 = arith.negf %176 : vector<24x256xf32>
    %178 = math.exp %177 : vector<24x256xf32>
    %cst_62 = arith.constant 1.000000e+00 : f32
    %179 = vector.broadcast %cst_62 : f32 to vector<24x256xf32>
    %180 = arith.addf %179, %178 : vector<24x256xf32>
    %181 = arith.divf %179, %180 : vector<24x256xf32>
    %cst_63 = arith.constant dense<0.000000e+00> : vector<24xf32>
    %182 = vector.multi_reduction <add>, %181, %cst_63 [1] : vector<24x256xf32> to vector<24xf32>
    %183 = vector.shape_cast %182 : vector<24xf32> to vector<24x1xf32>
    %cst_64 = arith.constant 2.560000e+02 : f32
    %184 = vector.broadcast %cst_64 : f32 to vector<24x1xf32>
    %185 = arith.divf %183, %184 : vector<24x1xf32>
    %c0_65 = arith.constant 0 : index
    %c0_66 = arith.constant 0 : index
    %186 = vector.load %arg4[%c0_65, %c0_66] : memref<24x24xf32, #tpu.memory_space<vmem>>, vector<24x24xf32>
    %cst_67 = arith.constant dense<0.000000e+00> : vector<24x1xf32>
    %187 = tpu.matmul %186, %185, %cst_67 {dimension_numbers = #tpu.dot_dimension_numbers<[1], [0], [0], [1], [0, 0, 1, 1], [], []>} : vector<24x24xf32>, vector<24x1xf32>, vector<24x1xf32> -> vector<24x1xf32>
    %c0_68 = arith.constant 0 : index
    %c0_69 = arith.constant 0 : index
    %188 = vector.load %arg5[%c0_68, %c0_69] : memref<24x1xf32, #tpu.memory_space<vmem>>, vector<24x1xf32>
    %189 = arith.addf %187, %188 : vector<24x1xf32>
    %190 = arith.negf %189 : vector<24x1xf32>
    %191 = math.exp %190 : vector<24x1xf32>
    %cst_70 = arith.constant 1.000000e+00 : f32
    %192 = vector.broadcast %cst_70 : f32 to vector<24x1xf32>
    %193 = arith.addf %192, %191 : vector<24x1xf32>
    %194 = arith.divf %192, %193 : vector<24x1xf32>
    %195 = vector.broadcast %194 : vector<24x1xf32> to vector<24x256xf32>
    %196 = arith.mulf %181, %195 : vector<24x256xf32>
    %c0_71 = arith.constant 0 : index
    %c0_72 = arith.constant 0 : index
    %197 = vector.load %arg8[%c0_71, %c0_72] : memref<3x24xf32, #tpu.memory_space<vmem>>, vector<3x24xf32>
    %cst_73 = arith.constant dense<0.000000e+00> : vector<3x256xf32>
    %198 = tpu.matmul %197, %196, %cst_73 {dimension_numbers = #tpu.dot_dimension_numbers<[1], [0], [0], [1], [0, 0, 1, 1], [], []>} : vector<3x24xf32>, vector<24x256xf32>, vector<3x256xf32> -> vector<3x256xf32>
    %199 = vector.extract_strided_slice %196 {offsets = [0, 0], sizes = [8, 256], strides = [1, 1]} : vector<24x256xf32> to vector<8x256xf32>
    %cst_74 = arith.constant dense<0xFF800000> : vector<256xf32>
    %200 = vector.multi_reduction <maximumf>, %199, %cst_74 [0] : vector<8x256xf32> to vector<256xf32>
    %201 = vector.shape_cast %200 : vector<256xf32> to vector<1x256xf32>
    %202 = vector.extract_strided_slice %196 {offsets = [8, 0], sizes = [8, 256], strides = [1, 1]} : vector<24x256xf32> to vector<8x256xf32>
    %cst_75 = arith.constant dense<0xFF800000> : vector<256xf32>
    %203 = vector.multi_reduction <maximumf>, %202, %cst_75 [0] : vector<8x256xf32> to vector<256xf32>
    %204 = vector.shape_cast %203 : vector<256xf32> to vector<1x256xf32>
    %205 = vector.extract_strided_slice %196 {offsets = [16, 0], sizes = [8, 256], strides = [1, 1]} : vector<24x256xf32> to vector<8x256xf32>
    %cst_76 = arith.constant dense<0xFF800000> : vector<256xf32>
    %206 = vector.multi_reduction <maximumf>, %205, %cst_76 [0] : vector<8x256xf32> to vector<256xf32>
    %207 = vector.shape_cast %206 : vector<256xf32> to vector<1x256xf32>
    %cst_77 = arith.constant 0.000000e+00 : f32
    %208 = vector.broadcast %cst_77 : f32 to vector<2x256xf32>
    %209 = tpu.concatenate %198, %201, %204, %207, %208 in 0 : vector<3x256xf32>, vector<1x256xf32>, vector<1x256xf32>, vector<1x256xf32>, vector<2x256xf32> -> vector<8x256xf32>
    %210 = vector.extract_strided_slice %209 {offsets = [0, 205], sizes = [8, 51], strides = [1, 1]} : vector<8x256xf32> to vector<8x51xf32>
    %211 = vector.extract_strided_slice %209 {offsets = [0, 0], sizes = [8, 205], strides = [1, 1]} : vector<8x256xf32> to vector<8x205xf32>
    %212 = tpu.concatenate %210, %211 in 1 : vector<8x51xf32>, vector<8x205xf32> -> vector<8x256xf32>
    %c25 = arith.constant 25 : index
    %c0_78 = arith.constant 0 : index
    %213 = vector.load %arg12[%c25, %c0_78] : memref<74x256xf32, #tpu.memory_space<vmem>>, vector<1x256xf32>
    %214 = vector.broadcast %213 : vector<1x256xf32> to vector<8x256xf32>
    %215 = arith.mulf %212, %214 : vector<8x256xf32>
    %c0_79 = arith.constant 0 : index
    %c0_80 = arith.constant 0 : index
    %216 = vector.load %arg15[%c0_79, %c0_80] : memref<392x256xf32, #tpu.memory_space<vmem>>, vector<8x256xf32>
    tpu.vector_store %arg15[%c0_79, %c0_80], %215 {strides = array<i32>} : memref<392x256xf32, #tpu.memory_space<vmem>>, vector<8x256xf32>,
    %217 = vector.extract_strided_slice %209 {offsets = [0, 206], sizes = [8, 50], strides = [1, 1]} : vector<8x256xf32> to vector<8x50xf32>
    %218 = vector.extract_strided_slice %209 {offsets = [0, 0], sizes = [8, 206], strides = [1, 1]} : vector<8x256xf32> to vector<8x206xf32>
    %219 = tpu.concatenate %217, %218 in 1 : vector<8x50xf32>, vector<8x206xf32> -> vector<8x256xf32>
    %c26 = arith.constant 26 : index
    %c0_81 = arith.constant 0 : index
    %220 = vector.load %arg12[%c26, %c0_81] : memref<74x256xf32, #tpu.memory_space<vmem>>, vector<1x256xf32>
    %221 = vector.broadcast %220 : vector<1x256xf32> to vector<8x256xf32>
    %222 = arith.mulf %219, %221 : vector<8x256xf32>
    %c8_82 = arith.constant 8 : index
    %c0_83 = arith.constant 0 : index
    %223 = vector.load %arg15[%c8_82, %c0_83] : memref<392x256xf32, #tpu.memory_space<vmem>>, vector<8x256xf32>
    tpu.vector_store %arg15[%c8_82, %c0_83], %222 {strides = array<i32>} : memref<392x256xf32, #tpu.memory_space<vmem>>, vector<8x256xf32>,
    %224 = vector.extract_strided_slice %209 {offsets = [0, 207], sizes = [8, 49], strides = [1, 1]} : vector<8x256xf32> to vector<8x49xf32>
    %225 = vector.extract_strided_slice %209 {offsets = [0, 0], sizes = [8, 207], strides = [1, 1]} : vector<8x256xf32> to vector<8x207xf32>
    %226 = tpu.concatenate %224, %225 in 1 : vector<8x49xf32>, vector<8x207xf32> -> vector<8x256xf32>
    %c27 = arith.constant 27 : index
    %c0_84 = arith.constant 0 : index
    %227 = vector.load %arg12[%c27, %c0_84] : memref<74x256xf32, #tpu.memory_space<vmem>>, vector<1x256xf32>
    %228 = vector.broadcast %227 : vector<1x256xf32> to vector<8x256xf32>
    %229 = arith.mulf %226, %228 : vector<8x256xf32>
    %c16_85 = arith.constant 16 : index
    %c0_86 = arith.constant 0 : index
    %230 = vector.load %arg15[%c16_85, %c0_86] : memref<392x256xf32, #tpu.memory_space<vmem>>, vector<8x256xf32>
    tpu.vector_store %arg15[%c16_85, %c0_86], %229 {strides = array<i32>} : memref<392x256xf32, #tpu.memory_space<vmem>>, vector<8x256xf32>,
    %231 = vector.extract_strided_slice %209 {offsets = [0, 208], sizes = [8, 48], strides = [1, 1]} : vector<8x256xf32> to vector<8x48xf32>
    %232 = vector.extract_strided_slice %209 {offsets = [0, 0], sizes = [8, 208], strides = [1, 1]} : vector<8x256xf32> to vector<8x208xf32>
    %233 = tpu.concatenate %231, %232 in 1 : vector<8x48xf32>, vector<8x208xf32> -> vector<8x256xf32>
    %c28 = arith.constant 28 : index
    %c0_87 = arith.constant 0 : index
    %234 = vector.load %arg12[%c28, %c0_87] : memref<74x256xf32, #tpu.memory_space<vmem>>, vector<1x256xf32>
    %235 = vector.broadcast %234 : vector<1x256xf32> to vector<8x256xf32>
    %236 = arith.mulf %233, %235 : vector<8x256xf32>
    %c24_88 = arith.constant 24 : index
    %c0_89 = arith.constant 0 : index
    %237 = vector.load %arg15[%c24_88, %c0_89] : memref<392x256xf32, #tpu.memory_space<vmem>>, vector<8x256xf32>
    tpu.vector_store %arg15[%c24_88, %c0_89], %236 {strides = array<i32>} : memref<392x256xf32, #tpu.memory_space<vmem>>, vector<8x256xf32>,
    %238 = vector.extract_strided_slice %209 {offsets = [0, 209], sizes = [8, 47], strides = [1, 1]} : vector<8x256xf32> to vector<8x47xf32>
    %239 = vector.extract_strided_slice %209 {offsets = [0, 0], sizes = [8, 209], strides = [1, 1]} : vector<8x256xf32> to vector<8x209xf32>
    %240 = tpu.concatenate %238, %239 in 1 : vector<8x47xf32>, vector<8x209xf32> -> vector<8x256xf32>
    %c29 = arith.constant 29 : index
    %c0_90 = arith.constant 0 : index
    %241 = vector.load %arg12[%c29, %c0_90] : memref<74x256xf32, #tpu.memory_space<vmem>>, vector<1x256xf32>
    %242 = vector.broadcast %241 : vector<1x256xf32> to vector<8x256xf32>
    %243 = arith.mulf %240, %242 : vector<8x256xf32>
    %c32_91 = arith.constant 32 : index
    %c0_92 = arith.constant 0 : index
    %244 = vector.load %arg15[%c32_91, %c0_92] : memref<392x256xf32, #tpu.memory_space<vmem>>, vector<8x256xf32>
    tpu.vector_store %arg15[%c32_91, %c0_92], %243 {strides = array<i32>} : memref<392x256xf32, #tpu.memory_space<vmem>>, vector<8x256xf32>,
    %245 = vector.extract_strided_slice %209 {offsets = [0, 210], sizes = [8, 46], strides = [1, 1]} : vector<8x256xf32> to vector<8x46xf32>
    %246 = vector.extract_strided_slice %209 {offsets = [0, 0], sizes = [8, 210], strides = [1, 1]} : vector<8x256xf32> to vector<8x210xf32>
    %247 = tpu.concatenate %245, %246 in 1 : vector<8x46xf32>, vector<8x210xf32> -> vector<8x256xf32>
    %c30 = arith.constant 30 : index
    %c0_93 = arith.constant 0 : index
    %248 = vector.load %arg12[%c30, %c0_93] : memref<74x256xf32, #tpu.memory_space<vmem>>, vector<1x256xf32>
    %249 = vector.broadcast %248 : vector<1x256xf32> to vector<8x256xf32>
    %250 = arith.mulf %247, %249 : vector<8x256xf32>
    %c40_94 = arith.constant 40 : index
    %c0_95 = arith.constant 0 : index
    %251 = vector.load %arg15[%c40_94, %c0_95] : memref<392x256xf32, #tpu.memory_space<vmem>>, vector<8x256xf32>
    tpu.vector_store %arg15[%c40_94, %c0_95], %250 {strides = array<i32>} : memref<392x256xf32, #tpu.memory_space<vmem>>, vector<8x256xf32>,
    %252 = vector.extract_strided_slice %209 {offsets = [0, 211], sizes = [8, 45], strides = [1, 1]} : vector<8x256xf32> to vector<8x45xf32>
    %253 = vector.extract_strided_slice %209 {offsets = [0, 0], sizes = [8, 211], strides = [1, 1]} : vector<8x256xf32> to vector<8x211xf32>
    %254 = tpu.concatenate %252, %253 in 1 : vector<8x45xf32>, vector<8x211xf32> -> vector<8x256xf32>
    %c31 = arith.constant 31 : index
    %c0_96 = arith.constant 0 : index
    %255 = vector.load %arg12[%c31, %c0_96] : memref<74x256xf32, #tpu.memory_space<vmem>>, vector<1x256xf32>
    %256 = vector.broadcast %255 : vector<1x256xf32> to vector<8x256xf32>
    %257 = arith.mulf %254, %256 : vector<8x256xf32>
    %c48_97 = arith.constant 48 : index
    %c0_98 = arith.constant 0 : index
    %258 = vector.load %arg15[%c48_97, %c0_98] : memref<392x256xf32, #tpu.memory_space<vmem>>, vector<8x256xf32>
    tpu.vector_store %arg15[%c48_97, %c0_98], %257 {strides = array<i32>} : memref<392x256xf32, #tpu.memory_space<vmem>>, vector<8x256xf32>,
    %259 = vector.extract_strided_slice %209 {offsets = [0, 221], sizes = [8, 35], strides = [1, 1]} : vector<8x256xf32> to vector<8x35xf32>
    %260 = vector.extract_strided_slice %209 {offsets = [0, 0], sizes = [8, 221], strides = [1, 1]} : vector<8x256xf32> to vector<8x221xf32>
    %261 = tpu.concatenate %259, %260 in 1 : vector<8x35xf32>, vector<8x221xf32> -> vector<8x256xf32>
    %c32_99 = arith.constant 32 : index
    %c0_100 = arith.constant 0 : index
    %262 = vector.load %arg12[%c32_99, %c0_100] : memref<74x256xf32, #tpu.memory_space<vmem>>, vector<1x256xf32>
    %263 = vector.broadcast %262 : vector<1x256xf32> to vector<8x256xf32>
    %264 = arith.mulf %261, %263 : vector<8x256xf32>
    %c56_101 = arith.constant 56 : index
    %c0_102 = arith.constant 0 : index
    %265 = vector.load %arg15[%c56_101, %c0_102] : memref<392x256xf32, #tpu.memory_space<vmem>>, vector<8x256xf32>
    tpu.vector_store %arg15[%c56_101, %c0_102], %264 {strides = array<i32>} : memref<392x256xf32, #tpu.memory_space<vmem>>, vector<8x256xf32>,
    %266 = vector.extract_strided_slice %209 {offsets = [0, 222], sizes = [8, 34], strides = [1, 1]} : vector<8x256xf32> to vector<8x34xf32>
    %267 = vector.extract_strided_slice %209 {offsets = [0, 0], sizes = [8, 222], strides = [1, 1]} : vector<8x256xf32> to vector<8x222xf32>
    %268 = tpu.concatenate %266, %267 in 1 : vector<8x34xf32>, vector<8x222xf32> -> vector<8x256xf32>
    %c33 = arith.constant 33 : index
    %c0_103 = arith.constant 0 : index
    %269 = vector.load %arg12[%c33, %c0_103] : memref<74x256xf32, #tpu.memory_space<vmem>>, vector<1x256xf32>
    %270 = vector.broadcast %269 : vector<1x256xf32> to vector<8x256xf32>
    %271 = arith.mulf %268, %270 : vector<8x256xf32>
    %c64_104 = arith.constant 64 : index
    %c0_105 = arith.constant 0 : index
    %272 = vector.load %arg15[%c64_104, %c0_105] : memref<392x256xf32, #tpu.memory_space<vmem>>, vector<8x256xf32>
    tpu.vector_store %arg15[%c64_104, %c0_105], %271 {strides = array<i32>} : memref<392x256xf32, #tpu.memory_space<vmem>>, vector<8x256xf32>,
    %273 = vector.extract_strided_slice %209 {offsets = [0, 223], sizes = [8, 33], strides = [1, 1]} : vector<8x256xf32> to vector<8x33xf32>
    %274 = vector.extract_strided_slice %209 {offsets = [0, 0], sizes = [8, 223], strides = [1, 1]} : vector<8x256xf32> to vector<8x223xf32>
    %275 = tpu.concatenate %273, %274 in 1 : vector<8x33xf32>, vector<8x223xf32> -> vector<8x256xf32>
    %c34 = arith.constant 34 : index
    %c0_106 = arith.constant 0 : index
    %276 = vector.load %arg12[%c34, %c0_106] : memref<74x256xf32, #tpu.memory_space<vmem>>, vector<1x256xf32>
    %277 = vector.broadcast %276 : vector<1x256xf32> to vector<8x256xf32>
    %278 = arith.mulf %275, %277 : vector<8x256xf32>
    %c72_107 = arith.constant 72 : index
    %c0_108 = arith.constant 0 : index
    %279 = vector.load %arg15[%c72_107, %c0_108] : memref<392x256xf32, #tpu.memory_space<vmem>>, vector<8x256xf32>
    tpu.vector_store %arg15[%c72_107, %c0_108], %278 {strides = array<i32>} : memref<392x256xf32, #tpu.memory_space<vmem>>, vector<8x256xf32>,
    %280 = vector.extract_strided_slice %209 {offsets = [0, 224], sizes = [8, 32], strides = [1, 1]} : vector<8x256xf32> to vector<8x32xf32>
    %281 = vector.extract_strided_slice %209 {offsets = [0, 0], sizes = [8, 224], strides = [1, 1]} : vector<8x256xf32> to vector<8x224xf32>
    %282 = tpu.concatenate %280, %281 in 1 : vector<8x32xf32>, vector<8x224xf32> -> vector<8x256xf32>
    %c35 = arith.constant 35 : index
    %c0_109 = arith.constant 0 : index
    %283 = vector.load %arg12[%c35, %c0_109] : memref<74x256xf32, #tpu.memory_space<vmem>>, vector<1x256xf32>
    %284 = vector.broadcast %283 : vector<1x256xf32> to vector<8x256xf32>
    %285 = arith.mulf %282, %284 : vector<8x256xf32>
    %c80_110 = arith.constant 80 : index
    %c0_111 = arith.constant 0 : index
    %286 = vector.load %arg15[%c80_110, %c0_111] : memref<392x256xf32, #tpu.memory_space<vmem>>, vector<8x256xf32>
    tpu.vector_store %arg15[%c80_110, %c0_111], %285 {strides = array<i32>} : memref<392x256xf32, #tpu.memory_space<vmem>>, vector<8x256xf32>,
    %287 = vector.extract_strided_slice %209 {offsets = [0, 225], sizes = [8, 31], strides = [1, 1]} : vector<8x256xf32> to vector<8x31xf32>
    %288 = vector.extract_strided_slice %209 {offsets = [0, 0], sizes = [8, 225], strides = [1, 1]} : vector<8x256xf32> to vector<8x225xf32>
    %289 = tpu.concatenate %287, %288 in 1 : vector<8x31xf32>, vector<8x225xf32> -> vector<8x256xf32>
    %c36 = arith.constant 36 : index
    %c0_112 = arith.constant 0 : index
    %290 = vector.load %arg12[%c36, %c0_112] : memref<74x256xf32, #tpu.memory_space<vmem>>, vector<1x256xf32>
    %291 = vector.broadcast %290 : vector<1x256xf32> to vector<8x256xf32>
    %292 = arith.mulf %289, %291 : vector<8x256xf32>
    %c88_113 = arith.constant 88 : index
    %c0_114 = arith.constant 0 : index
    %293 = vector.load %arg15[%c88_113, %c0_114] : memref<392x256xf32, #tpu.memory_space<vmem>>, vector<8x256xf32>
    tpu.vector_store %arg15[%c88_113, %c0_114], %292 {strides = array<i32>} : memref<392x256xf32, #tpu.memory_space<vmem>>, vector<8x256xf32>,
    %294 = vector.extract_strided_slice %209 {offsets = [0, 226], sizes = [8, 30], strides = [1, 1]} : vector<8x256xf32> to vector<8x30xf32>
    %295 = vector.extract_strided_slice %209 {offsets = [0, 0], sizes = [8, 226], strides = [1, 1]} : vector<8x256xf32> to vector<8x226xf32>
    %296 = tpu.concatenate %294, %295 in 1 : vector<8x30xf32>, vector<8x226xf32> -> vector<8x256xf32>
    %c37 = arith.constant 37 : index
    %c0_115 = arith.constant 0 : index
    %297 = vector.load %arg12[%c37, %c0_115] : memref<74x256xf32, #tpu.memory_space<vmem>>, vector<1x256xf32>
    %298 = vector.broadcast %297 : vector<1x256xf32> to vector<8x256xf32>
    %299 = arith.mulf %296, %298 : vector<8x256xf32>
    %c96_116 = arith.constant 96 : index
    %c0_117 = arith.constant 0 : index
    %300 = vector.load %arg15[%c96_116, %c0_117] : memref<392x256xf32, #tpu.memory_space<vmem>>, vector<8x256xf32>
    tpu.vector_store %arg15[%c96_116, %c0_117], %299 {strides = array<i32>} : memref<392x256xf32, #tpu.memory_space<vmem>>, vector<8x256xf32>,
    %301 = vector.extract_strided_slice %209 {offsets = [0, 227], sizes = [8, 29], strides = [1, 1]} : vector<8x256xf32> to vector<8x29xf32>
    %302 = vector.extract_strided_slice %209 {offsets = [0, 0], sizes = [8, 227], strides = [1, 1]} : vector<8x256xf32> to vector<8x227xf32>
    %303 = tpu.concatenate %301, %302 in 1 : vector<8x29xf32>, vector<8x227xf32> -> vector<8x256xf32>
    %c38 = arith.constant 38 : index
    %c0_118 = arith.constant 0 : index
    %304 = vector.load %arg12[%c38, %c0_118] : memref<74x256xf32, #tpu.memory_space<vmem>>, vector<1x256xf32>
    %305 = vector.broadcast %304 : vector<1x256xf32> to vector<8x256xf32>
    %306 = arith.mulf %303, %305 : vector<8x256xf32>
    %c104_119 = arith.constant 104 : index
    %c0_120 = arith.constant 0 : index
    %307 = vector.load %arg15[%c104_119, %c0_120] : memref<392x256xf32, #tpu.memory_space<vmem>>, vector<8x256xf32>
    tpu.vector_store %arg15[%c104_119, %c0_120], %306 {strides = array<i32>} : memref<392x256xf32, #tpu.memory_space<vmem>>, vector<8x256xf32>,
    %308 = vector.extract_strided_slice %209 {offsets = [0, 237], sizes = [8, 19], strides = [1, 1]} : vector<8x256xf32> to vector<8x19xf32>
    %309 = vector.extract_strided_slice %209 {offsets = [0, 0], sizes = [8, 237], strides = [1, 1]} : vector<8x256xf32> to vector<8x237xf32>
    %310 = tpu.concatenate %308, %309 in 1 : vector<8x19xf32>, vector<8x237xf32> -> vector<8x256xf32>
    %c39 = arith.constant 39 : index
    %c0_121 = arith.constant 0 : index
    %311 = vector.load %arg12[%c39, %c0_121] : memref<74x256xf32, #tpu.memory_space<vmem>>, vector<1x256xf32>
    %312 = vector.broadcast %311 : vector<1x256xf32> to vector<8x256xf32>
    %313 = arith.mulf %310, %312 : vector<8x256xf32>
    %c112_122 = arith.constant 112 : index
    %c0_123 = arith.constant 0 : index
    %314 = vector.load %arg15[%c112_122, %c0_123] : memref<392x256xf32, #tpu.memory_space<vmem>>, vector<8x256xf32>
    tpu.vector_store %arg15[%c112_122, %c0_123], %313 {strides = array<i32>} : memref<392x256xf32, #tpu.memory_space<vmem>>, vector<8x256xf32>,
    %315 = vector.extract_strided_slice %209 {offsets = [0, 238], sizes = [8, 18], strides = [1, 1]} : vector<8x256xf32> to vector<8x18xf32>
    %316 = vector.extract_strided_slice %209 {offsets = [0, 0], sizes = [8, 238], strides = [1, 1]} : vector<8x256xf32> to vector<8x238xf32>
    %317 = tpu.concatenate %315, %316 in 1 : vector<8x18xf32>, vector<8x238xf32> -> vector<8x256xf32>
    %c40_124 = arith.constant 40 : index
    %c0_125 = arith.constant 0 : index
    %318 = vector.load %arg12[%c40_124, %c0_125] : memref<74x256xf32, #tpu.memory_space<vmem>>, vector<1x256xf32>
    %319 = vector.broadcast %318 : vector<1x256xf32> to vector<8x256xf32>
    %320 = arith.mulf %317, %319 : vector<8x256xf32>
    %c120_126 = arith.constant 120 : index
    %c0_127 = arith.constant 0 : index
    %321 = vector.load %arg15[%c120_126, %c0_127] : memref<392x256xf32, #tpu.memory_space<vmem>>, vector<8x256xf32>
    tpu.vector_store %arg15[%c120_126, %c0_127], %320 {strides = array<i32>} : memref<392x256xf32, #tpu.memory_space<vmem>>, vector<8x256xf32>,
    %322 = vector.extract_strided_slice %209 {offsets = [0, 239], sizes = [8, 17], strides = [1, 1]} : vector<8x256xf32> to vector<8x17xf32>
    %323 = vector.extract_strided_slice %209 {offsets = [0, 0], sizes = [8, 239], strides = [1, 1]} : vector<8x256xf32> to vector<8x239xf32>
    %324 = tpu.concatenate %322, %323 in 1 : vector<8x17xf32>, vector<8x239xf32> -> vector<8x256xf32>
    %c41 = arith.constant 41 : index
    %c0_128 = arith.constant 0 : index
    %325 = vector.load %arg12[%c41, %c0_128] : memref<74x256xf32, #tpu.memory_space<vmem>>, vector<1x256xf32>
    %326 = vector.broadcast %325 : vector<1x256xf32> to vector<8x256xf32>
    %327 = arith.mulf %324, %326 : vector<8x256xf32>
    %c128_129 = arith.constant 128 : index
    %c0_130 = arith.constant 0 : index
    %328 = vector.load %arg15[%c128_129, %c0_130] : memref<392x256xf32, #tpu.memory_space<vmem>>, vector<8x256xf32>
    tpu.vector_store %arg15[%c128_129, %c0_130], %327 {strides = array<i32>} : memref<392x256xf32, #tpu.memory_space<vmem>>, vector<8x256xf32>,
    %329 = vector.extract_strided_slice %209 {offsets = [0, 240], sizes = [8, 16], strides = [1, 1]} : vector<8x256xf32> to vector<8x16xf32>
    %330 = vector.extract_strided_slice %209 {offsets = [0, 0], sizes = [8, 240], strides = [1, 1]} : vector<8x256xf32> to vector<8x240xf32>
    %331 = tpu.concatenate %329, %330 in 1 : vector<8x16xf32>, vector<8x240xf32> -> vector<8x256xf32>
    %c42 = arith.constant 42 : index
    %c0_131 = arith.constant 0 : index
    %332 = vector.load %arg12[%c42, %c0_131] : memref<74x256xf32, #tpu.memory_space<vmem>>, vector<1x256xf32>
    %333 = vector.broadcast %332 : vector<1x256xf32> to vector<8x256xf32>
    %334 = arith.mulf %331, %333 : vector<8x256xf32>
    %c136_132 = arith.constant 136 : index
    %c0_133 = arith.constant 0 : index
    %335 = vector.load %arg15[%c136_132, %c0_133] : memref<392x256xf32, #tpu.memory_space<vmem>>, vector<8x256xf32>
    tpu.vector_store %arg15[%c136_132, %c0_133], %334 {strides = array<i32>} : memref<392x256xf32, #tpu.memory_space<vmem>>, vector<8x256xf32>,
    %336 = vector.extract_strided_slice %209 {offsets = [0, 241], sizes = [8, 15], strides = [1, 1]} : vector<8x256xf32> to vector<8x15xf32>
    %337 = vector.extract_strided_slice %209 {offsets = [0, 0], sizes = [8, 241], strides = [1, 1]} : vector<8x256xf32> to vector<8x241xf32>
    %338 = tpu.concatenate %336, %337 in 1 : vector<8x15xf32>, vector<8x241xf32> -> vector<8x256xf32>
    %c43 = arith.constant 43 : index
    %c0_134 = arith.constant 0 : index
    %339 = vector.load %arg12[%c43, %c0_134] : memref<74x256xf32, #tpu.memory_space<vmem>>, vector<1x256xf32>
    %340 = vector.broadcast %339 : vector<1x256xf32> to vector<8x256xf32>
    %341 = arith.mulf %338, %340 : vector<8x256xf32>
    %c144_135 = arith.constant 144 : index
    %c0_136 = arith.constant 0 : index
    %342 = vector.load %arg15[%c144_135, %c0_136] : memref<392x256xf32, #tpu.memory_space<vmem>>, vector<8x256xf32>
    tpu.vector_store %arg15[%c144_135, %c0_136], %341 {strides = array<i32>} : memref<392x256xf32, #tpu.memory_space<vmem>>, vector<8x256xf32>,
    %343 = vector.extract_strided_slice %209 {offsets = [0, 242], sizes = [8, 14], strides = [1, 1]} : vector<8x256xf32> to vector<8x14xf32>
    %344 = vector.extract_strided_slice %209 {offsets = [0, 0], sizes = [8, 242], strides = [1, 1]} : vector<8x256xf32> to vector<8x242xf32>
    %345 = tpu.concatenate %343, %344 in 1 : vector<8x14xf32>, vector<8x242xf32> -> vector<8x256xf32>
    %c44 = arith.constant 44 : index
    %c0_137 = arith.constant 0 : index
    %346 = vector.load %arg12[%c44, %c0_137] : memref<74x256xf32, #tpu.memory_space<vmem>>, vector<1x256xf32>
    %347 = vector.broadcast %346 : vector<1x256xf32> to vector<8x256xf32>
    %348 = arith.mulf %345, %347 : vector<8x256xf32>
    %c152_138 = arith.constant 152 : index
    %c0_139 = arith.constant 0 : index
    %349 = vector.load %arg15[%c152_138, %c0_139] : memref<392x256xf32, #tpu.memory_space<vmem>>, vector<8x256xf32>
    tpu.vector_store %arg15[%c152_138, %c0_139], %348 {strides = array<i32>} : memref<392x256xf32, #tpu.memory_space<vmem>>, vector<8x256xf32>,
    %350 = vector.extract_strided_slice %209 {offsets = [0, 243], sizes = [8, 13], strides = [1, 1]} : vector<8x256xf32> to vector<8x13xf32>
    %351 = vector.extract_strided_slice %209 {offsets = [0, 0], sizes = [8, 243], strides = [1, 1]} : vector<8x256xf32> to vector<8x243xf32>
    %352 = tpu.concatenate %350, %351 in 1 : vector<8x13xf32>, vector<8x243xf32> -> vector<8x256xf32>
    %c45 = arith.constant 45 : index
    %c0_140 = arith.constant 0 : index
    %353 = vector.load %arg12[%c45, %c0_140] : memref<74x256xf32, #tpu.memory_space<vmem>>, vector<1x256xf32>
    %354 = vector.broadcast %353 : vector<1x256xf32> to vector<8x256xf32>
    %355 = arith.mulf %352, %354 : vector<8x256xf32>
    %c160_141 = arith.constant 160 : index
    %c0_142 = arith.constant 0 : index
    %356 = vector.load %arg15[%c160_141, %c0_142] : memref<392x256xf32, #tpu.memory_space<vmem>>, vector<8x256xf32>
    tpu.vector_store %arg15[%c160_141, %c0_142], %355 {strides = array<i32>} : memref<392x256xf32, #tpu.memory_space<vmem>>, vector<8x256xf32>,
    %357 = vector.extract_strided_slice %209 {offsets = [0, 253], sizes = [8, 3], strides = [1, 1]} : vector<8x256xf32> to vector<8x3xf32>
    %358 = vector.extract_strided_slice %209 {offsets = [0, 0], sizes = [8, 253], strides = [1, 1]} : vector<8x256xf32> to vector<8x253xf32>
    %359 = tpu.concatenate %357, %358 in 1 : vector<8x3xf32>, vector<8x253xf32> -> vector<8x256xf32>
    %c46 = arith.constant 46 : index
    %c0_143 = arith.constant 0 : index
    %360 = vector.load %arg12[%c46, %c0_143] : memref<74x256xf32, #tpu.memory_space<vmem>>, vector<1x256xf32>
    %361 = vector.broadcast %360 : vector<1x256xf32> to vector<8x256xf32>
    %362 = arith.mulf %359, %361 : vector<8x256xf32>
    %c168_144 = arith.constant 168 : index
    %c0_145 = arith.constant 0 : index
    %363 = vector.load %arg15[%c168_144, %c0_145] : memref<392x256xf32, #tpu.memory_space<vmem>>, vector<8x256xf32>
    tpu.vector_store %arg15[%c168_144, %c0_145], %362 {strides = array<i32>} : memref<392x256xf32, #tpu.memory_space<vmem>>, vector<8x256xf32>,
    %364 = vector.extract_strided_slice %209 {offsets = [0, 254], sizes = [8, 2], strides = [1, 1]} : vector<8x256xf32> to vector<8x2xf32>
    %365 = vector.extract_strided_slice %209 {offsets = [0, 0], sizes = [8, 254], strides = [1, 1]} : vector<8x256xf32> to vector<8x254xf32>
    %366 = tpu.concatenate %364, %365 in 1 : vector<8x2xf32>, vector<8x254xf32> -> vector<8x256xf32>
    %c47 = arith.constant 47 : index
    %c0_146 = arith.constant 0 : index
    %367 = vector.load %arg12[%c47, %c0_146] : memref<74x256xf32, #tpu.memory_space<vmem>>, vector<1x256xf32>
    %368 = vector.broadcast %367 : vector<1x256xf32> to vector<8x256xf32>
    %369 = arith.mulf %366, %368 : vector<8x256xf32>
    %c176_147 = arith.constant 176 : index
    %c0_148 = arith.constant 0 : index
    %370 = vector.load %arg15[%c176_147, %c0_148] : memref<392x256xf32, #tpu.memory_space<vmem>>, vector<8x256xf32>
    tpu.vector_store %arg15[%c176_147, %c0_148], %369 {strides = array<i32>} : memref<392x256xf32, #tpu.memory_space<vmem>>, vector<8x256xf32>,
    %371 = vector.extract_strided_slice %209 {offsets = [0, 255], sizes = [8, 1], strides = [1, 1]} : vector<8x256xf32> to vector<8x1xf32>
    %372 = vector.extract_strided_slice %209 {offsets = [0, 0], sizes = [8, 255], strides = [1, 1]} : vector<8x256xf32> to vector<8x255xf32>
    %373 = tpu.concatenate %371, %372 in 1 : vector<8x1xf32>, vector<8x255xf32> -> vector<8x256xf32>
    %c48_149 = arith.constant 48 : index
    %c0_150 = arith.constant 0 : index
    %374 = vector.load %arg12[%c48_149, %c0_150] : memref<74x256xf32, #tpu.memory_space<vmem>>, vector<1x256xf32>
    %375 = vector.broadcast %374 : vector<1x256xf32> to vector<8x256xf32>
    %376 = arith.mulf %373, %375 : vector<8x256xf32>
    %c184_151 = arith.constant 184 : index
    %c0_152 = arith.constant 0 : index
    %377 = vector.load %arg15[%c184_151, %c0_152] : memref<392x256xf32, #tpu.memory_space<vmem>>, vector<8x256xf32>
    tpu.vector_store %arg15[%c184_151, %c0_152], %376 {strides = array<i32>} : memref<392x256xf32, #tpu.memory_space<vmem>>, vector<8x256xf32>,
    %c192_153 = arith.constant 192 : index
    %c0_154 = arith.constant 0 : index
    %378 = vector.load %arg15[%c192_153, %c0_154] : memref<392x256xf32, #tpu.memory_space<vmem>>, vector<8x256xf32>
    tpu.vector_store %arg15[%c192_153, %c0_154], %209 {strides = array<i32>} : memref<392x256xf32, #tpu.memory_space<vmem>>, vector<8x256xf32>,
    %379 = vector.extract_strided_slice %209 {offsets = [0, 1], sizes = [8, 255], strides = [1, 1]} : vector<8x256xf32> to vector<8x255xf32>
    %380 = vector.extract_strided_slice %209 {offsets = [0, 0], sizes = [8, 1], strides = [1, 1]} : vector<8x256xf32> to vector<8x1xf32>
    %381 = tpu.concatenate %379, %380 in 1 : vector<8x255xf32>, vector<8x1xf32> -> vector<8x256xf32>
    %c50 = arith.constant 50 : index
    %c0_155 = arith.constant 0 : index
    %382 = vector.load %arg12[%c50, %c0_155] : memref<74x256xf32, #tpu.memory_space<vmem>>, vector<1x256xf32>
    %383 = vector.broadcast %382 : vector<1x256xf32> to vector<8x256xf32>
    %384 = arith.mulf %381, %383 : vector<8x256xf32>
    %c200 = arith.constant 200 : index
    %c0_156 = arith.constant 0 : index
    %385 = vector.load %arg15[%c200, %c0_156] : memref<392x256xf32, #tpu.memory_space<vmem>>, vector<8x256xf32>
    tpu.vector_store %arg15[%c200, %c0_156], %384 {strides = array<i32>} : memref<392x256xf32, #tpu.memory_space<vmem>>, vector<8x256xf32>,
    %386 = vector.extract_strided_slice %209 {offsets = [0, 2], sizes = [8, 254], strides = [1, 1]} : vector<8x256xf32> to vector<8x254xf32>
    %387 = vector.extract_strided_slice %209 {offsets = [0, 0], sizes = [8, 2], strides = [1, 1]} : vector<8x256xf32> to vector<8x2xf32>
    %388 = tpu.concatenate %386, %387 in 1 : vector<8x254xf32>, vector<8x2xf32> -> vector<8x256xf32>
    %c51 = arith.constant 51 : index
    %c0_157 = arith.constant 0 : index
    %389 = vector.load %arg12[%c51, %c0_157] : memref<74x256xf32, #tpu.memory_space<vmem>>, vector<1x256xf32>
    %390 = vector.broadcast %389 : vector<1x256xf32> to vector<8x256xf32>
    %391 = arith.mulf %388, %390 : vector<8x256xf32>
    %c208 = arith.constant 208 : index
    %c0_158 = arith.constant 0 : index
    %392 = vector.load %arg15[%c208, %c0_158] : memref<392x256xf32, #tpu.memory_space<vmem>>, vector<8x256xf32>
    tpu.vector_store %arg15[%c208, %c0_158], %391 {strides = array<i32>} : memref<392x256xf32, #tpu.memory_space<vmem>>, vector<8x256xf32>,
    %393 = vector.extract_strided_slice %209 {offsets = [0, 3], sizes = [8, 253], strides = [1, 1]} : vector<8x256xf32> to vector<8x253xf32>
    %394 = vector.extract_strided_slice %209 {offsets = [0, 0], sizes = [8, 3], strides = [1, 1]} : vector<8x256xf32> to vector<8x3xf32>
    %395 = tpu.concatenate %393, %394 in 1 : vector<8x253xf32>, vector<8x3xf32> -> vector<8x256xf32>
    %c52 = arith.constant 52 : index
    %c0_159 = arith.constant 0 : index
    %396 = vector.load %arg12[%c52, %c0_159] : memref<74x256xf32, #tpu.memory_space<vmem>>, vector<1x256xf32>
    %397 = vector.broadcast %396 : vector<1x256xf32> to vector<8x256xf32>
    %398 = arith.mulf %395, %397 : vector<8x256xf32>
    %c216 = arith.constant 216 : index
    %c0_160 = arith.constant 0 : index
    %399 = vector.load %arg15[%c216, %c0_160] : memref<392x256xf32, #tpu.memory_space<vmem>>, vector<8x256xf32>
    tpu.vector_store %arg15[%c216, %c0_160], %398 {strides = array<i32>} : memref<392x256xf32, #tpu.memory_space<vmem>>, vector<8x256xf32>,
    %400 = vector.extract_strided_slice %209 {offsets = [0, 13], sizes = [8, 243], strides = [1, 1]} : vector<8x256xf32> to vector<8x243xf32>
    %401 = vector.extract_strided_slice %209 {offsets = [0, 0], sizes = [8, 13], strides = [1, 1]} : vector<8x256xf32> to vector<8x13xf32>
    %402 = tpu.concatenate %400, %401 in 1 : vector<8x243xf32>, vector<8x13xf32> -> vector<8x256xf32>
    %c53 = arith.constant 53 : index
    %c0_161 = arith.constant 0 : index
    %403 = vector.load %arg12[%c53, %c0_161] : memref<74x256xf32, #tpu.memory_space<vmem>>, vector<1x256xf32>
    %404 = vector.broadcast %403 : vector<1x256xf32> to vector<8x256xf32>
    %405 = arith.mulf %402, %404 : vector<8x256xf32>
    %c224 = arith.constant 224 : index
    %c0_162 = arith.constant 0 : index
    %406 = vector.load %arg15[%c224, %c0_162] : memref<392x256xf32, #tpu.memory_space<vmem>>, vector<8x256xf32>
    tpu.vector_store %arg15[%c224, %c0_162], %405 {strides = array<i32>} : memref<392x256xf32, #tpu.memory_space<vmem>>, vector<8x256xf32>,
    %407 = vector.extract_strided_slice %209 {offsets = [0, 14], sizes = [8, 242], strides = [1, 1]} : vector<8x256xf32> to vector<8x242xf32>
    %408 = vector.extract_strided_slice %209 {offsets = [0, 0], sizes = [8, 14], strides = [1, 1]} : vector<8x256xf32> to vector<8x14xf32>
    %409 = tpu.concatenate %407, %408 in 1 : vector<8x242xf32>, vector<8x14xf32> -> vector<8x256xf32>
    %c54 = arith.constant 54 : index
    %c0_163 = arith.constant 0 : index
    %410 = vector.load %arg12[%c54, %c0_163] : memref<74x256xf32, #tpu.memory_space<vmem>>, vector<1x256xf32>
    %411 = vector.broadcast %410 : vector<1x256xf32> to vector<8x256xf32>
    %412 = arith.mulf %409, %411 : vector<8x256xf32>
    %c232 = arith.constant 232 : index
    %c0_164 = arith.constant 0 : index
    %413 = vector.load %arg15[%c232, %c0_164] : memref<392x256xf32, #tpu.memory_space<vmem>>, vector<8x256xf32>
    tpu.vector_store %arg15[%c232, %c0_164], %412 {strides = array<i32>} : memref<392x256xf32, #tpu.memory_space<vmem>>, vector<8x256xf32>,
    %414 = vector.extract_strided_slice %209 {offsets = [0, 15], sizes = [8, 241], strides = [1, 1]} : vector<8x256xf32> to vector<8x241xf32>
    %415 = vector.extract_strided_slice %209 {offsets = [0, 0], sizes = [8, 15], strides = [1, 1]} : vector<8x256xf32> to vector<8x15xf32>
    %416 = tpu.concatenate %414, %415 in 1 : vector<8x241xf32>, vector<8x15xf32> -> vector<8x256xf32>
    %c55 = arith.constant 55 : index
    %c0_165 = arith.constant 0 : index
    %417 = vector.load %arg12[%c55, %c0_165] : memref<74x256xf32, #tpu.memory_space<vmem>>, vector<1x256xf32>
    %418 = vector.broadcast %417 : vector<1x256xf32> to vector<8x256xf32>
    %419 = arith.mulf %416, %418 : vector<8x256xf32>
    %c240 = arith.constant 240 : index
    %c0_166 = arith.constant 0 : index
    %420 = vector.load %arg15[%c240, %c0_166] : memref<392x256xf32, #tpu.memory_space<vmem>>, vector<8x256xf32>
    tpu.vector_store %arg15[%c240, %c0_166], %419 {strides = array<i32>} : memref<392x256xf32, #tpu.memory_space<vmem>>, vector<8x256xf32>,
    %421 = vector.extract_strided_slice %209 {offsets = [0, 16], sizes = [8, 240], strides = [1, 1]} : vector<8x256xf32> to vector<8x240xf32>
    %422 = vector.extract_strided_slice %209 {offsets = [0, 0], sizes = [8, 16], strides = [1, 1]} : vector<8x256xf32> to vector<8x16xf32>
    %423 = tpu.concatenate %421, %422 in 1 : vector<8x240xf32>, vector<8x16xf32> -> vector<8x256xf32>
    %c56_167 = arith.constant 56 : index
    %c0_168 = arith.constant 0 : index
    %424 = vector.load %arg12[%c56_167, %c0_168] : memref<74x256xf32, #tpu.memory_space<vmem>>, vector<1x256xf32>
    %425 = vector.broadcast %424 : vector<1x256xf32> to vector<8x256xf32>
    %426 = arith.mulf %423, %425 : vector<8x256xf32>
    %c248 = arith.constant 248 : index
    %c0_169 = arith.constant 0 : index
    %427 = vector.load %arg15[%c248, %c0_169] : memref<392x256xf32, #tpu.memory_space<vmem>>, vector<8x256xf32>
    tpu.vector_store %arg15[%c248, %c0_169], %426 {strides = array<i32>} : memref<392x256xf32, #tpu.memory_space<vmem>>, vector<8x256xf32>,
    %428 = vector.extract_strided_slice %209 {offsets = [0, 17], sizes = [8, 239], strides = [1, 1]} : vector<8x256xf32> to vector<8x239xf32>
    %429 = vector.extract_strided_slice %209 {offsets = [0, 0], sizes = [8, 17], strides = [1, 1]} : vector<8x256xf32> to vector<8x17xf32>
    %430 = tpu.concatenate %428, %429 in 1 : vector<8x239xf32>, vector<8x17xf32> -> vector<8x256xf32>
    %c57 = arith.constant 57 : index
    %c0_170 = arith.constant 0 : index
    %431 = vector.load %arg12[%c57, %c0_170] : memref<74x256xf32, #tpu.memory_space<vmem>>, vector<1x256xf32>
    %432 = vector.broadcast %431 : vector<1x256xf32> to vector<8x256xf32>
    %433 = arith.mulf %430, %432 : vector<8x256xf32>
    %c256 = arith.constant 256 : index
    %c0_171 = arith.constant 0 : index
    %434 = vector.load %arg15[%c256, %c0_171] : memref<392x256xf32, #tpu.memory_space<vmem>>, vector<8x256xf32>
    tpu.vector_store %arg15[%c256, %c0_171], %433 {strides = array<i32>} : memref<392x256xf32, #tpu.memory_space<vmem>>, vector<8x256xf32>,
    %435 = vector.extract_strided_slice %209 {offsets = [0, 18], sizes = [8, 238], strides = [1, 1]} : vector<8x256xf32> to vector<8x238xf32>
    %436 = vector.extract_strided_slice %209 {offsets = [0, 0], sizes = [8, 18], strides = [1, 1]} : vector<8x256xf32> to vector<8x18xf32>
    %437 = tpu.concatenate %435, %436 in 1 : vector<8x238xf32>, vector<8x18xf32> -> vector<8x256xf32>
    %c58 = arith.constant 58 : index
    %c0_172 = arith.constant 0 : index
    %438 = vector.load %arg12[%c58, %c0_172] : memref<74x256xf32, #tpu.memory_space<vmem>>, vector<1x256xf32>
    %439 = vector.broadcast %438 : vector<1x256xf32> to vector<8x256xf32>
    %440 = arith.mulf %437, %439 : vector<8x256xf32>
    %c264 = arith.constant 264 : index
    %c0_173 = arith.constant 0 : index
    %441 = vector.load %arg15[%c264, %c0_173] : memref<392x256xf32, #tpu.memory_space<vmem>>, vector<8x256xf32>
    tpu.vector_store %arg15[%c264, %c0_173], %440 {strides = array<i32>} : memref<392x256xf32, #tpu.memory_space<vmem>>, vector<8x256xf32>,
    %442 = vector.extract_strided_slice %209 {offsets = [0, 19], sizes = [8, 237], strides = [1, 1]} : vector<8x256xf32> to vector<8x237xf32>
    %443 = vector.extract_strided_slice %209 {offsets = [0, 0], sizes = [8, 19], strides = [1, 1]} : vector<8x256xf32> to vector<8x19xf32>
    %444 = tpu.concatenate %442, %443 in 1 : vector<8x237xf32>, vector<8x19xf32> -> vector<8x256xf32>
    %c59 = arith.constant 59 : index
    %c0_174 = arith.constant 0 : index
    %445 = vector.load %arg12[%c59, %c0_174] : memref<74x256xf32, #tpu.memory_space<vmem>>, vector<1x256xf32>
    %446 = vector.broadcast %445 : vector<1x256xf32> to vector<8x256xf32>
    %447 = arith.mulf %444, %446 : vector<8x256xf32>
    %c272 = arith.constant 272 : index
    %c0_175 = arith.constant 0 : index
    %448 = vector.load %arg15[%c272, %c0_175] : memref<392x256xf32, #tpu.memory_space<vmem>>, vector<8x256xf32>
    tpu.vector_store %arg15[%c272, %c0_175], %447 {strides = array<i32>} : memref<392x256xf32, #tpu.memory_space<vmem>>, vector<8x256xf32>,
    %449 = vector.extract_strided_slice %209 {offsets = [0, 29], sizes = [8, 227], strides = [1, 1]} : vector<8x256xf32> to vector<8x227xf32>
    %450 = vector.extract_strided_slice %209 {offsets = [0, 0], sizes = [8, 29], strides = [1, 1]} : vector<8x256xf32> to vector<8x29xf32>
    %451 = tpu.concatenate %449, %450 in 1 : vector<8x227xf32>, vector<8x29xf32> -> vector<8x256xf32>
    %c60 = arith.constant 60 : index
    %c0_176 = arith.constant 0 : index
    %452 = vector.load %arg12[%c60, %c0_176] : memref<74x256xf32, #tpu.memory_space<vmem>>, vector<1x256xf32>
    %453 = vector.broadcast %452 : vector<1x256xf32> to vector<8x256xf32>
    %454 = arith.mulf %451, %453 : vector<8x256xf32>
    %c280 = arith.constant 280 : index
    %c0_177 = arith.constant 0 : index
    %455 = vector.load %arg15[%c280, %c0_177] : memref<392x256xf32, #tpu.memory_space<vmem>>, vector<8x256xf32>
    tpu.vector_store %arg15[%c280, %c0_177], %454 {strides = array<i32>} : memref<392x256xf32, #tpu.memory_space<vmem>>, vector<8x256xf32>,
    %456 = vector.extract_strided_slice %209 {offsets = [0, 30], sizes = [8, 226], strides = [1, 1]} : vector<8x256xf32> to vector<8x226xf32>
    %457 = vector.extract_strided_slice %209 {offsets = [0, 0], sizes = [8, 30], strides = [1, 1]} : vector<8x256xf32> to vector<8x30xf32>
    %458 = tpu.concatenate %456, %457 in 1 : vector<8x226xf32>, vector<8x30xf32> -> vector<8x256xf32>
    %c61 = arith.constant 61 : index
    %c0_178 = arith.constant 0 : index
    %459 = vector.load %arg12[%c61, %c0_178] : memref<74x256xf32, #tpu.memory_space<vmem>>, vector<1x256xf32>
    %460 = vector.broadcast %459 : vector<1x256xf32> to vector<8x256xf32>
    %461 = arith.mulf %458, %460 : vector<8x256xf32>
    %c288 = arith.constant 288 : index
    %c0_179 = arith.constant 0 : index
    %462 = vector.load %arg15[%c288, %c0_179] : memref<392x256xf32, #tpu.memory_space<vmem>>, vector<8x256xf32>
    tpu.vector_store %arg15[%c288, %c0_179], %461 {strides = array<i32>} : memref<392x256xf32, #tpu.memory_space<vmem>>, vector<8x256xf32>,
    %463 = vector.extract_strided_slice %209 {offsets = [0, 31], sizes = [8, 225], strides = [1, 1]} : vector<8x256xf32> to vector<8x225xf32>
    %464 = vector.extract_strided_slice %209 {offsets = [0, 0], sizes = [8, 31], strides = [1, 1]} : vector<8x256xf32> to vector<8x31xf32>
    %465 = tpu.concatenate %463, %464 in 1 : vector<8x225xf32>, vector<8x31xf32> -> vector<8x256xf32>
    %c62 = arith.constant 62 : index
    %c0_180 = arith.constant 0 : index
    %466 = vector.load %arg12[%c62, %c0_180] : memref<74x256xf32, #tpu.memory_space<vmem>>, vector<1x256xf32>
    %467 = vector.broadcast %466 : vector<1x256xf32> to vector<8x256xf32>
    %468 = arith.mulf %465, %467 : vector<8x256xf32>
    %c296 = arith.constant 296 : index
    %c0_181 = arith.constant 0 : index
    %469 = vector.load %arg15[%c296, %c0_181] : memref<392x256xf32, #tpu.memory_space<vmem>>, vector<8x256xf32>
    tpu.vector_store %arg15[%c296, %c0_181], %468 {strides = array<i32>} : memref<392x256xf32, #tpu.memory_space<vmem>>, vector<8x256xf32>,
    %470 = vector.extract_strided_slice %209 {offsets = [0, 32], sizes = [8, 224], strides = [1, 1]} : vector<8x256xf32> to vector<8x224xf32>
    %471 = vector.extract_strided_slice %209 {offsets = [0, 0], sizes = [8, 32], strides = [1, 1]} : vector<8x256xf32> to vector<8x32xf32>
    %472 = tpu.concatenate %470, %471 in 1 : vector<8x224xf32>, vector<8x32xf32> -> vector<8x256xf32>
    %c63 = arith.constant 63 : index
    %c0_182 = arith.constant 0 : index
    %473 = vector.load %arg12[%c63, %c0_182] : memref<74x256xf32, #tpu.memory_space<vmem>>, vector<1x256xf32>
    %474 = vector.broadcast %473 : vector<1x256xf32> to vector<8x256xf32>
    %475 = arith.mulf %472, %474 : vector<8x256xf32>
    %c304 = arith.constant 304 : index
    %c0_183 = arith.constant 0 : index
    %476 = vector.load %arg15[%c304, %c0_183] : memref<392x256xf32, #tpu.memory_space<vmem>>, vector<8x256xf32>
    tpu.vector_store %arg15[%c304, %c0_183], %475 {strides = array<i32>} : memref<392x256xf32, #tpu.memory_space<vmem>>, vector<8x256xf32>,
    %477 = vector.extract_strided_slice %209 {offsets = [0, 33], sizes = [8, 223], strides = [1, 1]} : vector<8x256xf32> to vector<8x223xf32>
    %478 = vector.extract_strided_slice %209 {offsets = [0, 0], sizes = [8, 33], strides = [1, 1]} : vector<8x256xf32> to vector<8x33xf32>
    %479 = tpu.concatenate %477, %478 in 1 : vector<8x223xf32>, vector<8x33xf32> -> vector<8x256xf32>
    %c64_184 = arith.constant 64 : index
    %c0_185 = arith.constant 0 : index
    %480 = vector.load %arg12[%c64_184, %c0_185] : memref<74x256xf32, #tpu.memory_space<vmem>>, vector<1x256xf32>
    %481 = vector.broadcast %480 : vector<1x256xf32> to vector<8x256xf32>
    %482 = arith.mulf %479, %481 : vector<8x256xf32>
    %c312 = arith.constant 312 : index
    %c0_186 = arith.constant 0 : index
    %483 = vector.load %arg15[%c312, %c0_186] : memref<392x256xf32, #tpu.memory_space<vmem>>, vector<8x256xf32>
    tpu.vector_store %arg15[%c312, %c0_186], %482 {strides = array<i32>} : memref<392x256xf32, #tpu.memory_space<vmem>>, vector<8x256xf32>,
    %484 = vector.extract_strided_slice %209 {offsets = [0, 34], sizes = [8, 222], strides = [1, 1]} : vector<8x256xf32> to vector<8x222xf32>
    %485 = vector.extract_strided_slice %209 {offsets = [0, 0], sizes = [8, 34], strides = [1, 1]} : vector<8x256xf32> to vector<8x34xf32>
    %486 = tpu.concatenate %484, %485 in 1 : vector<8x222xf32>, vector<8x34xf32> -> vector<8x256xf32>
    %c65 = arith.constant 65 : index
    %c0_187 = arith.constant 0 : index
    %487 = vector.load %arg12[%c65, %c0_187] : memref<74x256xf32, #tpu.memory_space<vmem>>, vector<1x256xf32>
    %488 = vector.broadcast %487 : vector<1x256xf32> to vector<8x256xf32>
    %489 = arith.mulf %486, %488 : vector<8x256xf32>
    %c320 = arith.constant 320 : index
    %c0_188 = arith.constant 0 : index
    %490 = vector.load %arg15[%c320, %c0_188] : memref<392x256xf32, #tpu.memory_space<vmem>>, vector<8x256xf32>
    tpu.vector_store %arg15[%c320, %c0_188], %489 {strides = array<i32>} : memref<392x256xf32, #tpu.memory_space<vmem>>, vector<8x256xf32>,
    %491 = vector.extract_strided_slice %209 {offsets = [0, 35], sizes = [8, 221], strides = [1, 1]} : vector<8x256xf32> to vector<8x221xf32>
    %492 = vector.extract_strided_slice %209 {offsets = [0, 0], sizes = [8, 35], strides = [1, 1]} : vector<8x256xf32> to vector<8x35xf32>
    %493 = tpu.concatenate %491, %492 in 1 : vector<8x221xf32>, vector<8x35xf32> -> vector<8x256xf32>
    %c66 = arith.constant 66 : index
    %c0_189 = arith.constant 0 : index
    %494 = vector.load %arg12[%c66, %c0_189] : memref<74x256xf32, #tpu.memory_space<vmem>>, vector<1x256xf32>
    %495 = vector.broadcast %494 : vector<1x256xf32> to vector<8x256xf32>
    %496 = arith.mulf %493, %495 : vector<8x256xf32>
    %c328 = arith.constant 328 : index
    %c0_190 = arith.constant 0 : index
    %497 = vector.load %arg15[%c328, %c0_190] : memref<392x256xf32, #tpu.memory_space<vmem>>, vector<8x256xf32>
    tpu.vector_store %arg15[%c328, %c0_190], %496 {strides = array<i32>} : memref<392x256xf32, #tpu.memory_space<vmem>>, vector<8x256xf32>,
    %498 = vector.extract_strided_slice %209 {offsets = [0, 45], sizes = [8, 211], strides = [1, 1]} : vector<8x256xf32> to vector<8x211xf32>
    %499 = vector.extract_strided_slice %209 {offsets = [0, 0], sizes = [8, 45], strides = [1, 1]} : vector<8x256xf32> to vector<8x45xf32>
    %500 = tpu.concatenate %498, %499 in 1 : vector<8x211xf32>, vector<8x45xf32> -> vector<8x256xf32>
    %c67 = arith.constant 67 : index
    %c0_191 = arith.constant 0 : index
    %501 = vector.load %arg12[%c67, %c0_191] : memref<74x256xf32, #tpu.memory_space<vmem>>, vector<1x256xf32>
    %502 = vector.broadcast %501 : vector<1x256xf32> to vector<8x256xf32>
    %503 = arith.mulf %500, %502 : vector<8x256xf32>
    %c336 = arith.constant 336 : index
    %c0_192 = arith.constant 0 : index
    %504 = vector.load %arg15[%c336, %c0_192] : memref<392x256xf32, #tpu.memory_space<vmem>>, vector<8x256xf32>
    tpu.vector_store %arg15[%c336, %c0_192], %503 {strides = array<i32>} : memref<392x256xf32, #tpu.memory_space<vmem>>, vector<8x256xf32>,
    %505 = vector.extract_strided_slice %209 {offsets = [0, 46], sizes = [8, 210], strides = [1, 1]} : vector<8x256xf32> to vector<8x210xf32>
    %506 = vector.extract_strided_slice %209 {offsets = [0, 0], sizes = [8, 46], strides = [1, 1]} : vector<8x256xf32> to vector<8x46xf32>
    %507 = tpu.concatenate %505, %506 in 1 : vector<8x210xf32>, vector<8x46xf32> -> vector<8x256xf32>
    %c68 = arith.constant 68 : index
    %c0_193 = arith.constant 0 : index
    %508 = vector.load %arg12[%c68, %c0_193] : memref<74x256xf32, #tpu.memory_space<vmem>>, vector<1x256xf32>
    %509 = vector.broadcast %508 : vector<1x256xf32> to vector<8x256xf32>
    %510 = arith.mulf %507, %509 : vector<8x256xf32>
    %c344 = arith.constant 344 : index
    %c0_194 = arith.constant 0 : index
    %511 = vector.load %arg15[%c344, %c0_194] : memref<392x256xf32, #tpu.memory_space<vmem>>, vector<8x256xf32>
    tpu.vector_store %arg15[%c344, %c0_194], %510 {strides = array<i32>} : memref<392x256xf32, #tpu.memory_space<vmem>>, vector<8x256xf32>,
    %512 = vector.extract_strided_slice %209 {offsets = [0, 47], sizes = [8, 209], strides = [1, 1]} : vector<8x256xf32> to vector<8x209xf32>
    %513 = vector.extract_strided_slice %209 {offsets = [0, 0], sizes = [8, 47], strides = [1, 1]} : vector<8x256xf32> to vector<8x47xf32>
    %514 = tpu.concatenate %512, %513 in 1 : vector<8x209xf32>, vector<8x47xf32> -> vector<8x256xf32>
    %c69 = arith.constant 69 : index
    %c0_195 = arith.constant 0 : index
    %515 = vector.load %arg12[%c69, %c0_195] : memref<74x256xf32, #tpu.memory_space<vmem>>, vector<1x256xf32>
    %516 = vector.broadcast %515 : vector<1x256xf32> to vector<8x256xf32>
    %517 = arith.mulf %514, %516 : vector<8x256xf32>
    %c352 = arith.constant 352 : index
    %c0_196 = arith.constant 0 : index
    %518 = vector.load %arg15[%c352, %c0_196] : memref<392x256xf32, #tpu.memory_space<vmem>>, vector<8x256xf32>
    tpu.vector_store %arg15[%c352, %c0_196], %517 {strides = array<i32>} : memref<392x256xf32, #tpu.memory_space<vmem>>, vector<8x256xf32>,
    %519 = vector.extract_strided_slice %209 {offsets = [0, 48], sizes = [8, 208], strides = [1, 1]} : vector<8x256xf32> to vector<8x208xf32>
    %520 = vector.extract_strided_slice %209 {offsets = [0, 0], sizes = [8, 48], strides = [1, 1]} : vector<8x256xf32> to vector<8x48xf32>
    %521 = tpu.concatenate %519, %520 in 1 : vector<8x208xf32>, vector<8x48xf32> -> vector<8x256xf32>
    %c70 = arith.constant 70 : index
    %c0_197 = arith.constant 0 : index
    %522 = vector.load %arg12[%c70, %c0_197] : memref<74x256xf32, #tpu.memory_space<vmem>>, vector<1x256xf32>
    %523 = vector.broadcast %522 : vector<1x256xf32> to vector<8x256xf32>
    %524 = arith.mulf %521, %523 : vector<8x256xf32>
    %c360 = arith.constant 360 : index
    %c0_198 = arith.constant 0 : index
    %525 = vector.load %arg15[%c360, %c0_198] : memref<392x256xf32, #tpu.memory_space<vmem>>, vector<8x256xf32>
    tpu.vector_store %arg15[%c360, %c0_198], %524 {strides = array<i32>} : memref<392x256xf32, #tpu.memory_space<vmem>>, vector<8x256xf32>,
    %526 = vector.extract_strided_slice %209 {offsets = [0, 49], sizes = [8, 207], strides = [1, 1]} : vector<8x256xf32> to vector<8x207xf32>
    %527 = vector.extract_strided_slice %209 {offsets = [0, 0], sizes = [8, 49], strides = [1, 1]} : vector<8x256xf32> to vector<8x49xf32>
    %528 = tpu.concatenate %526, %527 in 1 : vector<8x207xf32>, vector<8x49xf32> -> vector<8x256xf32>
    %c71 = arith.constant 71 : index
    %c0_199 = arith.constant 0 : index
    %529 = vector.load %arg12[%c71, %c0_199] : memref<74x256xf32, #tpu.memory_space<vmem>>, vector<1x256xf32>
    %530 = vector.broadcast %529 : vector<1x256xf32> to vector<8x256xf32>
    %531 = arith.mulf %528, %530 : vector<8x256xf32>
    %c368 = arith.constant 368 : index
    %c0_200 = arith.constant 0 : index
    %532 = vector.load %arg15[%c368, %c0_200] : memref<392x256xf32, #tpu.memory_space<vmem>>, vector<8x256xf32>
    tpu.vector_store %arg15[%c368, %c0_200], %531 {strides = array<i32>} : memref<392x256xf32, #tpu.memory_space<vmem>>, vector<8x256xf32>,
    %533 = vector.extract_strided_slice %209 {offsets = [0, 50], sizes = [8, 206], strides = [1, 1]} : vector<8x256xf32> to vector<8x206xf32>
    %534 = vector.extract_strided_slice %209 {offsets = [0, 0], sizes = [8, 50], strides = [1, 1]} : vector<8x256xf32> to vector<8x50xf32>
    %535 = tpu.concatenate %533, %534 in 1 : vector<8x206xf32>, vector<8x50xf32> -> vector<8x256xf32>
    %c72_201 = arith.constant 72 : index
    %c0_202 = arith.constant 0 : index
    %536 = vector.load %arg12[%c72_201, %c0_202] : memref<74x256xf32, #tpu.memory_space<vmem>>, vector<1x256xf32>
    %537 = vector.broadcast %536 : vector<1x256xf32> to vector<8x256xf32>
    %538 = arith.mulf %535, %537 : vector<8x256xf32>
    %c376 = arith.constant 376 : index
    %c0_203 = arith.constant 0 : index
    %539 = vector.load %arg15[%c376, %c0_203] : memref<392x256xf32, #tpu.memory_space<vmem>>, vector<8x256xf32>
    tpu.vector_store %arg15[%c376, %c0_203], %538 {strides = array<i32>} : memref<392x256xf32, #tpu.memory_space<vmem>>, vector<8x256xf32>,
    %540 = vector.extract_strided_slice %209 {offsets = [0, 51], sizes = [8, 205], strides = [1, 1]} : vector<8x256xf32> to vector<8x205xf32>
    %541 = vector.extract_strided_slice %209 {offsets = [0, 0], sizes = [8, 51], strides = [1, 1]} : vector<8x256xf32> to vector<8x51xf32>
    %542 = tpu.concatenate %540, %541 in 1 : vector<8x205xf32>, vector<8x51xf32> -> vector<8x256xf32>
    %c73 = arith.constant 73 : index
    %c0_204 = arith.constant 0 : index
    %543 = vector.load %arg12[%c73, %c0_204] : memref<74x256xf32, #tpu.memory_space<vmem>>, vector<1x256xf32>
    %544 = vector.broadcast %543 : vector<1x256xf32> to vector<8x256xf32>
    %545 = arith.mulf %542, %544 : vector<8x256xf32>
    %c384 = arith.constant 384 : index
    %c0_205 = arith.constant 0 : index
    %546 = vector.load %arg15[%c384, %c0_205] : memref<392x256xf32, #tpu.memory_space<vmem>>, vector<8x256xf32>
    tpu.vector_store %arg15[%c384, %c0_205], %545 {strides = array<i32>} : memref<392x256xf32, #tpu.memory_space<vmem>>, vector<8x256xf32>,
    %c0_206 = arith.constant 0 : index
    %c0_207 = arith.constant 0 : index
    %547 = vector.load %arg9[%c0_206, %c0_207] : memref<3x392xf32, #tpu.memory_space<vmem>>, vector<3x392xf32>
    %c0_208 = arith.constant 0 : index
    %c0_209 = arith.constant 0 : index
    %548 = vector.load %arg15[%c0_208, %c0_209] : memref<392x256xf32, #tpu.memory_space<vmem>>, vector<392x256xf32>
    %cst_210 = arith.constant dense<0.000000e+00> : vector<3x256xf32>
    %549 = tpu.matmul %547, %548, %cst_210 {dimension_numbers = #tpu.dot_dimension_numbers<[1], [0], [0], [1], [0, 0, 1, 1], [], []>} : vector<3x392xf32>, vector<392x256xf32>, vector<3x256xf32> -> vector<3x256xf32>
    %550 = arith.negf %549 : vector<3x256xf32>
    %551 = math.exp %550 : vector<3x256xf32>
    %cst_211 = arith.constant 1.000000e+00 : f32
    %552 = vector.broadcast %cst_211 : f32 to vector<3x256xf32>
    %553 = arith.addf %552, %551 : vector<3x256xf32>
    %554 = arith.divf %552, %553 : vector<3x256xf32>
    %c0_212 = arith.constant 0 : index
    %c0_213 = arith.constant 0 : index
    %555 = vector.load %arg10[%c0_212, %c0_213] : memref<24x3xf32, #tpu.memory_space<vmem>>, vector<24x3xf32>
    %cst_214 = arith.constant dense<0.000000e+00> : vector<24x256xf32>
    %556 = tpu.matmul %555, %554, %cst_214 {dimension_numbers = #tpu.dot_dimension_numbers<[1], [0], [0], [1], [0, 0, 1, 1], [], []>} : vector<24x3xf32>, vector<3x256xf32>, vector<24x256xf32> -> vector<24x256xf32>
    %557 = arith.mulf %196, %556 : vector<24x256xf32>
    %c0_215 = arith.constant 0 : index
    %c0_216 = arith.constant 0 : index
    %558 = vector.load %arg11[%c0_215, %c0_216] : memref<3x24xf32, #tpu.memory_space<vmem>>, vector<3x24xf32>
    %cst_217 = arith.constant dense<0.000000e+00> : vector<3x256xf32>
    %559 = tpu.matmul %558, %557, %cst_217 {dimension_numbers = #tpu.dot_dimension_numbers<[1], [0], [0], [1], [0, 0, 1, 1], [], []>} : vector<3x24xf32>, vector<24x256xf32>, vector<3x256xf32> -> vector<3x256xf32>
    %cst_218 = arith.constant dense<0xFF800000> : vector<256xf32>
    %560 = vector.multi_reduction <maximumf>, %559, %cst_218 [0] : vector<3x256xf32> to vector<256xf32>
    %561 = vector.shape_cast %560 : vector<256xf32> to vector<1x256xf32>
    %562 = vector.broadcast %561 : vector<1x256xf32> to vector<3x256xf32>
    %563 = arith.subf %559, %562 : vector<3x256xf32>
    %564 = math.exp %563 : vector<3x256xf32>
    %cst_219 = arith.constant dense<0.000000e+00> : vector<256xf32>
    %565 = vector.multi_reduction <add>, %564, %cst_219 [0] : vector<3x256xf32> to vector<256xf32>
    %566 = vector.shape_cast %565 : vector<256xf32> to vector<1x256xf32>
    %567 = vector.broadcast %566 : vector<1x256xf32> to vector<3x256xf32>
    %568 = arith.divf %564, %567 : vector<3x256xf32>
    %569 = vector.extract_strided_slice %568 {offsets = [0, 0], sizes = [1, 256], strides = [1, 1]} : vector<3x256xf32> to vector<1x256xf32>
    %570 = vector.extract_strided_slice %557 {offsets = [16, 0], sizes = [8, 256], strides = [1, 1]} : vector<24x256xf32> to vector<8x256xf32>
    %571 = vector.broadcast %569 : vector<1x256xf32> to vector<8x256xf32>
    %572 = arith.mulf %571, %570 : vector<8x256xf32>
    %573 = vector.extract_strided_slice %568 {offsets = [1, 0], sizes = [1, 256], strides = [1, 1]} : vector<3x256xf32> to vector<1x256xf32>
    %574 = vector.extract_strided_slice %557 {offsets = [8, 0], sizes = [8, 256], strides = [1, 1]} : vector<24x256xf32> to vector<8x256xf32>
    %575 = vector.broadcast %573 : vector<1x256xf32> to vector<8x256xf32>
    %576 = arith.mulf %575, %574 : vector<8x256xf32>
    %577 = arith.addf %572, %576 : vector<8x256xf32>
    %578 = vector.extract_strided_slice %568 {offsets = [2, 0], sizes = [1, 256], strides = [1, 1]} : vector<3x256xf32> to vector<1x256xf32>
    %579 = vector.extract_strided_slice %557 {offsets = [0, 0], sizes = [8, 256], strides = [1, 1]} : vector<24x256xf32> to vector<8x256xf32>
    %580 = vector.broadcast %578 : vector<1x256xf32> to vector<8x256xf32>
    %581 = arith.mulf %580, %579 : vector<8x256xf32>
    %582 = arith.addf %577, %581 : vector<8x256xf32>
    %583 = arith.negf %582 : vector<8x256xf32>
    %584 = math.exp %583 : vector<8x256xf32>
    %cst_220 = arith.constant 1.000000e+00 : f32
    %585 = vector.broadcast %cst_220 : f32 to vector<8x256xf32>
    %586 = arith.addf %585, %584 : vector<8x256xf32>
    %587 = arith.divf %585, %586 : vector<8x256xf32>
    %c0_221 = arith.constant 0 : index
    %c0_222 = arith.constant 0 : index
    %c0_223 = arith.constant 0 : index
    %588 = vector.load %arg13[%c0_221, %c0_222, %c0_223] : memref<1x8x256xf32, #tpu.memory_space<vmem>>, vector<1x8x256xf32>
    %589 = vector.shape_cast %588 : vector<1x8x256xf32> to vector<8x256xf32>
    %590 = vector.shape_cast %587 : vector<8x256xf32> to vector<1x8x256xf32>
    tpu.vector_store %arg13[%c0_221, %c0_222, %c0_223], %590 {strides = array<i32>} : memref<1x8x256xf32, #tpu.memory_space<vmem>>, vector<1x8x256xf32>,
    return
  }
  func.func @transform_0(%arg0: i32) -> (i32, i32, i32) {
    %c0_i32 = arith.constant 0 : i32
    %c0_i32_0 = arith.constant 0 : i32
    %c0_i32_1 = arith.constant 0 : i32
    return %arg0, %c0_i32, %c0_i32_0 : i32, i32, i32
  }
  func.func @transform_1(%arg0: i32) -> (i32, i32) {
    %c0_i32 = arith.constant 0 : i32
    %c0_i32_0 = arith.constant 0 : i32
    %c0_i32_1 = arith.constant 0 : i32
    return %c0_i32, %c0_i32_0 : i32, i32
  }
  func.func @transform_2(%arg0: i32) -> (i32, i32) {
    %c0_i32 = arith.constant 0 : i32
    %c0_i32_0 = arith.constant 0 : i32
    %c0_i32_1 = arith.constant 0 : i32
    return %c0_i32, %c0_i32_0 : i32, i32
  }
  func.func @transform_3(%arg0: i32) -> (i32, i32) {
    %c0_i32 = arith.constant 0 : i32
    %c0_i32_0 = arith.constant 0 : i32
    %c0_i32_1 = arith.constant 0 : i32
    return %c0_i32, %c0_i32_0 : i32, i32
  }
  func.func @transform_4(%arg0: i32) -> (i32, i32) {
    %c0_i32 = arith.constant 0 : i32
    %c0_i32_0 = arith.constant 0 : i32
    %c0_i32_1 = arith.constant 0 : i32
    return %c0_i32, %c0_i32_0 : i32, i32
  }
  func.func @transform_5(%arg0: i32) -> (i32, i32) {
    %c0_i32 = arith.constant 0 : i32
    %c0_i32_0 = arith.constant 0 : i32
    %c0_i32_1 = arith.constant 0 : i32
    return %c0_i32, %c0_i32_0 : i32, i32
  }
  func.func @transform_6(%arg0: i32) -> (i32, i32) {
    %c0_i32 = arith.constant 0 : i32
    %c0_i32_0 = arith.constant 0 : i32
    %c0_i32_1 = arith.constant 0 : i32
    return %c0_i32, %c0_i32_0 : i32, i32
  }
  func.func @transform_7(%arg0: i32) -> (i32, i32) {
    %c0_i32 = arith.constant 0 : i32
    %c0_i32_0 = arith.constant 0 : i32
    %c0_i32_1 = arith.constant 0 : i32
    return %c0_i32, %c0_i32_0 : i32, i32
  }
  func.func @transform_8(%arg0: i32) -> (i32, i32) {
    %c0_i32 = arith.constant 0 : i32
    %c0_i32_0 = arith.constant 0 : i32
    %c0_i32_1 = arith.constant 0 : i32
    return %c0_i32, %c0_i32_0 : i32, i32
  }
  func.func @transform_9(%arg0: i32) -> (i32, i32) {
    %c0_i32 = arith.constant 0 : i32
    %c0_i32_0 = arith.constant 0 : i32
    %c0_i32_1 = arith.constant 0 : i32
    return %c0_i32, %c0_i32_0 : i32, i32
  }
  func.func @transform_10(%arg0: i32) -> (i32, i32) {
    %c0_i32 = arith.constant 0 : i32
    %c0_i32_0 = arith.constant 0 : i32
    %c0_i32_1 = arith.constant 0 : i32
    return %c0_i32, %c0_i32_0 : i32, i32
  }
  func.func @transform_11(%arg0: i32) -> (i32, i32) {
    %c0_i32 = arith.constant 0 : i32
    %c0_i32_0 = arith.constant 0 : i32
    %c0_i32_1 = arith.constant 0 : i32
    return %c0_i32, %c0_i32_0 : i32, i32
  }
  func.func @transform_12(%arg0: i32) -> (i32, i32, i32) {
    %c0_i32 = arith.constant 0 : i32
    %c0_i32_0 = arith.constant 0 : i32
    %c0_i32_1 = arith.constant 0 : i32
    return %arg0, %c0_i32, %c0_i32_0 : i32, i32, i32
  }
}

</mosaic_0001>

<bundles_post_ra>
// kernel: tpu_custom_call.1
= control target key start
LH: loop header
LB: loop body
LE: loop exit
PB: predicated region body
PF: predicated region fallthrough
CT: control target
= control target key end

     0   :  { %s5427_s0 = inlined_call_operand.vmem [shape: f32[2,8,256], index: 0, kind: input, shape index: {}]   ;;  %s5428_s1 = inlined_call_operand.vmem [shape: f32[24,200], index: 1, kind: input, shape index: {}]   ;;  %s5429_s2 = inlined_call_operand.vmem [shape: f32[24,1], index: 2, kind: input, shape index: {}]   ;;  %s5430_s3 = inlined_call_operand.vmem [shape: f32[24,24], index: 3, kind: input, shape index: {}]   ;;  %s5431_s4 = inlined_call_operand.vmem [shape: f32[24,1], index: 4, kind: input, shape index: {}]   ;;  %s5432_s5 = inlined_call_operand.vmem [shape: f32[256,1], index: 5, kind: input, shape index: {}]   ;;  %s5433_s6 = inlined_call_operand.vmem [shape: f32[1,256], index: 6, kind: input, shape index: {}]   ;;  %s5434_s7 = inlined_call_operand.vmem [shape: f32[3,24], index: 7, kind: input, shape index: {}]   ;;  %s5435_s8 = inlined_call_operand.vmem [shape: f32[3,392], index: 8, kind: input, shape index: {}]   ;;  %s5436_s9 = inlined_call_operand.vmem [shape: f32[24,3], index: 9, kind: input, shape index: {}]   ;;  %s5437_s10 = inlined_call_operand.vmem [shape: f32[3,24], index: 10, kind: input, shape index: {}]   ;;  %s5438_s11 = inlined_call_operand.vmem [shape: f32[74,256], index: 11, kind: input, shape index: {}]   ;;  %s5439_s12 = inlined_call_operand.hbm [shape: f32[2,8,256], index: 12, kind: output, shape index: {}]  }
   0x1   :  { %5548 = sst [smem:[#allocation29_spill]] %s5427_s0 }
   0x2   :  { %5549 = sst [smem:[#allocation30_spill]] %s5428_s1 }
   0x3   :  { %5550 = sst [smem:[#allocation31_spill]] %s5429_s2 }
   0x4   :  { %5551 = sst [smem:[#allocation32_spill]] %s5430_s3 }
   0x5   :  { %5552 = sst [smem:[#allocation33_spill]] %s5431_s4 }
   0x6   :  { %5553 = sst [smem:[#allocation34_spill]] %s5434_s7 }
   0x7   :  { %5554 = sst [smem:[#allocation35_spill]] %s5437_s10 }
   0x8   :  { %5555 = sst [smem:[#allocation36_spill]] %s5439_s12 }
   0x9   :  { %17 = vsyncpa [#allocation5], 0 }
   0xa   :  { %19 = vsyncpa [#allocation5 + $0x1], 0  ;;  %s3889_s6 = smov 0   ;;  %s3891_s20 = smov 0  }
   0xb   :  { %s3893_s21 = smov 0   ;;  %s3895_s22 = smov 0  }
   0xc LB: > { %5556 = sst [smem:[#allocation7_spill]] %s3758_s6  ;;  %s3910_s23 = sadd.s32 4294967295, %s3770_s22   ;;  %s3770_s22 = sphi %s3895_s22, %s5708_s22   ;;  %s3766_s21 = sphi %s3893_s21, %s5711_s21   ;;  %s3762_s20 = sphi %s3891_s20, %s5710_s20   ;;  %s3758_s6 = sphi %s3889_s6, %s5709_s6  }
   0xd   : > { %5557 = sst [smem:[#allocation8_spill]] %s3762_s20  ;;  %s3419_s24 = sadd.s32 4294967294, %s3770_s22  }
   0xe   : > { %5558 = sst [smem:[#allocation9_spill]] %s3766_s21  ;;  %s3914_s25 = sadd.s32 1, %s3770_s22  }
   0xf   : > { %5559 = sst [smem:[#allocation10_spill]] %s3770_s22  ;;  %s289_s26 = sadd.s32 1, %s3766_s21 }
  0x10   : > { %5560 = sst [smem:[#allocation11_spill]] %s3910_s23  ;;  %s286_s27 = ssub.s32 %s3770_s22, %s3914_s25 }
  0x11   : > { %5561 = sst [smem:[#allocation12_spill]] %s3914_s25  ;;  %p299_p0 = scmp.ne.s32.totalorder %s3766_s21, %s3762_s20 }
  0x12   : > { %p287_p1 = scmp.eq.s32.totalorder %s286_s27, 0  ;;  %p300_p2 = scmp.eq.s32.totalorder %s3910_s23, 1 }
  0x13   : > { %p305_p3 = scmp.ne.s32.totalorder %s3762_s20, %s3758_s6  ;;  %p306_p4 = scmp.eq.s32.totalorder %s3419_s24, 1 }
  0x14   : > { %s3925_s28 = scalar_select %p287_p1, %s3766_s21, %s289_s26  }
  0x15   : > { %p3927_p5 = por %p300_p2, %p299_p0  ;;  %p3931_p6 = por %p306_p4, %p305_p3 }
  0x16   : > { %5562 = sst [smem:[#allocation13_spill]] %s3925_s28  ;;  %p3422_p7 = scmp.ge.s32.totalorder %s3770_s22, 1 }
  0x17   : > { %s5563_s29 = scalar_select %p3927_p5, 1, 0 }
  0x18   : > { %s5565_s30 = scalar_select %p3931_p6, 1, 0 }
  0x19   : > { %5564 = sst [smem:[#allocation14_spill]] %s5563_s29  ;;  %p365_p8 = scmp.lt.s32.totalorder %s3770_s22, 3 }
  0x1a   : > { %5566 = sst [smem:[#allocation15_spill]] %s5565_s30 }
  0x1b   : > { %p366_p9 = pnand %p3422_p7, %p365_p8 }
  0x1d   : > { %369 = sbr.rel (%p366_p9) target bundleno = 2264 (0x8d8), region = 68 }
  0x22   : > { %p407_p10 = scmp.lt.s32.totalorder %s3910_s23, 1  ;;  %s5567_s0 = sld [smem:[#allocation29_spill]]  ;;  %vm1139_vm0 = vcmask 588800   ;;  %v3796_v3 = vmov 0   ;;  %v428_v7 = vlaneseq  ;;  %vm5494_vm1 = vcmask 1031168  }
  0x23   : > { %s5454_s18 = smov 126   ;;  %s5476_s19 = smov 114   ;;  %3645 = vset.pattern.permute.xlu1 %v3796_v3  ;;  %3644 = vset.pattern.permute.xlu0 %v3796_v3  ;;  %v3439_v11 = vld [vmem:[%s5438_s11 + $0x17] ss:$8 sm:$0x3]  ;;  %vm799_vm2 = vcmask 932864  }
  0x24   : > { %s408_s13 = scalar_select %p407_p10, %s3910_s23, 1  ;;  %v4055_v8 = vshrl.u32 %v428_v7, 7  ;;  %v3438_v14 = vld [vmem:[%s5438_s11 + $0x16] ss:$8 sm:$0x3]  ;;  %vm5491_vm3 = vcmask 1039360  }
  0x25   : > { %s5452_s5 = smov 127   ;;  %s5450_s24 = smov 1   ;;  %v3437_v17 = vld [vmem:[%s5438_s11 + $0x15] ss:$8 sm:$0x3]  ;;  %vm5483_vm4 = vcmask 7168  }
  0x26   : > { %s3529_s14 = sshll.u32 %s408_s13, 4  ;;  %s5448_s26 = smov 2   ;;  %5570 = vst [vmem:[#allocation16_spill] sm:$0xff] %v4055_v8  ;;  %v4058_v9 = vsub.s32 1, %v4055_v8  ;;  %v4061_v10 = vsub.s32 0, %v4055_v8  ;;  %vm5482_vm5 = vcmask 15360  }
  0x27   : > { %s5446_s27 = smov 14   ;;  %s5444_s13 = smov 15   ;;  %v3436_v30 = vld [vmem:[%s5438_s11 + $0x13] ss:$8 sm:$0x3]  ;;  %vm5481_vm6 = vcmask 113664  }
  0x28   : > { %s411_s17 = scalar_lea.vmem %s5567_s0, %s3529_s14  ;;  %s5440_s14 = smov 16   ;;  %v815_v15 = vrot.slane %v3439_v11, %v4058_v9  ;;  %v811_v16 = vrot.slane %v3439_v11, %v4061_v10  ;;  %v788_v20 = vrot.slane %v3438_v14, %v4058_v9  ;;  %v784_v21 = vrot.slane %v3438_v14, %v4061_v10  ;;  %v3435_v41 = vld [vmem:[%s5438_s11 + $0x12] ss:$8 sm:$0x3] }
  0x29   : > { %v3942_v0 = vld [vmem:[%s411_s17] sm:$0xff]  ;;  %v3948_v1 = vld [vmem:[%s411_s17 + $0x8] sm:$0xff]  ;;  %s5442_s15 = smov 17   ;;  %s5502_s16 = smov 18   ;;  %v761_v25 = vrot.slane %v3437_v17, %v4058_v9  ;;  %v757_v29 = vrot.slane %v3437_v17, %v4061_v10  ;;  %v732_v39 = vrot.slane %v3436_v30, %v4058_v9  ;;  %v728_v40 = vrot.slane %v3436_v30, %v4061_v10 }
  0x2a   : > { %768 = vrot.lane.b32.xlu1 %v3942_v0, %s5454_s18  ;;  %795 = vrot.lane.b32.xlu0 %v3942_v0, %s5476_s19  ;;  %s5489_s17 = smov 30   ;;  %s5568_s1 = sld [smem:[#allocation30_spill]]  ;;  %v705_v48 = vrot.slane %v3435_v41, %v4058_v9  ;;  %v701_v49 = vrot.slane %v3435_v41, %v4061_v10  ;;  %v3434_v50 = vld [vmem:[%s5438_s11 + $0x11] ss:$8 sm:$0x3]  ;;  %vm5480_vm7 = vcmask 121856  }
  0x2b   : > { %s5569_s2 = sld [smem:[#allocation31_spill]]  ;;  %v678_v57 = vrot.slane %v3434_v50, %v4058_v9  ;;  %v674_v58 = vrot.slane %v3434_v50, %v4061_v10  ;;  %v3433_v59 = vld [vmem:[%s5438_s11 + $0x10] ss:$8 sm:$0x3]  ;;  %vm5479_vm8 = vcmask 130048   ;;  %vm5478_vm9 = vcmask 138240  }
  0x2c   : > { %v647_v3 = vrot.slane %v3433_v59, %v4061_v10  ;;  %vm555_vm10 = vcmask 146432   ;;  %vm528_vm11 = vcmask 244736   ;;  %vm501_vm12 = vcmask 252928   ;;  %s5571_s3 = sld [smem:[#allocation32_spill]]  ;;  %s5510_s0 = smov 46  }
  0x2d   : > { %vm474_vm13 = vcmask 261120   ;;  %vm447_vm14 = vcmask 269312   ;;  %vm421_vm15 = vcmask 277504   ;;  %s5572_s4 = sld [smem:[#allocation33_spill]]  ;;  %s5525_s28 = smov 13  }
  0x2e   : > { %770 = vrot.lane.b32.xlu1 %v3948_v1, %s5454_s18  ;;  %797 = vrot.lane.b32.xlu0 %v3948_v1, %s5476_s19  ;;  %s5464_s18 = smov 97   ;;  %s5579_s7 = sld [smem:[#allocation34_spill]] }
  0x2f   : > { %s5581_s19 = smov 31   ;;  %s5524_s21 = smov 109  }
  0x30   : > { %v1066_v2 = vld [vmem:[%s5568_s1 + $0x8] sm:$0xff]  ;;  %s5595_s25 = smov 14   ;;  %s5596_s30 = smov 110  }
  0x31   : > { %3449 = vmatprep.mubr.msk.f32.mxu0 %vm1139_vm0, %v1066_v2  ;;  %v1122_v4 = vld [vmem:[%s5569_s2 + $0x8] sm:$0xff]  ;;  %v1123_v5 = vld [vmem:[%s5569_s2 + $0x10] sm:$0xff]  ;;  %v1121_v6 = vld [vmem:[%s5569_s2] sm:$0xff]  ;;  %v651_v2 = vrot.slane %v3433_v59, %v4058_v9  ;;  %s5515_s2 = smov 50   ;;  %s5597_s6 = smov 15  }
  0x32   : > { %743 = vrot.lane.b32.xlu1 %v3948_v1, %s5452_s5  ;;  %741 = vrot.lane.b32.xlu0 %v3942_v0, %s5452_s5  ;;  %s5460_s5 = smov 96   ;;  %s5602_s22 = smov 78  }
  0x33   : > { %s5603_s12 = smov 19   ;;  %s5604_s29 = smov 112  }
  0x34   : > { %s5605_s23 = smov 29   ;;  %s5606_s20 = smov 79  }
  0x35   : > { %s5607_s10 = smov 113  }
  0x36   : > { %715 = vrot.lane.b32.xlu1 %v3942_v0, %s5450_s24  ;;  %712 = vrot.lane.b32.xlu0 %v3948_v1, %s5450_s24  ;;  %s5458_s24 = smov 95  }
  0x3a   : > { %688 = vrot.lane.b32.xlu1 %v3942_v0, %s5448_s26  ;;  %685 = vrot.lane.b32.xlu0 %v3948_v1, %s5448_s26  ;;  %s5456_s26 = smov 94  }
  0x3e   : > { %661 = vrot.lane.b32.xlu1 %v3942_v0, %s5446_s27  ;;  %658 = vrot.lane.b32.xlu0 %v3948_v1, %s5446_s27  ;;  %s5462_s27 = smov 34  }
  0x42   : > { %634 = vrot.lane.b32.xlu1 %v3942_v0, %s5444_s13  ;;  %631 = vrot.lane.b32.xlu0 %v3948_v1, %s5444_s13  ;;  %s5472_s13 = smov 33  }
  0x46   : > { %607 = vrot.lane.b32.xlu1 %v3942_v0, %s5440_s14  ;;  %604 = vrot.lane.b32.xlu0 %v3948_v1, %s5440_s14  ;;  %s5487_s14 = smov 31  }
  0x4a   : > { %580 = vrot.lane.b32.xlu1 %v3942_v0, %s5442_s15  ;;  %577 = vrot.lane.b32.xlu0 %v3948_v1, %s5442_s15  ;;  %s5474_s15 = smov 32  }
  0x4e   : > { %553 = vrot.lane.b32.xlu1 %v3942_v0, %s5502_s16  ;;  %550 = vrot.lane.b32.xlu0 %v3948_v1, %s5502_s16 }
  0x52   : > { %526 = vrot.lane.b32.xlu1 %v3942_v0, %s5489_s17  ;;  %523 = vrot.lane.b32.xlu0 %v3948_v1, %s5489_s17  ;;  %s5496_s17 = smov 29  }
  0x56   : > { %499 = vrot.lane.b32.xlu1 %v3942_v0, %s5487_s14  ;;  %496 = vrot.lane.b32.xlu0 %v3948_v1, %s5487_s14  ;;  %s5495_s14 = smov 79  }
  0x5a   : > { %472 = vrot.lane.b32.xlu1 %v3942_v0, %s5474_s15  ;;  %469 = vrot.lane.b32.xlu0 %v3948_v1, %s5474_s15  ;;  %s5582_s15 = smov 114  }
  0x5e   : > { %445 = vrot.lane.b32.xlu1 %v3942_v0, %s5472_s13  ;;  %442 = vrot.lane.b32.xlu0 %v3948_v1, %s5472_s13  ;;  %s5499_s13 = smov 80  }
  0x62   : > { %419 = vrot.lane.b32.xlu1 %v3942_v0, %s5462_s27  ;;  %415 = vrot.lane.b32.xlu0 %v3948_v1, %s5462_s27  ;;  %s5500_s27 = smov 19  }
  0x66   : > { %1040 = vrot.lane.b32.xlu1 %v3948_v1, %s5456_s26  ;;  %1038 = vrot.lane.b32.xlu0 %v3942_v0, %s5456_s26  ;;  %s5466_s26 = smov 98  }
  0x6a   : > { %1013 = vrot.lane.b32.xlu1 %v3948_v1, %s5458_s24  ;;  %1011 = vrot.lane.b32.xlu0 %v3942_v0, %s5458_s24  ;;  %s5468_s24 = smov 110  }
  0x6e   : > { %986 = vrot.lane.b32.xlu1 %v3948_v1, %s5460_s5  ;;  %984 = vrot.lane.b32.xlu0 %v3942_v0, %s5460_s5  ;;  %s5501_s5 = smov 78  }
  0x72   : > { %959 = vrot.lane.b32.xlu1 %v3948_v1, %s5464_s18  ;;  %957 = vrot.lane.b32.xlu0 %v3942_v0, %s5464_s18  ;;  %s5470_s18 = smov 111  }
  0x76   : > { %932 = vrot.lane.b32.xlu1 %v3948_v1, %s5466_s26  ;;  %930 = vrot.lane.b32.xlu0 %v3942_v0, %s5466_s26  ;;  %s5498_s26 = smov 112  }
  0x7a   : > { %905 = vrot.lane.b32.xlu1 %v3948_v1, %s5468_s24  ;;  %903 = vrot.lane.b32.xlu0 %v3942_v0, %s5468_s24  ;;  %s5497_s24 = smov 113  }
  0x7e   : > { %878 = vrot.lane.b32.xlu1 %v3948_v1, %s5470_s18  ;;  %876 = vrot.lane.b32.xlu0 %v3942_v0, %s5470_s18  ;;  %s5580_s18 = smov 30  }
  0x82   : > { %851 = vrot.lane.b32.xlu1 %v3948_v1, %s5498_s26  ;;  %849 = vrot.lane.b32.xlu0 %v3942_v0, %s5498_s26 }
  0x86   : > { %824 = vrot.lane.b32.xlu1 %v3948_v1, %s5497_s24  ;;  %822 = vrot.lane.b32.xlu0 %v3942_v0, %s5497_s24 }
  0x8a   : > { %1131 = vperm.xlu1 %3645, %v1122_v4   ;;  %1136 = vperm.xlu0 %3644, %v1123_v5   ;;  %v3432_v4 = vld [vmem:[%s5438_s11 + $0x7] ss:$8 sm:$0x3] }
  0x8b   : > { %v624_v14 = vrot.slane %v3432_v4, %v4058_v9 }
  0x8e   : > { %1126 = vperm.xlu1 %3645, %v1121_v6  }
  0x9c   : > { %v769_v12 = vpop.permute.xlu1 %768  ;;  %v796_v13 = vpop.permute.xlu0 %795 }
  0xa0   : > { %v771_v18 = vpop.permute.xlu1 %770  ;;  %v798_v19 = vpop.permute.xlu0 %797 }
  0xa1   : > { %v777_v22 = vsel %vm5494_vm1, %v771_v18, %v769_v12  ;;  %v804_v23 = vsel %vm799_vm2, %v798_v19, %v796_v13  ;;  %v800_v24 = vsel %vm799_vm2, %v796_v13, %v798_v19  ;;  %v773_v26 = vsel %vm5494_vm1, %v769_v12, %v771_v18 }
  0xa2   : > { %v819_v27 = vmul.f32 %v815_v15, %v804_v23  ;;  %v818_v28 = vmul.f32 %v811_v16, %v800_v24  ;;  %v792_v33 = vmul.f32 %v788_v20, %v777_v22  ;;  %v791_v36 = vmul.f32 %v784_v21, %v773_v26  ;;  %v3431_v16 = vld [vmem:[%s5438_s11 + $0x6] ss:$8 sm:$0x3] }
  0xa3   : > { %v620_v15 = vrot.slane %v3432_v4, %v4061_v10  ;;  %v597_v23 = vrot.slane %v3431_v16, %v4058_v9  ;;  %v593_v24 = vrot.slane %v3431_v16, %v4061_v10  ;;  %vm1536_vm1 = vcmask 1045504  }
  0xa4   : > { %v744_v31 = vpop.permute.xlu1 %743  ;;  %1149 = vmatprep.subr.mxu0 %v819_v27  ;;  %v742_v32 = vpop.permute.xlu0 %741 }
  0xa5   : > { %v746_v34 = vsel %vm5491_vm3, %v742_v32, %v744_v31  ;;  %v750_v35 = vsel %vm5491_vm3, %v744_v31, %v742_v32  ;;  %1150 = vmatpush1.msra.mxu0 %v818_v28  ;;  %vm5492_vm3 = vcmask 195584  }
  0xa6   : > { %1151 = vmatprep.subr.mxu0 %v792_v33  ;;  %v765_v37 = vmul.f32 %v761_v25, %v750_v35  ;;  %v764_v38 = vmul.f32 %v757_v29, %v746_v34  ;;  %v3430_v25 = vld [vmem:[%s5438_s11 + $0x5] ss:$8 sm:$0x3]  ;;  %v3429_v34 = vld [vmem:[%s5438_s11 + $0x4] ss:$8 sm:$0x3] }
  0xa7   : > { %1152 = vmatpush1.msra.mxu0 %v791_v36  ;;  %v570_v32 = vrot.slane %v3430_v25, %v4058_v9  ;;  %v566_v33 = vrot.slane %v3430_v25, %v4061_v10  ;;  %v543_v41 = vrot.slane %v3429_v34, %v4058_v9 }
  0xa8   : > { %v716_v42 = vpop.permute.xlu1 %715  ;;  %1153 = vmatprep.subr.mxu0 %v765_v37  ;;  %v713_v43 = vpop.permute.xlu0 %712 }
  0xa9   : > { %v718_v44 = vsel %vm5483_vm4, %v716_v42, %v713_v43  ;;  %v721_v45 = vsel %vm5483_vm4, %v713_v43, %v716_v42  ;;  %1154 = vmatpush1.msra.mxu0 %v764_v38  ;;  %v539_v42 = vrot.slane %v3429_v34, %v4061_v10  ;;  %v3428_v43 = vld [vmem:[%s5438_s11 + $0x3] ss:$8 sm:$0x3]  ;;  %vm5485_vm4 = vcmask 900096  }
  0xaa   : > { %1155 = vmatprep.subr.mxu0 %v3948_v1  ;;  %v736_v46 = vmul.f32 %v732_v39, %v718_v44  ;;  %v735_v47 = vmul.f32 %v728_v40, %v721_v45  ;;  %v516_v50 = vrot.slane %v3428_v43, %v4058_v9 }
  0xab   : > { %1156 = vmatpush1.msra.mxu0 %v3942_v0 }
  0xac   : > { %v689_v51 = vpop.permute.xlu1 %688  ;;  %1157 = vmatprep.subr.mxu0 %v736_v46  ;;  %v686_v52 = vpop.permute.xlu0 %685 }
  0xad   : > { %v691_v53 = vsel %vm5482_vm5, %v689_v51, %v686_v52  ;;  %v694_v54 = vsel %vm5482_vm5, %v686_v52, %v689_v51  ;;  %1158 = vmatpush1.msra.mxu0 %v735_v47  ;;  %v512_v51 = vrot.slane %v3428_v43, %v4061_v10  ;;  %v3427_v52 = vld [vmem:[%s5438_s11 + $0x2] ss:$8 sm:$0x3]  ;;  %vm5484_vm5 = vcmask 801792  }
  0xae   : > { %v709_v55 = vmul.f32 %v705_v48, %v691_v53  ;;  %v708_v56 = vmul.f32 %v701_v49, %v694_v54  ;;  %v489_v59 = vrot.slane %v3427_v52, %v4058_v9 }
  0xb0   : > { %v662_v60 = vpop.permute.xlu1 %661  ;;  %1159 = vmatprep.subr.mxu0 %v709_v55  ;;  %v659_v61 = vpop.permute.xlu0 %658 }
  0xb1   : > { %v664_v62 = vsel %vm5481_vm6, %v662_v60, %v659_v61  ;;  %v667_v63 = vsel %vm5481_vm6, %v659_v61, %v662_v60  ;;  %1160 = vmatpush1.msra.mxu0 %v708_v56  ;;  %v485_v60 = vrot.slane %v3427_v52, %v4061_v10  ;;  %v3426_v61 = vld [vmem:[%s5438_s11 + $0x1] ss:$8 sm:$0x3]  ;;  %vm5493_vm6 = vcmask 793600  }
  0xb2   : > { %v682_v0 = vmul.f32 %v678_v57, %v664_v62  ;;  %v681_v1 = vmul.f32 %v674_v58, %v667_v63  ;;  %v462_v4 = vrot.slane %v3426_v61, %v4058_v9 }
  0xb4   : > { %v635_v5 = vpop.permute.xlu1 %634  ;;  %1161 = vmatprep.subr.mxu0 %v682_v0  ;;  %v632_v6 = vpop.permute.xlu0 %631 }
  0xb5   : > { %v637_v7 = vsel %vm5480_vm7, %v635_v5, %v632_v6  ;;  %v640_v11 = vsel %vm5480_vm7, %v632_v6, %v635_v5  ;;  %1162 = vmatpush1.msra.mxu0 %v681_v1  ;;  %v458_v5 = vrot.slane %v3426_v61, %v4061_v10  ;;  %v426_v6 = vld [vmem:[%s5438_s11] ss:$8 sm:$0x3]  ;;  %vm988_vm7 = vcmask 785408  }
  0xb6   : > { %v655_v12 = vmul.f32 %v651_v2, %v637_v7  ;;  %v654_v13 = vmul.f32 %v647_v3, %v640_v11  ;;  %v435_v16 = vrot.slane %v426_v6, %v4058_v9 }
  0xb8   : > { %v608_v17 = vpop.permute.xlu1 %607  ;;  %1163 = vmatprep.subr.mxu0 %v655_v12  ;;  %v605_v18 = vpop.permute.xlu0 %604 }
  0xb9   : > { %v610_v19 = vsel %vm5479_vm8, %v608_v17, %v605_v18  ;;  %v613_v20 = vsel %vm5479_vm8, %v605_v18, %v608_v17  ;;  %1164 = vmatpush1.msra.mxu0 %v654_v13  ;;  %v431_v17 = vrot.slane %v426_v6, %v4061_v10  ;;  %v3448_v18 = vld [vmem:[%s5438_s11 + $0x30] ss:$8 sm:$0x3]  ;;  %vm1015_vm8 = vcmask 777216  }
  0xba   : > { %v628_v21 = vmul.f32 %v624_v14, %v610_v19  ;;  %v627_v22 = vmul.f32 %v620_v15, %v613_v20  ;;  %v1058_v25 = vrot.slane %v3448_v18, %v4058_v9 }
  0xbc   : > { %v581_v26 = vpop.permute.xlu1 %580  ;;  %1165 = vmatprep.subr.mxu0 %v628_v21  ;;  %v578_v27 = vpop.permute.xlu0 %577 }
  0xbd   : > { %v583_v28 = vsel %vm5478_vm9, %v581_v26, %v578_v27  ;;  %v586_v29 = vsel %vm5478_vm9, %v578_v27, %v581_v26  ;;  %1166 = vmatpush1.msra.mxu0 %v627_v22  ;;  %vm1042_vm9 = vcmask 769024   ;;  %v1054_v26 = vrot.slane %v3448_v18, %v4061_v10  ;;  %v3447_v27 = vld [vmem:[%s5438_s11 + $0x27] ss:$8 sm:$0x3] }
  0xbe   : > { %v601_v30 = vmul.f32 %v597_v23, %v583_v28  ;;  %v600_v31 = vmul.f32 %v593_v24, %v586_v29  ;;  %v1031_v34 = vrot.slane %v3447_v27, %v4058_v9 }
  0xc0   : > { %v554_v35 = vpop.permute.xlu1 %553  ;;  %1167 = vmatprep.subr.mxu0 %v601_v30  ;;  %v551_v36 = vpop.permute.xlu0 %550 }
  0xc1   : > { %v556_v37 = vsel %vm555_vm10, %v554_v35, %v551_v36  ;;  %v559_v38 = vsel %vm555_vm10, %v551_v36, %v554_v35  ;;  %1168 = vmatpush1.msra.mxu0 %v600_v31  ;;  %v1027_v35 = vrot.slane %v3447_v27, %v4061_v10  ;;  %v3446_v36 = vld [vmem:[%s5438_s11 + $0x26] ss:$8 sm:$0x3] }
  0xc2   : > { %v574_v39 = vmul.f32 %v570_v32, %v556_v37  ;;  %v573_v40 = vmul.f32 %v566_v33, %v559_v38  ;;  %v1004_v43 = vrot.slane %v3446_v36, %v4058_v9 }
  0xc4   : > { %v527_v44 = vpop.permute.xlu1 %526  ;;  %1169 = vmatprep.subr.mxu0 %v574_v39  ;;  %v524_v45 = vpop.permute.xlu0 %523 }
  0xc5   : > { %v529_v46 = vsel %vm528_vm11, %v527_v44, %v524_v45  ;;  %v532_v47 = vsel %vm528_vm11, %v524_v45, %v527_v44  ;;  %1170 = vmatpush1.msra.mxu0 %v573_v40  ;;  %v1000_v44 = vrot.slane %v3446_v36, %v4061_v10  ;;  %v3445_v45 = vld [vmem:[%s5438_s11 + $0x25] ss:$8 sm:$0x3] }
  0xc6   : > { %v547_v48 = vmul.f32 %v543_v41, %v529_v46  ;;  %v546_v49 = vmul.f32 %v539_v42, %v532_v47  ;;  %v977_v52 = vrot.slane %v3445_v45, %v4058_v9 }
  0xc8   : > { %v500_v53 = vpop.permute.xlu1 %499  ;;  %1171 = vmatprep.subr.mxu0 %v547_v48  ;;  %v497_v54 = vpop.permute.xlu0 %496 }
  0xc9   : > { %v502_v55 = vsel %vm501_vm12, %v500_v53, %v497_v54  ;;  %v505_v56 = vsel %vm501_vm12, %v497_v54, %v500_v53  ;;  %1172 = vmatpush1.msra.mxu0 %v546_v49  ;;  %v973_v53 = vrot.slane %v3445_v45, %v4061_v10  ;;  %v3444_v54 = vld [vmem:[%s5438_s11 + $0x24] ss:$8 sm:$0x3]  ;;  %v1068_v45 = vld [vmem:[%s5568_s1 + $0x18] sm:$0xff] }
  0xca   : > { %v520_v57 = vmul.f32 %v516_v50, %v502_v55  ;;  %v519_v58 = vmul.f32 %v512_v51, %v505_v56  ;;  %v950_v61 = vrot.slane %v3444_v54, %v4058_v9 }
  0xcc   : > { %v473_v62 = vpop.permute.xlu1 %472  ;;  %1173 = vmatprep.subr.mxu0 %v520_v57  ;;  %v470_v63 = vpop.permute.xlu0 %469 }
  0xcd   : > { %v475_v0 = vsel %vm474_vm13, %v473_v62, %v470_v63  ;;  %v478_v1 = vsel %vm474_vm13, %v470_v63, %v473_v62  ;;  %1174 = vmatpush1.msra.mxu0 %v519_v58  ;;  %v946_v62 = vrot.slane %v3444_v54, %v4061_v10  ;;  %v3443_v63 = vld [vmem:[%s5438_s11 + $0x23] ss:$8 sm:$0x3] }
  0xce   : > { %v493_v2 = vmul.f32 %v489_v59, %v475_v0  ;;  %v492_v3 = vmul.f32 %v485_v60, %v478_v1  ;;  %v923_v6 = vrot.slane %v3443_v63, %v4058_v9 }
  0xd0   : > { %v446_v7 = vpop.permute.xlu1 %445  ;;  %1175 = vmatprep.subr.mxu0 %v493_v2  ;;  %v443_v11 = vpop.permute.xlu0 %442 }
  0xd1   : > { %v448_v12 = vsel %vm447_vm14, %v446_v7, %v443_v11  ;;  %v451_v13 = vsel %vm447_vm14, %v443_v11, %v446_v7  ;;  %1176 = vmatpush1.msra.mxu0 %v492_v3  ;;  %v919_v7 = vrot.slane %v3443_v63, %v4061_v10  ;;  %v3442_v11 = vld [vmem:[%s5438_s11 + $0x22] ss:$8 sm:$0x3] }
  0xd2   : > { %v466_v14 = vmul.f32 %v462_v4, %v448_v12  ;;  %v465_v15 = vmul.f32 %v458_v5, %v451_v13  ;;  %v896_v18 = vrot.slane %v3442_v11, %v4058_v9 }
  0xd4   : > { %v420_v19 = vpop.permute.xlu1 %419  ;;  %1177 = vmatprep.subr.mxu0 %v466_v14  ;;  %v416_v20 = vpop.permute.xlu0 %415 }
  0xd5   : > { %v422_v21 = vsel %vm421_vm15, %v420_v19, %v416_v20  ;;  %v425_v22 = vsel %vm421_vm15, %v416_v20, %v420_v19  ;;  %1178 = vmatpush1.msra.mxu0 %v465_v15  ;;  %v892_v19 = vrot.slane %v3442_v11, %v4061_v10  ;;  %v3441_v20 = vld [vmem:[%s5438_s11 + $0x21] ss:$8 sm:$0x3] }
  0xd6   : > { %v439_v23 = vmul.f32 %v435_v16, %v422_v21  ;;  %v438_v24 = vmul.f32 %v431_v17, %v425_v22  ;;  %v869_v27 = vrot.slane %v3441_v20, %v4058_v9 }
  0xd8   : > { %v1041_v28 = vpop.permute.xlu1 %1040  ;;  %1179 = vmatprep.subr.mxu0 %v439_v23  ;;  %v1039_v29 = vpop.permute.xlu0 %1038 }
  0xd9   : > { %v1043_v30 = vsel %vm1042_vm9, %v1039_v29, %v1041_v28  ;;  %v1047_v31 = vsel %vm1042_vm9, %v1041_v28, %v1039_v29  ;;  %1180 = vmatpush1.msra.mxu0 %v438_v24  ;;  %v865_v28 = vrot.slane %v3441_v20, %v4061_v10  ;;  %v3440_v29 = vld [vmem:[%s5438_s11 + $0x20] ss:$8 sm:$0x3] }
  0xda   : > { %v1062_v32 = vmul.f32 %v1058_v25, %v1047_v31  ;;  %v1061_v33 = vmul.f32 %v1054_v26, %v1043_v30  ;;  %v842_v36 = vrot.slane %v3440_v29, %v4058_v9 }
  0xdc   : > { %v1014_v37 = vpop.permute.xlu1 %1013  ;;  %1195 = vmatprep.subr.mxu0 %v1062_v32  ;;  %v1012_v38 = vpop.permute.xlu0 %1011 }
  0xdd   : > { %v1016_v39 = vsel %vm1015_vm8, %v1012_v38, %v1014_v37  ;;  %v1020_v40 = vsel %vm1015_vm8, %v1014_v37, %v1012_v38  ;;  %1196 = vmatpush2.msra.mxu0 %v1061_v33  ;;  %v838_v37 = vrot.slane %v3440_v29, %v4061_v10 }
  0xde   : > { %v1035_v41 = vmul.f32 %v1031_v34, %v1020_v40  ;;  %v1034_v42 = vmul.f32 %v1027_v35, %v1016_v39 }
  0xe0   : > { %v987_v46 = vpop.permute.xlu1 %986  ;;  %1197 = vmatprep.subr.mxu0 %v1035_v41  ;;  %v985_v47 = vpop.permute.xlu0 %984 }
  0xe1   : > { %v989_v48 = vsel %vm988_vm7, %v985_v47, %v987_v46  ;;  %v993_v49 = vsel %vm988_vm7, %v987_v46, %v985_v47  ;;  %1198 = vmatpush2.msra.mxu0 %v1034_v42  ;;  %v1067_v46 = vld [vmem:[%s5568_s1 + $0x10] sm:$0xff]  ;;  %v1070_v47 = vld [vmem:[%s5568_s1 + $0x28] sm:$0xff] }
  0xe2   : > { %v1008_v50 = vmul.f32 %v1004_v43, %v993_v49  ;;  %v1007_v51 = vmul.f32 %v1000_v44, %v989_v48  ;;  %v1065_v44 = vld [vmem:[%s5568_s1] sm:$0xff] }
  0xe3   : > { %v1069_v48 = vld [vmem:[%s5568_s1 + $0x20] sm:$0xff]  ;;  %s5514_s1 = smov 49  }
  0xe4   : > { %v960_v55 = vpop.permute.xlu1 %959  ;;  %1199 = vmatprep.subr.mxu0 %v1008_v50  ;;  %v958_v56 = vpop.permute.xlu0 %957 }
  0xe5   : > { %v962_v57 = vsel %vm5493_vm6, %v958_v56, %v960_v55  ;;  %v966_v58 = vsel %vm5493_vm6, %v960_v55, %v958_v56  ;;  %1200 = vmatpush2.msra.mxu0 %v1007_v51  ;;  %vm1533_vm6 = vcmask 1044480  }
  0xe6   : > { %v981_v59 = vmul.f32 %v977_v52, %v966_v58  ;;  %v980_v60 = vmul.f32 %v973_v53, %v962_v57 }
  0xe8   : > { %v933_v0 = vpop.permute.xlu1 %932  ;;  %1201 = vmatprep.subr.mxu0 %v981_v59  ;;  %v931_v1 = vpop.permute.xlu0 %930 }
  0xe9   : > { %v935_v2 = vsel %vm5484_vm5, %v931_v1, %v933_v0  ;;  %v939_v3 = vsel %vm5484_vm5, %v933_v0, %v931_v1  ;;  %1202 = vmatpush2.msra.mxu0 %v980_v60  ;;  %vm5486_vm5 = vcmask 908288  }
  0xea   : > { %v954_v4 = vmul.f32 %v950_v61, %v939_v3  ;;  %v953_v5 = vmul.f32 %v946_v62, %v935_v2 }
  0xec   : > { %v906_v12 = vpop.permute.xlu1 %905  ;;  %1203 = vmatprep.subr.mxu0 %v954_v4  ;;  %v904_v13 = vpop.permute.xlu0 %903 }
  0xed   : > { %v908_v14 = vsel %vm5485_vm4, %v904_v13, %v906_v12  ;;  %v912_v15 = vsel %vm5485_vm4, %v906_v12, %v904_v13  ;;  %1204 = vmatpush2.msra.mxu0 %v953_v5  ;;  %vm853_vm4 = vcmask 916480  }
  0xee   : > { %v927_v16 = vmul.f32 %v923_v6, %v912_v15  ;;  %v926_v17 = vmul.f32 %v919_v7, %v908_v14 }
  0xf0   : > { %v879_v21 = vpop.permute.xlu1 %878  ;;  %1205 = vmatprep.subr.mxu0 %v927_v16  ;;  %v877_v22 = vpop.permute.xlu0 %876 }
  0xf1   : > { %v881_v23 = vsel %vm5486_vm5, %v877_v22, %v879_v21  ;;  %v885_v24 = vsel %vm5486_vm5, %v879_v21, %v877_v22  ;;  %1206 = vmatpush2.msra.mxu0 %v926_v17  ;;  %vm826_vm5 = vcmask 924672  }
  0xf2   : > { %v900_v25 = vmul.f32 %v896_v18, %v885_v24  ;;  %v899_v26 = vmul.f32 %v892_v19, %v881_v23 }
  0xf4   : > { %v852_v30 = vpop.permute.xlu1 %851  ;;  %1207 = vmatprep.subr.mxu0 %v900_v25  ;;  %v850_v31 = vpop.permute.xlu0 %849 }
  0xf5   : > { %v854_v32 = vsel %vm853_vm4, %v850_v31, %v852_v30  ;;  %v858_v33 = vsel %vm853_vm4, %v852_v30, %v850_v31  ;;  %1208 = vmatpush2.msra.mxu0 %v899_v26  ;;  %v5532_v30 = vmov 0.0  }
  0xf6   : > { %v873_v34 = vmul.f32 %v869_v27, %v858_v33  ;;  %v872_v35 = vmul.f32 %v865_v28, %v854_v32  ;;  %3539 = vmatprep.subr.mxu1 %v5532_v30 }
  0xf8   : > { %v825_v38 = vpop.permute.xlu1 %824  ;;  %1209 = vmatprep.subr.mxu0 %v873_v34  ;;  %v823_v39 = vpop.permute.xlu0 %822 }
  0xf9   : > { %v827_v40 = vsel %vm826_vm5, %v823_v39, %v825_v38  ;;  %v831_v41 = vsel %vm826_vm5, %v825_v38, %v823_v39  ;;  %1210 = vmatpush2.msra.mxu0 %v872_v35  ;;  %v1282_v38 = vld [vmem:[%s5571_s3 + $0x8] sm:$0xff]  ;;  %v1283_v39 = vld [vmem:[%s5571_s3 + $0x10] sm:$0xff] }
  0xfa   : > { %v846_v42 = vmul.f32 %v842_v36, %v831_v41  ;;  %v845_v43 = vmul.f32 %v838_v37, %v827_v40  ;;  %v1281_v37 = vld [vmem:[%s5571_s3] sm:$0xff]  ;;  %s5591_s3 = smov 1  }
  0xfb   : > { %v1284_v40 = vld [vmem:[%s5572_s4] sm:$0xff] }
  0xfc   : > { %1211 = vmatprep.subr.mxu0 %v846_v42 }
  0xfd   : > { %1212 = vmatpush2.msra.mxu0 %v845_v43 }
  0xfe   : > { %1214 = vmatmul.mubr.f32.vlgmr.msra.gmra.mxu0 %v1065_v44  ;;  %v1285_v44 = vld [vmem:[%s5572_s4 + $0x8] sm:$0xff] }
  0xff   : > { %3450 = vmatprep.mubr.msk.f32.mxu0 %vm1139_vm0, %v1068_v45 }
 0x102   : > { %1220 = vmatmul.mubr.f32.gmra.mxu0 %v1067_v46 }
 0x103   : > { %3451 = vmatprep.mubr.msk.f32.mxu0 %vm1139_vm0, %v1070_v47  ;;  %vm3798_vm0 = vmmov 0  }
 0x104   : > { %3545 = vmatprep.mubr.msk.f32.mxu1 %vm3798_vm0, %v5532_v30 }
 0x105   : > { %v1132_v49 = vpop.permute.xlu1 %1131  ;;  %v1137_v58 = vpop.permute.xlu0 %1136 }
 0x106   : > { %1226 = vmatmul.mubr.f32.gmra.mxu0 %v1069_v48 }
 0x109   : > { %v1127_v52 = vpop.permute.xlu1 %1126 }
 0x1be   : > { %v1215_v50 = vpop.f32.mrf.mxu0 }
 0x1bf   : > { %v1216_v56 = vadd.f32 %v1215_v50, %v1127_v52 }
 0x1c0   : > { %v1217_v51 = vpop.f32.mrf.mxu0 }
 0x1c1   : > { %v1218_v53 = vadd.f32 %v1217_v51, %v1127_v52  ;;  %v3452_v1 = vmul.f32 -1.442695, %v1216_v56 }
 0x1c2   : > { %v1221_v54 = vpop.f32.mrf.mxu0 }
 0x1c3   : > { %v1222_v55 = vadd.f32 %v1221_v54, %v1132_v49  ;;  %v3453_v61 = vmul.f32 -1.442695, %v1218_v53 }
 0x1c4   : > { %v1223_v57 = vpop.f32.mrf.mxu0 }
 0x1c5   : > { %v3454_v59 = vmul.f32 -1.442695, %v1222_v55  ;;  %v1224_v60 = vadd.f32 %v1223_v57, %v1132_v49  ;;  %v1286_v49 = vld [vmem:[%s5572_s4 + $0x10] sm:$0xff]  ;;  %s5593_s4 = smov 2  }
 0x1c6   : > { %v1227_v62 = vpop.f32.mrf.mxu0 }
 0x1c7   : > { %3648 = vpow2.f32 %v3454_v59  ;;  %v3455_v63 = vmul.f32 -1.442695, %v1224_v60  ;;  %v1228_v0 = vadd.f32 %v1227_v62, %v1137_v58 }
 0x1c8   : > { %v1229_v2 = vpop.f32.mrf.mxu0 }
 0x1c9   : > { %3650 = vpow2.f32 %v3455_v63  ;;  %v3456_v3 = vmul.f32 -1.442695, %v1228_v0  ;;  %v1230_v4 = vadd.f32 %v1229_v2, %v1137_v58 }
 0x1ca   : > { %3652 = vpow2.f32 %v3453_v61 }
 0x1cb   : > { %3654 = vpow2.f32 %v3456_v3  ;;  %v3457_v5 = vmul.f32 -1.442695, %v1230_v4 }
 0x1cc   : > { %3656 = vpow2.f32 %v3452_v1 }
 0x1cd   : > { %3658 = vpow2.f32 %v3457_v5 }
 0x1d4   : > { %v3649_v6 = vpop.eup %3648 }
 0x1d5   : > { %v1252_v7 = vadd.f32 1.0, %v3649_v6 }
 0x1d6   : > { %v3651_v11 = vpop.eup %3650 }
 0x1d7   : > { %v3653_v12 = vpop.eup %3652  ;;  %v1253_v13 = vadd.f32 1.0, %v3651_v11  ;;  %3660 = vrcp.f32 %v1252_v7 }
 0x1d8   : > { %v3655_v14 = vpop.eup %3654  ;;  %v1251_v18 = vadd.f32 1.0, %v3653_v12  ;;  %v1416_v12 = vld [vmem:[%s5579_s7] sm:$0x7]  ;;  %s5522_s7 = smov 3  }
 0x1d9   : > { %v3657_v15 = vpop.eup %3656  ;;  %3662 = vrcp.f32 %v1253_v13  ;;  %v1254_v16 = vadd.f32 1.0, %v3655_v14 }
 0x1da   : > { %v3659_v17 = vpop.eup %3658  ;;  %v1250_v20 = vadd.f32 1.0, %v3657_v15 }
 0x1db   : > { %v1255_v19 = vadd.f32 1.0, %v3659_v17  ;;  %3664 = vrcp.f32 %v1254_v16 }
 0x1dd   : > { %3666 = vrcp.f32 %v1255_v19 }
 0x1de   : > { %3668 = vrcp.f32 %v1251_v18 }
 0x1df   : > { %3670 = vrcp.f32 %v1250_v20 }
 0x1e4   : > { %v4250_v21 = vpop.eup %3660 }
 0x1e6   : > { %v4252_v22 = vpop.eup %3662 }
 0x1e7   : > { %v1271_v23 = vadd.f32 %v4252_v22, %v4250_v21 }
 0x1e8   : > { %v4256_v24 = vpop.eup %3664 }
 0x1e9   : > { %1272 = vadd.xlane.f32.xlu1 %v1271_v23 }
 0x1ea   : > { %v4258_v25 = vpop.eup %3666 }
 0x1eb   : > { %v1274_v26 = vadd.f32 %v4258_v25, %v4256_v24  ;;  %v4262_v27 = vpop.eup %3668 }
 0x1ec   : > { %v4264_v28 = vpop.eup %3670 }
 0x1ed   : > { %1275 = vadd.xlane.f32.xlu0 %v1274_v26  ;;  %v1268_v29 = vadd.f32 %v4264_v28, %v4262_v27 }
 0x1f1   : > { %1269 = vadd.xlane.f32.xlu0 %v1268_v29 }
 0x272   : > { %v1273_v31 = vpop.xlane.xlu1 %1272 }
 0x273   : > { %v1279_v34 = vmul.f32 0.00390625, %v1273_v31 }
 0x276   : > { %v1276_v32 = vpop.xlane.xlu0 %1275 }
 0x277   : > { %v1280_v33 = vmul.f32 0.00390625, %v1276_v32 }
 0x279   : > { %3540 = vmatpush3.msra.mxu1 %v1280_v33 }
 0x27a   : > { %3541 = vmatprep.subr.mxu1 %v5532_v30  ;;  %v1270_v35 = vpop.xlane.xlu0 %1269 }
 0x27b   : > { %v1278_v36 = vmul.f32 0.00390625, %v1270_v35  ;;  %3542 = vmatpush3.msra.mxu1 %v1279_v34 }
 0x27c   : > { %3543 = vmatprep.subr.mxu1 %v5532_v30 }
 0x27d   : > { %3544 = vmatpush3.msra.mxu1 %v1278_v36 }
 0x27e   : > { %3546 = vmatmul.mubr.msk.f32.vlgmr.msra.gmra.mxu1 %vm5492_vm3, %v1281_v37 }
 0x27f   : > { %3548 = vmatprep.mubr.msk.f32.mxu1 %vm3798_vm0, %v5532_v30 }
 0x282   : > { %3549 = vmatmul.mubr.msk.f32.gmra.mxu1 %vm5492_vm3, %v1282_v38 }
 0x283   : > { %3551 = vmatprep.mubr.msk.f32.mxu1 %vm3798_vm0, %v5532_v30  ;;  %vm5544_vm0 = vcmask 1042432  }
 0x286   : > { %3552 = vmatmul.mubr.msk.f32.gmra.mxu1 %vm5492_vm3, %v1283_v39 }
 0x287   : > { %1484 = vmatprep.mubr.f32.mxu1 %v5532_v30 }
 0x33e   : > { %v1363_v41 = vpop.f32.mrf.mxu1 }
 0x33f   : > { %v1364_v42 = vadd.f32 %v1363_v41, %v1284_v40 }
 0x340   : > { %v3547_v43 = vpop.f32.mrf.mxu1 }
 0x341   : > { %v3461_v45 = vmul.f32 -1.442695, %v1364_v42 }
 0x342   : > { %v1368_v46 = vpop.f32.mrf.mxu1 }
 0x343   : > { %v1369_v47 = vadd.f32 %v1368_v46, %v1285_v44  ;;  %3672 = vpow2.f32 %v3461_v45 }
 0x344   : > { %v3550_v48 = vpop.f32.mrf.mxu1 }
 0x345   : > { %v3462_v50 = vmul.f32 -1.442695, %v1369_v47 }
 0x346   : > { %v1373_v51 = vpop.f32.mrf.mxu1 }
 0x347   : > { %3674 = vpow2.f32 %v3462_v50  ;;  %v1374_v52 = vadd.f32 %v1373_v51, %v1286_v49 }
 0x348   : > { %v3553_v53 = vpop.f32.mrf.mxu1 }
 0x349   : > { %v3463_v54 = vmul.f32 -1.442695, %v1374_v52 }
 0x34b   : > { %3676 = vpow2.f32 %v3463_v54 }
 0x350   : > { %v3673_v55 = vpop.eup %3672 }
 0x351   : > { %v1386_v58 = vadd.f32 1.0, %v3673_v55 }
 0x354   : > { %v3675_v56 = vpop.eup %3674 }
 0x355   : > { %v1387_v57 = vadd.f32 1.0, %v3675_v56 }
 0x357   : > { %3678 = vrcp.f32 %v1387_v57 }
 0x358   : > { %v3677_v59 = vpop.eup %3676  ;;  %3680 = vrcp.f32 %v1386_v58 }
 0x359   : > { %v1388_v60 = vadd.f32 1.0, %v3677_v59 }
 0x35b   : > { %3682 = vrcp.f32 %v1388_v60 }
 0x364   : > { %v3679_v61 = vpop.eup %3678 }
 0x365   : > { %1402 = vperm.xlu1 %3645, %v3679_v61   ;;  %v3681_v62 = vpop.eup %3680 }
 0x368   : > { %v3683_v63 = vpop.eup %3682 }
 0x369   : > { %1397 = vperm.xlu1 %3645, %v3681_v62   ;;  %1407 = vperm.xlu0 %3644, %v3683_v63  }
 0x3e0   : > { %v1403_v0 = vpop.permute.xlu1 %1402 }
 0x3e1   : > { %v4306_v5 = vmul.f32 %v4252_v22, %v1403_v0  ;;  %v4310_v6 = vmul.f32 %v4250_v21, %v1403_v0 }
 0x3e3   : > { %5575 = vst [vmem:[#allocation19_spill] sm:$0xff] %v4306_v5  ;;  %5576 = vst [vmem:[#allocation20_spill] sm:$0xff] %v4310_v6  ;;  %v1503_v14 = vrot.slane %v4310_v6, 4  ;;  %v1509_v17 = vrot.slane %v4306_v5, 4 }
 0x3e4   : > { %v1408_v1 = vpop.permute.xlu0 %1407  ;;  %v1398_v4 = vpop.permute.xlu1 %1397 }
 0x3e5   : > { %v4300_v2 = vmul.f32 %v4256_v24, %v1408_v1  ;;  %v4303_v3 = vmul.f32 %v4258_v25, %v1408_v1  ;;  %v4314_v7 = vmul.f32 %v4262_v27, %v1398_v4  ;;  %v4318_v11 = vmul.f32 %v4264_v28, %v1398_v4 }
 0x3e6   : > { %v1504_v20 = vmax.f32 %v4310_v6, %v1503_v14  ;;  %v1510_v23 = vmax.f32 %v4306_v5, %v1509_v17 }
 0x3e7   : > { %5573 = vst [vmem:[#allocation17_spill] sm:$0xff] %v4300_v2  ;;  %5574 = vst [vmem:[#allocation18_spill] sm:$0xff] %v4303_v3  ;;  %1446 = vmatprep.subr.mxu1 %v4303_v3  ;;  %v1491_v13 = vrot.slane %v4318_v11, 4  ;;  %v1497_v15 = vrot.slane %v4314_v7, 4  ;;  %v1515_v16 = vrot.slane %v4300_v2, 4  ;;  %v1521_v19 = vrot.slane %v4303_v3, 4 }
 0x3e8   : > { %1447 = vmatpush1.msra.mxu1 %v4300_v2  ;;  %5577 = vst [vmem:[#allocation21_spill] sm:$0xff] %v4314_v7  ;;  %5578 = vst [vmem:[#allocation22_spill] sm:$0xff] %v4318_v11  ;;  %v1505_v26 = vrot.slane %v1504_v20, 2  ;;  %v1511_v29 = vrot.slane %v1510_v23, 2 }
 0x3e9   : > { %1448 = vmatprep.subr.mxu1 %v4306_v5  ;;  %v1492_v18 = vmax.f32 %v4318_v11, %v1491_v13  ;;  %v1498_v21 = vmax.f32 %v4314_v7, %v1497_v15  ;;  %v1516_v22 = vmax.f32 %v4300_v2, %v1515_v16  ;;  %v1522_v24 = vmax.f32 %v4303_v3, %v1521_v19 }
 0x3ea   : > { %1449 = vmatpush1.msra.mxu1 %v4310_v6  ;;  %v1506_v33 = vmax.f32 %v1504_v20, %v1505_v26  ;;  %v1512_v36 = vmax.f32 %v1510_v23, %v1511_v29 }
 0x3eb   : > { %1450 = vmatprep.subr.mxu1 %v4314_v7  ;;  %v1493_v25 = vrot.slane %v1492_v18, 2  ;;  %v1517_v27 = vrot.slane %v1516_v22, 2  ;;  %v1499_v28 = vrot.slane %v1498_v21, 2  ;;  %v1523_v31 = vrot.slane %v1522_v24, 2 }
 0x3ec   : > { %1451 = vmatpush1.msra.mxu1 %v4318_v11  ;;  %v1507_v39 = vrot.slane %v1506_v33, 1  ;;  %v1513_v42 = vrot.slane %v1512_v36, 1 }
 0x3ed   : > { %3464 = vmatmul.mubr.msk.f32.vlgmr.msra.gmra.mxu1 %vm5492_vm3, %v1416_v12  ;;  %v1494_v32 = vmax.f32 %v1492_v18, %v1493_v25  ;;  %v1518_v34 = vmax.f32 %v1516_v22, %v1517_v27  ;;  %v1500_v35 = vmax.f32 %v1498_v21, %v1499_v28  ;;  %v1524_v37 = vmax.f32 %v1522_v24, %v1523_v31 }
 0x3ee   : > { %vm1530_vm3 = vcmask 1043456   ;;  %v1508_v46 = vmax.f32 %v1506_v33, %v1507_v39  ;;  %v1514_v52 = vmax.f32 %v1512_v36, %v1513_v42  ;;  %v2816_v42 = vld [vmem:[%s5435_s8 + $0x8] sm:$0x77] }
 0x3ef   : > { %v1495_v38 = vrot.slane %v1494_v32, 1  ;;  %v1519_v40 = vrot.slane %v1518_v34, 1  ;;  %v1501_v41 = vrot.slane %v1500_v35, 1  ;;  %v1525_v44 = vrot.slane %v1524_v37, 1 }
 0x3f1   : > { %v1496_v43 = vmax.f32 %v1494_v32, %v1495_v38  ;;  %v1520_v47 = vmax.f32 %v1518_v34, %v1519_v40  ;;  %v1502_v49 = vmax.f32 %v1500_v35, %v1501_v41  ;;  %v1526_v54 = vmax.f32 %v1524_v37, %v1525_v44  ;;  %v2815_v38 = vld [vmem:[%s5435_s8] sm:$0x77] }
 0x3f2   : > { %v2917_v39 = vcombine.high %v2815_v38, %v2815_v38 }
 0x3f4   : > { %2987 = vmatprep.mubr.f32.mxu1 %v2917_v39 }
 0x4ad   : > { %v1486_v45 = vpop.f32.mrf.mxu1 }
 0x4ae   : > { %v1528_v48 = vsel %vm5544_vm0, %v1486_v45, %v1496_v43  ;;  %v2918_v43 = vcombine.high %v2816_v42, %v2816_v42  ;;  %v3479_v42 = vld [vmem:[%s5438_s11 + $0x47] ss:$8 sm:$0x3] }
 0x4af   : > { %v1531_v50 = vsel %vm1530_vm3, %v1528_v48, %v1508_v46  ;;  %v1488_v51 = vpop.f32.mrf.mxu1  ;;  %v1930_v3 = vrot.slane %v3479_v42, %v4061_v10 }
 0x4b0   : > { %v4341_v53 = vsel %vm1533_vm6, %v1531_v50, %v1520_v47  ;;  %v1529_v55 = vsel %vm5544_vm0, %v1488_v51, %v1502_v49  ;;  %vm1892_vm0 = vcmask 236544  }
 0x4b1   : > { %v4346_v56 = vsel %vm1536_vm1, %v4341_v53, 0.0  ;;  %v1532_v57 = vsel %vm1530_vm3, %v1529_v55, %v1514_v52  ;;  %vm2920_vm3 = vcmask 64512   ;;  %v3480_v55 = vld [vmem:[%s5438_s11 + $0x50] ss:$8 sm:$0x3] }
 0x4b2   : > { %v4349_v58 = vsel %vm1533_vm6, %v1532_v57, %v1526_v54  ;;  %2761 = vrot.lane.b32.xlu0 %v4346_v56, %s5501_s5  ;;  %1944 = vrot.lane.b32.xlu1 %v4346_v56, %s5502_s16  ;;  %s5506_s5 = smov 35   ;;  %s5507_s16 = smov 125   ;;  %v1956_v38 = vrot.slane %v3480_v55, %v4061_v10  ;;  %v1960_v39 = vrot.slane %v3480_v55, %v4058_v9  ;;  %vm2765_vm6 = vcmask 637952   ;;  %v3478_v55 = vld [vmem:[%s5438_s11 + $0x46] ss:$8 sm:$0x3] }
 0x4b3   : > { %v4445_v59 = vsel %vm1536_vm1, %v4349_v58, 0.0  ;;  %3513 = vmatprep.mubr.msk.f32.mxu0 %vm2920_vm3, %v2918_v43  ;;  %vm1919_vm3 = vcmask 154624  }
 0x4b6   : > { %2337 = vrot.lane.b32.xlu0 %v4346_v56, %s5498_s26  ;;  %1917 = vrot.lane.b32.xlu1 %v4346_v56, %s5500_s27  ;;  %s5504_s26 = smov 115   ;;  %s5505_s27 = smov 82  }
 0x4ba   : > { %2734 = vrot.lane.b32.xlu0 %v4346_v56, %s5495_s14  ;;  %1890 = vrot.lane.b32.xlu1 %v4346_v56, %s5496_s17  ;;  %s5583_s14 = smov 32   ;;  %s5503_s17 = smov 81  }
 0x4be   : > { %2311 = vrot.lane.b32.xlu0 %v4346_v56, %s5497_s24  ;;  %1864 = vrot.lane.b32.xlu1 %v4346_v56, %s5580_s18  ;;  %s5584_s24 = smov 33  }
 0x4c2   : > { %2707 = vrot.lane.b32.xlu0 %v4346_v56, %s5499_s13  ;;  %1838 = vrot.lane.b32.xlu1 %v4346_v56, %s5581_s19  ;;  %s5585_s13 = smov 34  }
 0x4c6   : > { %2285 = vrot.lane.b32.xlu0 %v4346_v56, %s5582_s15  ;;  %1812 = vrot.lane.b32.xlu1 %v4346_v56, %s5583_s14 }
 0x4ca   : > { %2680 = vrot.lane.b32.xlu0 %v4346_v56, %s5503_s17  ;;  %1786 = vrot.lane.b32.xlu1 %v4346_v56, %s5584_s24  ;;  %s5508_s17 = smov 45  }
 0x4ce   : > { %2258 = vrot.lane.b32.xlu0 %v4346_v56, %s5504_s26  ;;  %1760 = vrot.lane.b32.xlu1 %v4346_v56, %s5585_s13  ;;  %s5509_s26 = smov 83  }
 0x4d2   : > { %2653 = vrot.lane.b32.xlu0 %v4346_v56, %s5505_s27  ;;  %1733 = vrot.lane.b32.xlu1 %v4346_v56, %s5506_s5  ;;  %s5586_s27 = smov 126   ;;  %s5511_s5 = smov 47  }
 0x4d6   : > { %2231 = vrot.lane.b32.xlu0 %v4346_v56, %s5507_s16  ;;  %1706 = vrot.lane.b32.xlu1 %v4346_v56, %s5508_s17  ;;  %s5512_s16 = smov 93   ;;  %s5513_s17 = smov 48  }
 0x4da   : > { %2626 = vrot.lane.b32.xlu0 %v4346_v56, %s5509_s26  ;;  %1679 = vrot.lane.b32.xlu1 %v4346_v56, %s5510_s0  ;;  %s5587_s26 = smov 127   ;;  %s5588_s0 = smov 94  }
 0x4de   : > { %2205 = vrot.lane.b32.xlu0 %v4346_v56, %s5586_s27  ;;  %1652 = vrot.lane.b32.xlu1 %v4346_v56, %s5511_s5  ;;  %s5589_s5 = smov 95  }
 0x4e2   : > { %2599 = vrot.lane.b32.xlu0 %v4346_v56, %s5512_s16  ;;  %1625 = vrot.lane.b32.xlu1 %v4346_v56, %s5513_s17  ;;  %s5516_s16 = smov 51   ;;  %s5590_s17 = smov 96  }
 0x4e6   : > { %2179 = vrot.lane.b32.xlu0 %v4346_v56, %s5587_s26  ;;  %1598 = vrot.lane.b32.xlu1 %v4346_v56, %s5514_s1  ;;  %s5592_s1 = smov 97  }
 0x4ea   : > { %2573 = vrot.lane.b32.xlu0 %v4346_v56, %s5588_s0  ;;  %1571 = vrot.lane.b32.xlu1 %v4346_v56, %s5515_s2  ;;  %s5594_s2 = smov 98  }
 0x4ee   : > { %2547 = vrot.lane.b32.xlu0 %v4346_v56, %s5589_s5  ;;  %1544 = vrot.lane.b32.xlu1 %v4346_v56, %s5516_s16  ;;  %s5523_s16 = smov 99  }
 0x4f2   : > { %2521 = vrot.lane.b32.xlu0 %v4346_v56, %s5590_s17  ;;  %2154 = vrot.lane.b32.xlu1 %v4346_v56, %s5591_s3 }
 0x4f6   : > { %2495 = vrot.lane.b32.xlu0 %v4346_v56, %s5592_s1  ;;  %2128 = vrot.lane.b32.xlu1 %v4346_v56, %s5593_s4 }
 0x4fa   : > { %2469 = vrot.lane.b32.xlu0 %v4346_v56, %s5594_s2  ;;  %2101 = vrot.lane.b32.xlu1 %v4346_v56, %s5522_s7  ;;  %s5598_s7 = smov 111  }
 0x4fe   : > { %2442 = vrot.lane.b32.xlu0 %v4346_v56, %s5523_s16  ;;  %2074 = vrot.lane.b32.xlu1 %v4346_v56, %s5525_s28  ;;  %s5599_s16 = smov 16   ;;  %s5601_s28 = smov 18  }
 0x502   : > { %2415 = vrot.lane.b32.xlu0 %v4346_v56, %s5524_s21  ;;  %2048 = vrot.lane.b32.xlu1 %v4346_v56, %s5595_s25  ;;  %s5600_s21 = smov 17  }
 0x506   : > { %2389 = vrot.lane.b32.xlu0 %v4346_v56, %s5596_s30  ;;  %2022 = vrot.lane.b32.xlu1 %v4346_v56, %s5597_s6 }
 0x50a   : > { %2363 = vrot.lane.b32.xlu0 %v4346_v56, %s5598_s7  ;;  %1996 = vrot.lane.b32.xlu1 %v4346_v56, %s5599_s16 }
 0x50e   : > { %1970 = vrot.lane.b32.xlu1 %v4346_v56, %s5600_s21  ;;  %1941 = vrot.lane.b32.xlu0 %v4445_v59, %s5601_s28  ;;  %s5613_s28 = smov 45  }
 0x512   : > { %2763 = vrot.lane.b32.xlu1 %v4445_v59, %s5602_s22  ;;  %1914 = vrot.lane.b32.xlu0 %v4445_v59, %s5603_s12  ;;  %s5608_s22 = smov 80   ;;  %s5610_s12 = smov 115  }
 0x516   : > { %2339 = vrot.lane.b32.xlu1 %v4445_v59, %s5604_s29  ;;  %1887 = vrot.lane.b32.xlu0 %v4445_v59, %s5605_s23  ;;  %s5612_s23 = smov 82   ;;  %s5614_s29 = smov 125  }
 0x51a   : > { %2736 = vrot.lane.b32.xlu1 %v4445_v59, %s5606_s20  ;;  %1861 = vrot.lane.b32.xlu0 %v4445_v59, %s5580_s18  ;;  %s5611_s20 = smov 35   ;;  %s5617_s18 = smov 47  }
 0x51e   : > { %2313 = vrot.lane.b32.xlu1 %v4445_v59, %s5607_s10  ;;  %1835 = vrot.lane.b32.xlu0 %v4445_v59, %s5581_s19  ;;  %s5609_s10 = smov 81   ;;  %s5619_s19 = smov 93  }
 0x522   : > { %2709 = vrot.lane.b32.xlu1 %v4445_v59, %s5608_s22  ;;  %1809 = vrot.lane.b32.xlu0 %v4445_v59, %s5583_s14  ;;  %s5616_s14 = smov 83   ;;  %s5622_s22 = smov 51  }
 0x524   : > { %v4471_v60 = vpop.permute.xlu0 %2761  ;;  %v4473_v61 = vpop.permute.xlu1 %1944 }
 0x526   : > { %2287 = vrot.lane.b32.xlu1 %v4445_v59, %s5582_s15  ;;  %1783 = vrot.lane.b32.xlu0 %v4445_v59, %s5584_s24  ;;  %s5615_s24 = smov 46   ;;  %s5620_s15 = smov 49  }
 0x528   : > { %v4479_v62 = vpop.permute.xlu0 %2337  ;;  %v4481_v63 = vpop.permute.xlu1 %1917 }
 0x52a   : > { %2682 = vrot.lane.b32.xlu1 %v4445_v59, %s5609_s10  ;;  %1757 = vrot.lane.b32.xlu0 %v4445_v59, %s5585_s13  ;;  %s5618_s13 = smov 48  }
 0x52c   : > { %v4487_v0 = vpop.permute.xlu0 %2734  ;;  %v4489_v1 = vpop.permute.xlu1 %1890 }
 0x52e   : > { %2260 = vrot.lane.b32.xlu1 %v4445_v59, %s5610_s12  ;;  %1730 = vrot.lane.b32.xlu0 %v4445_v59, %s5611_s20  ;;  %s5703_s20 = sld [smem:[#allocation36_spill]] }
 0x530   : > { %v4495_v4 = vpop.permute.xlu0 %2311  ;;  %v4497_v12 = vpop.permute.xlu1 %1864 }
 0x532   : > { %2655 = vrot.lane.b32.xlu1 %v4445_v59, %s5612_s23  ;;  %1703 = vrot.lane.b32.xlu0 %v4445_v59, %s5613_s28 }
 0x534   : > { %v4503_v13 = vpop.permute.xlu0 %2707  ;;  %v4505_v14 = vpop.permute.xlu1 %1838  ;;  %s5704_s23 = smov %s5703_s20 }
 0x536   : > { %2233 = vrot.lane.b32.xlu1 %v4445_v59, %s5614_s29  ;;  %1676 = vrot.lane.b32.xlu0 %v4445_v59, %s5615_s24 }
 0x538   : > { %v4511_v15 = vpop.permute.xlu0 %2285  ;;  %v4513_v16 = vpop.permute.xlu1 %1812 }
 0x53a   : > { %2628 = vrot.lane.b32.xlu1 %v4445_v59, %s5616_s14  ;;  %1649 = vrot.lane.b32.xlu0 %v4445_v59, %s5617_s18  ;;  %s3823_s14 = smov [#allocation4]  }
 0x53b   : > { %s3714_s18 = sshll.u32 %s3823_s14, 4  ;;  %s3715_s18 = int_to_ptr.vmem [resolvable:$false] %s3714_s18 }
 0x53c   : > { %v4519_v17 = vpop.permute.xlu0 %2680  ;;  %v4521_v18 = vpop.permute.xlu1 %1786 }
 0x53e   : > { %2207 = vrot.lane.b32.xlu1 %v4445_v59, %s5586_s27  ;;  %1622 = vrot.lane.b32.xlu0 %v4445_v59, %s5618_s13  ;;  %s5621_s27 = smov 50   ;;  %s3716_s13 = scalar_lea.vmem %s3715_s18, 512 }
 0x540   : > { %v4527_v19 = vpop.permute.xlu0 %2258  ;;  %v4529_v20 = vpop.permute.xlu1 %1760 }
 0x542   : > { %2601 = vrot.lane.b32.xlu1 %v4445_v59, %s5619_s19  ;;  %1595 = vrot.lane.b32.xlu0 %v4445_v59, %s5620_s15 }
 0x544   : > { %v4535_v21 = vpop.permute.xlu0 %2653  ;;  %v4537_v22 = vpop.permute.xlu1 %1733 }
 0x546   : > { %2181 = vrot.lane.b32.xlu1 %v4445_v59, %s5587_s26  ;;  %1568 = vrot.lane.b32.xlu0 %v4445_v59, %s5621_s27  ;;  %s5693_s26 = sld [smem:[#allocation35_spill]] }
 0x548   : > { %v4543_v23 = vpop.permute.xlu0 %2231  ;;  %v4545_v24 = vpop.permute.xlu1 %1706 }
 0x54a   : > { %2575 = vrot.lane.b32.xlu1 %v4445_v59, %s5588_s0  ;;  %1540 = vrot.lane.b32.xlu0 %v4445_v59, %s5622_s22  ;;  %s5623_s0 = smov 3  }
 0x54c   : > { %v4551_v25 = vpop.permute.xlu0 %2626  ;;  %v4553_v26 = vpop.permute.xlu1 %1679 }
 0x54e   : > { %2549 = vrot.lane.b32.xlu1 %v4445_v59, %s5589_s5  ;;  %2151 = vrot.lane.b32.xlu0 %v4445_v59, %s5591_s3  ;;  %s5624_s3 = smov 13   ;;  %s5701_s5 = sld [smem:[#allocation11_spill]] }
 0x550   : > { %v4559_v27 = vpop.permute.xlu0 %2205  ;;  %v4561_v28 = vpop.permute.xlu1 %1652 }
 0x552   : > { %2523 = vrot.lane.b32.xlu1 %v4445_v59, %s5590_s17  ;;  %2125 = vrot.lane.b32.xlu0 %v4445_v59, %s5593_s4  ;;  %s5625_s4 = smov 99  }
 0x554   : > { %v4567_v29 = vpop.permute.xlu0 %2599  ;;  %v4569_v31 = vpop.permute.xlu1 %1625 }
 0x556   : > { %2497 = vrot.lane.b32.xlu1 %v4445_v59, %s5592_s1  ;;  %2098 = vrot.lane.b32.xlu0 %v4445_v59, %s5623_s0  ;;  %s5626_s1 = smov 109  }
 0x558   : > { %v4575_v32 = vpop.permute.xlu0 %2179  ;;  %v4577_v33 = vpop.permute.xlu1 %1598 }
 0x55a   : > { %2471 = vrot.lane.b32.xlu1 %v4445_v59, %s5594_s2  ;;  %2071 = vrot.lane.b32.xlu0 %v4445_v59, %s5624_s3 }
 0x55c   : > { %v4583_v34 = vpop.permute.xlu0 %2573  ;;  %v4585_v35 = vpop.permute.xlu1 %1571 }
 0x55e   : > { %2444 = vrot.lane.b32.xlu1 %v4445_v59, %s5625_s4  ;;  %2045 = vrot.lane.b32.xlu0 %v4445_v59, %s5595_s25  ;;  %s5700_s25 = sld [smem:[#allocation8_spill]] }
 0x560   : > { %v4591_v36 = vpop.permute.xlu0 %2547  ;;  %v4593_v37 = vpop.permute.xlu1 %1544 }
 0x562   : > { %2417 = vrot.lane.b32.xlu1 %v4445_v59, %s5626_s1  ;;  %2019 = vrot.lane.b32.xlu0 %v4445_v59, %s5597_s6  ;;  %s3822_s6 = smov 77  }
 0x564   : > { %v4602_v40 = vpop.permute.xlu0 %2521  ;;  %v4604_v41 = vpop.permute.xlu1 %2154 }
 0x566   : > { %2391 = vrot.lane.b32.xlu1 %v4445_v59, %s5596_s30  ;;  %1993 = vrot.lane.b32.xlu0 %v4445_v59, %s5599_s16  ;;  %s3530_s30 = sshll.u32 %s5701_s5, 8 }
 0x567   : > { %s5392_s28 = scalar_lea.hbm %s5703_s20, %s3530_s30 }
 0x568   : > { %v4613_v44 = vpop.permute.xlu0 %2495  ;;  %v4615_v45 = vpop.permute.xlu1 %2128 }
 0x56a   : > { %2365 = vrot.lane.b32.xlu1 %v4445_v59, %s5598_s7  ;;  %1967 = vrot.lane.b32.xlu0 %v4445_v59, %s5600_s21  ;;  %s404_s7 = sand.u32 1, %s5700_s25  }
 0x56b   : > { %s3423_s21 = sshll.u32 %s404_s7, 4  ;;  %s3346_s29 = scalar_lea.sflag [#allocation5], %s404_s7 }
 0x56c   : > { %v4621_v46 = vpop.permute.xlu0 %2469  ;;  %v4623_v47 = vpop.permute.xlu1 %2101  ;;  %s406_s16 = scalar_lea.vmem [#allocation4], %s3423_s21 }
 0x56d   : > { %s3360_s17 = sshll.u32 %s406_s16, 4  ;;  %s3361_s17 = int_to_ptr.vmem [resolvable:$true] %s3360_s17 }
 0x56e   : > { %2790 = vrot.lane.b32.xlu1 %v4445_v59, %s3822_s6  ;;  %2788 = vrot.lane.b32.xlu0 %v4346_v56, %s3822_s6  ;;  %v3511_v56 = vld [vmem:[%s5438_s11 + $0x90] ss:$8 sm:$0x3]  ;;  %s3710_s24 = scalar_lea.vmem %s3361_s17, 256  ;;  %p3717_p0 = scmp.lt.s32.totalorder %s3361_s17, %s3715_s18 }
 0x56f   : > { %v2777_v8 = vrot.slane %v3511_v56, %v4061_v10  ;;  %v2781_v6 = vrot.slane %v3511_v56, %v4058_v9  ;;  %p3711_p11 = scmp.ne.s32.totalorder %s3361_s17, %s3710_s24  ;;  %p3718_p1 = scmp.lt.s32.totalorder %s3716_s13, %s3710_s24 }
 0x570   : > { %v4627_v48 = vpop.permute.xlu0 %2442  ;;  %v4629_v49 = vpop.permute.xlu1 %2074 }
 0x571   : > { %p3712_p12 = pnand %p3711_p11, %p3927_p5  ;;  %p3719_p2 = por %p3718_p1, %p3717_p0 }
 0x573   : > { %p3713_p13 = pneg %p3712_p12 }
 0x574   : > { %v4631_v50 = vpop.permute.xlu0 %2415  ;;  %v4633_v51 = vpop.permute.xlu1 %2048 }
 0x575   : > { %5627 = vst [vmem:[#allocation23_spill] sm:$0xff] %v4631_v50  ;;  %p3720_p3 = pnand %p3719_p2, %p3713_p13 }
 0x578   : > { %v4635_v52 = vpop.permute.xlu0 %2389  ;;  %v4637_v54 = vpop.permute.xlu1 %2022 }
 0x579   : > { %5628 = vst [vmem:[#allocation24_spill] sm:$0xff] %v4635_v52  ;;  %5629 = vst [vmem:[#allocation25_spill] sm:$0xff] %v4637_v54  ;;  %v1903_v52 = vrot.slane %v3478_v55, %v4061_v10  ;;  %v3510_v54 = vld [vmem:[%s5438_s11 + $0x87] ss:$8 sm:$0x3] }
 0x57c   : > { %v4642_v57 = vpop.permute.xlu0 %2363  ;;  %v4644_v59 = vpop.permute.xlu1 %1996 }
 0x57d   : > { %5630 = vst [vmem:[#allocation26_spill] sm:$0xff] %v4642_v57  ;;  %5631 = vst [vmem:[#allocation27_spill] sm:$0xff] %v4644_v59 }
 0x580   : > { %v4654_v43 = vpop.permute.xlu1 %1970  ;;  %v1942_v30 = vpop.permute.xlu0 %1941 }
 0x581   : > { %5632 = vst [vmem:[#allocation28_spill] sm:$0xff] %v4654_v43  ;;  %v1946_v11 = vsel %vm555_vm10, %v4473_v61, %v1942_v30  ;;  %v1949_v7 = vsel %vm555_vm10, %v1942_v30, %v4473_v61  ;;  %v1934_v43 = vrot.slane %v3479_v42, %v4058_v9  ;;  %v1907_v30 = vrot.slane %v3478_v55, %v4058_v9  ;;  %v3477_v55 = vld [vmem:[%s5438_s11 + $0x45] ss:$8 sm:$0x3] }
 0x582   : > { %v1963_v5 = vmul.f32 %v1956_v38, %v1949_v7  ;;  %v1964_v2 = vmul.f32 %v1960_v39, %v1946_v11  ;;  %vm2738_vm10 = vcmask 646144  }
 0x584   : > { %v2764_v57 = vpop.permute.xlu1 %2763  ;;  %2923 = vmatprep.subr.mxu1 %v1964_v2  ;;  %v1915_v59 = vpop.permute.xlu0 %1914 }
 0x585   : > { %v2766_v61 = vsel %vm2765_vm6, %v4471_v60, %v2764_v57  ;;  %v2770_v56 = vsel %vm2765_vm6, %v2764_v57, %v4471_v60  ;;  %v1920_v7 = vsel %vm1919_vm3, %v4481_v63, %v1915_v59  ;;  %v1923_v11 = vsel %vm1919_vm3, %v1915_v59, %v4481_v63  ;;  %2924 = vmatpush1.msra.mxu1 %v1963_v5  ;;  %v3476_v63 = vld [vmem:[%s5438_s11 + $0x44] ss:$8 sm:$0x3] }
 0x586   : > { %v2784_v38 = vmul.f32 %v2777_v8, %v2766_v61  ;;  %v2785_v39 = vmul.f32 %v2781_v6, %v2770_v56  ;;  %v1937_v2 = vmul.f32 %v1930_v3, %v1923_v11  ;;  %v1938_v42 = vmul.f32 %v1934_v43, %v1920_v7 }
 0x587   : > { %v2750_v5 = vrot.slane %v3510_v54, %v4061_v10  ;;  %v2754_v6 = vrot.slane %v3510_v54, %v4058_v9  ;;  %v1876_v43 = vrot.slane %v3477_v55, %v4061_v10  ;;  %v1880_v61 = vrot.slane %v3477_v55, %v4058_v9 }
 0x588   : > { %2994 = vmatprep.subr.mxu0 %v2785_v39  ;;  %v4681_v50 = vpop.permute.xlu1 %2339  ;;  %2925 = vmatprep.subr.mxu1 %v1938_v42  ;;  %v1888_v60 = vpop.permute.xlu0 %1887  ;;  %v1854_v11 = vrot.slane %v3476_v63, %v4058_v9  ;;  %vm2630_vm6 = vcmask 678912   ;;  %vm1654_vm3 = vcmask 384000  }
 0x589   : > { %v1893_v8 = vsel %vm1892_vm0, %v4489_v1, %v1888_v60  ;;  %v1896_v3 = vsel %vm1892_vm0, %v1888_v60, %v4489_v1  ;;  %2926 = vmatpush1.msra.mxu1 %v1937_v2  ;;  %2995 = vmatpush1.msra.mxu0 %v2784_v38  ;;  %v1850_v1 = vrot.slane %v3476_v63, %v4061_v10  ;;  %v3509_v60 = vld [vmem:[%s5438_s11 + $0x86] ss:$8 sm:$0x3]  ;;  %vm2711_vm0 = vcmask 654336  }
 0x58a   : > { %v1910_v57 = vmul.f32 %v1903_v52, %v1896_v3  ;;  %v1911_v59 = vmul.f32 %v1907_v30, %v1893_v8  ;;  %v3475_v8 = vld [vmem:[%s5438_s11 + $0x43] ss:$8 sm:$0x3]  ;;  %v2727_v63 = vrot.slane %v3509_v60, %v4058_v9 }
 0x58c   : > { %v2737_v56 = vpop.permute.xlu1 %2736  ;;  %2927 = vmatprep.subr.mxu1 %v1911_v59  ;;  %v1862_v7 = vpop.permute.xlu0 %1861 }
 0x58d   : > { %v2739_v54 = vsel %vm2738_vm10, %v4487_v0, %v2737_v56  ;;  %v2743_v39 = vsel %vm2738_vm10, %v2737_v56, %v4487_v0  ;;  %v1866_v52 = vsel %vm528_vm11, %v4497_v12, %v1862_v7  ;;  %v1869_v30 = vsel %vm528_vm11, %v1862_v7, %v4497_v12  ;;  %2928 = vmatpush1.msra.mxu1 %v1910_v57  ;;  %v3474_v57 = vld [vmem:[%s5438_s11 + $0x42] ss:$8 sm:$0x3] }
 0x58e   : > { %v2757_v38 = vmul.f32 %v2750_v5, %v2739_v54  ;;  %v2758_v2 = vmul.f32 %v2754_v6, %v2743_v39  ;;  %v1883_v42 = vmul.f32 %v1876_v43, %v1869_v30  ;;  %v1884_v55 = vmul.f32 %v1880_v61, %v1866_v52 }
 0x58f   : > { %v2723_v6 = vrot.slane %v3509_v60, %v4061_v10  ;;  %v1824_v61 = vrot.slane %v3475_v8, %v4061_v10  ;;  %v1828_v56 = vrot.slane %v3475_v8, %v4058_v9  ;;  %v1802_v39 = vrot.slane %v3474_v57, %v4058_v9  ;;  %v3508_v60 = vld [vmem:[%s5438_s11 + $0x85] ss:$8 sm:$0x3]  ;;  %v3473_v8 = vld [vmem:[%s5438_s11 + $0x41] ss:$8 sm:$0x3] }
 0x590   : > { %2996 = vmatprep.subr.mxu0 %v2758_v2  ;;  %v4710_v0 = vpop.permute.xlu1 %2313  ;;  %2929 = vmatprep.subr.mxu1 %v1884_v55  ;;  %v1836_v3 = vpop.permute.xlu0 %1835  ;;  %vm2684_vm11 = vcmask 662528   ;;  %vm1627_vm10 = vcmask 392192  }
 0x591   : > { %v1840_v12 = vsel %vm501_vm12, %v4505_v14, %v1836_v3  ;;  %v1843_v5 = vsel %vm501_vm12, %v1836_v3, %v4505_v14  ;;  %2930 = vmatpush1.msra.mxu1 %v1883_v42  ;;  %2997 = vmatpush1.msra.mxu0 %v2757_v38  ;;  %v1798_v14 = vrot.slane %v3474_v57, %v4061_v10  ;;  %vm1735_vm12 = vcmask 285696  }
 0x592   : > { %v1857_v59 = vmul.f32 %v1850_v1, %v1843_v5  ;;  %v1858_v43 = vmul.f32 %v1854_v11, %v1840_v12  ;;  %v2696_v5 = vrot.slane %v3508_v60, %v4061_v10 }
 0x594   : > { %v2710_v7 = vpop.permute.xlu1 %2709  ;;  %2931 = vmatprep.subr.mxu1 %v1858_v43  ;;  %v1810_v54 = vpop.permute.xlu0 %1809  ;;  %v1772_v43 = vrot.slane %v3473_v8, %v4061_v10 }
 0x595   : > { %v2712_v52 = vsel %vm2711_vm0, %v4503_v13, %v2710_v7  ;;  %v2716_v30 = vsel %vm2711_vm0, %v2710_v7, %v4503_v13  ;;  %v1814_v1 = vsel %vm474_vm13, %v4513_v16, %v1810_v54  ;;  %v1817_v11 = vsel %vm474_vm13, %v1810_v54, %v4513_v16  ;;  %2932 = vmatpush1.msra.mxu1 %v1857_v59 }
 0x596   : > { %v2730_v38 = vmul.f32 %v2723_v6, %v2712_v52  ;;  %v2731_v2 = vmul.f32 %v2727_v63, %v2716_v30  ;;  %v1831_v42 = vmul.f32 %v1824_v61, %v1817_v11  ;;  %v1832_v55 = vmul.f32 %v1828_v56, %v1814_v1  ;;  %v3472_v63 = vld [vmem:[%s5438_s11 + $0x40] ss:$8 sm:$0x3]  ;;  %v3507_v1 = vld [vmem:[%s5438_s11 + $0x84] ss:$8 sm:$0x3] }
 0x597   : > { %v2700_v6 = vrot.slane %v3508_v60, %v4058_v9  ;;  %v1776_v61 = vrot.slane %v3473_v8, %v4058_v9  ;;  %v1750_v54 = vrot.slane %v3472_v63, %v4058_v9  ;;  %vm2657_vm13 = vcmask 670720  }
 0x598   : > { %2998 = vmatprep.subr.mxu0 %v2731_v2  ;;  %v4739_v13 = vpop.permute.xlu1 %2287  ;;  %2933 = vmatprep.subr.mxu1 %v1832_v55  ;;  %v1784_v3 = vpop.permute.xlu0 %1783  ;;  %v3471_v55 = vld [vmem:[%s5438_s11 + $0x37] ss:$8 sm:$0x3]  ;;  %vm2603_vm0 = vcmask 760832  }
 0x599   : > { %v1788_v16 = vsel %vm447_vm14, %v4521_v18, %v1784_v3  ;;  %v1791_v12 = vsel %vm447_vm14, %v1784_v3, %v4521_v18  ;;  %2934 = vmatpush1.msra.mxu1 %v1831_v42  ;;  %2999 = vmatpush1.msra.mxu0 %v2730_v38  ;;  %v1746_v18 = vrot.slane %v3472_v63, %v4061_v10  ;;  %vm1708_vm14 = vcmask 367616  }
 0x59a   : > { %v1805_v57 = vmul.f32 %v1798_v14, %v1791_v12  ;;  %v1806_v59 = vmul.f32 %v1802_v39, %v1788_v16  ;;  %v2673_v16 = vrot.slane %v3507_v1, %v4058_v9  ;;  %v3470_v12 = vld [vmem:[%s5438_s11 + $0x36] ss:$8 sm:$0x3]  ;;  %v1719_v63 = vrot.slane %v3471_v55, %v4061_v10 }
 0x59c   : > { %v2683_v56 = vpop.permute.xlu1 %2682  ;;  %2935 = vmatprep.subr.mxu1 %v1806_v59  ;;  %v1758_v7 = vpop.permute.xlu0 %1757 }
 0x59d   : > { %v2685_v52 = vsel %vm2684_vm11, %v4519_v17, %v2683_v56  ;;  %v2689_v14 = vsel %vm2684_vm11, %v2683_v56, %v4519_v17  ;;  %v1762_v39 = vsel %vm421_vm15, %v4529_v20, %v1758_v7  ;;  %v1765_v30 = vsel %vm421_vm15, %v1758_v7, %v4529_v20  ;;  %2936 = vmatpush1.msra.mxu1 %v1805_v57 }
 0x59e   : > { %v2703_v11 = vmul.f32 %v2696_v5, %v2685_v52  ;;  %v2704_v38 = vmul.f32 %v2700_v6, %v2689_v14  ;;  %v1779_v2 = vmul.f32 %v1772_v43, %v1765_v30  ;;  %v1780_v42 = vmul.f32 %v1776_v61, %v1762_v39  ;;  %v3506_v52 = vld [vmem:[%s5438_s11 + $0x83] ss:$8 sm:$0x3] }
 0x59f   : > { %v2669_v20 = vrot.slane %v3507_v1, %v4061_v10  ;;  %v1723_v57 = vrot.slane %v3471_v55, %v4058_v9  ;;  %vm1681_vm15 = vcmask 375808   ;;  %v1696_v61 = vrot.slane %v3470_v12, %v4058_v9 }
 0x5a0   : > { %3000 = vmatprep.subr.mxu0 %v2704_v38  ;;  %v4768_v17 = vpop.permute.xlu1 %2260  ;;  %2937 = vmatprep.subr.mxu1 %v1780_v42  ;;  %v1731_v60 = vpop.permute.xlu0 %1730  ;;  %vm1600_vm11 = vcmask 400384  }
 0x5a1   : > { %v1736_v8 = vsel %vm1735_vm12, %v4537_v22, %v1731_v60  ;;  %v1739_v3 = vsel %vm1735_vm12, %v1731_v60, %v4537_v22  ;;  %2938 = vmatpush1.msra.mxu1 %v1779_v2  ;;  %3001 = vmatpush1.msra.mxu0 %v2703_v11  ;;  %v1692_v22 = vrot.slane %v3470_v12, %v4061_v10  ;;  %v3469_v11 = vld [vmem:[%s5438_s11 + $0x35] ss:$8 sm:$0x3]  ;;  %vm1573_vm12 = vcmask 408576  }
 0x5a2   : > { %v1753_v5 = vmul.f32 %v1746_v18, %v1739_v3  ;;  %v1754_v6 = vmul.f32 %v1750_v54, %v1736_v8  ;;  %v2642_v2 = vrot.slane %v3506_v52, %v4061_v10  ;;  %v2646_v60 = vrot.slane %v3506_v52, %v4058_v9 }
 0x5a3   : > { %v1669_v12 = vrot.slane %v3469_v11, %v4058_v9 }
 0x5a4   : > { %v2656_v59 = vpop.permute.xlu1 %2655  ;;  %2939 = vmatprep.subr.mxu1 %v1754_v6  ;;  %v1704_v43 = vpop.permute.xlu0 %1703  ;;  %v4825_v6 = vld [vmem:[%s5438_s11 + $0x66] ss:$8 sm:$0x3] }
 0x5a5   : > { %v2658_v56 = vsel %vm2657_vm13, %v4535_v21, %v2656_v59  ;;  %v2662_v7 = vsel %vm2657_vm13, %v2656_v59, %v4535_v21  ;;  %v1709_v18 = vsel %vm1708_vm14, %v4545_v24, %v1704_v43  ;;  %v1712_v54 = vsel %vm1708_vm14, %v1704_v43, %v4545_v24  ;;  %2940 = vmatpush1.msra.mxu1 %v1753_v5  ;;  %v4800_v21 = vld [vmem:[%s5438_s11 + $0x70] ss:$8 sm:$0x3]  ;;  %v4818_v5 = vld [vmem:[%s5438_s11 + $0x67] ss:$8 sm:$0x3] }
 0x5a6   : > { %v2676_v14 = vmul.f32 %v2669_v20, %v2658_v56  ;;  %v2677_v39 = vmul.f32 %v2673_v16, %v2662_v7  ;;  %v1726_v30 = vmul.f32 %v1719_v63, %v1712_v54  ;;  %v1727_v1 = vmul.f32 %v1723_v57, %v1709_v18  ;;  %v3468_v20 = vld [vmem:[%s5438_s11 + $0x34] ss:$8 sm:$0x3]  ;;  %v3505_v54 = vld [vmem:[%s5438_s11 + $0x82] ss:$8 sm:$0x3] }
 0x5a7   : > { %v1665_v16 = vrot.slane %v3469_v11, %v4061_v10  ;;  %v1638_v59 = vrot.slane %v3468_v20, %v4061_v10  ;;  %v1642_v43 = vrot.slane %v3468_v20, %v4058_v9  ;;  %vm1546_vm13 = vcmask 416768  }
 0x5a8   : > { %3002 = vmatprep.subr.mxu0 %v2677_v39  ;;  %v4802_v24 = vpop.permute.xlu1 %2233  ;;  %2941 = vmatprep.subr.mxu1 %v1727_v1  ;;  %v1677_v38 = vpop.permute.xlu0 %1676  ;;  %v2356_v1 = vrot.slane %v4800_v21, %v4058_v9  ;;  %vm2262_vm14 = vcmask 941056  }
 0x5a9   : > { %v1682_v42 = vsel %vm1681_vm15, %v4553_v26, %v1677_v38  ;;  %v1685_v55 = vsel %vm1681_vm15, %v1677_v38, %v4553_v26  ;;  %2942 = vmatpush1.msra.mxu1 %v1726_v30  ;;  %3003 = vmatpush1.msra.mxu0 %v2676_v14  ;;  %v2352_v26 = vrot.slane %v4800_v21, %v4061_v10  ;;  %v4856_v38 = vld [vmem:[%s5438_s11 + $0x64] ss:$8 sm:$0x3] }
 0x5aa   : > { %v1699_v8 = vmul.f32 %v1692_v22, %v1685_v55  ;;  %v1700_v3 = vmul.f32 %v1696_v61, %v1682_v42  ;;  %v4832_v22 = vld [vmem:[%s5438_s11 + $0x65] ss:$8 sm:$0x3]  ;;  %v4986_v42 = vld [vmem:[%s5438_s11 + $0x75] ss:$8 sm:$0x3] }
 0x5ac   : > { %v2629_v63 = vpop.permute.xlu1 %2628  ;;  %2943 = vmatprep.subr.mxu1 %v1700_v3  ;;  %v1650_v57 = vpop.permute.xlu0 %1649  ;;  %v2615_v3 = vrot.slane %v3505_v54, %v4061_v10 }
 0x5ad   : > { %v2631_v61 = vsel %vm2630_vm6, %v4551_v25, %v2629_v63  ;;  %v2635_v56 = vsel %vm2630_vm6, %v2629_v63, %v4551_v25  ;;  %v1655_v7 = vsel %vm1654_vm3, %v4561_v28, %v1650_v57  ;;  %v1658_v18 = vsel %vm1654_vm3, %v1650_v57, %v4561_v28  ;;  %2944 = vmatpush1.msra.mxu1 %v1699_v8  ;;  %v3466_v57 = vld [vmem:[%s5438_s11 + $0x32] ss:$8 sm:$0x3]  ;;  %v4917_v28 = vld [vmem:[%s5438_s11 + $0x80] ss:$8 sm:$0x3] }
 0x5ae   : > { %v2649_v52 = vmul.f32 %v2642_v2, %v2631_v61  ;;  %v2650_v14 = vmul.f32 %v2646_v60, %v2635_v56  ;;  %v1672_v39 = vmul.f32 %v1665_v16, %v1658_v18  ;;  %v1673_v30 = vmul.f32 %v1669_v12, %v1655_v7  ;;  %v3467_v2 = vld [vmem:[%s5438_s11 + $0x33] ss:$8 sm:$0x3]  ;;  %v4868_v60 = vld [vmem:[%s5438_s11 + $0x63] ss:$8 sm:$0x3] }
 0x5af   : > { %v2619_v63 = vrot.slane %v3505_v54, %v4058_v9  ;;  %v1611_v7 = vrot.slane %v3467_v2, %v4061_v10  ;;  %v1615_v18 = vrot.slane %v3467_v2, %v4058_v9  ;;  %v1584_v2 = vrot.slane %v3466_v57, %v4061_v10 }
 0x5b0   : > { %3004 = vmatprep.subr.mxu0 %v2650_v14  ;;  %v4870_v20 = vpop.permute.xlu1 %2207  ;;  %2945 = vmatprep.subr.mxu1 %v1673_v30  ;;  %v1623_v8 = vpop.permute.xlu0 %1622  ;;  %vm2103_vm6 = vcmask 23552   ;;  %vm2446_vm3 = vcmask 809984  }
 0x5b1   : > { %v1628_v16 = vsel %vm1627_vm10, %v4569_v31, %v1623_v8  ;;  %v1631_v12 = vsel %vm1627_vm10, %v1623_v8, %v4569_v31  ;;  %2946 = vmatpush1.msra.mxu1 %v1672_v39  ;;  %3005 = vmatpush1.msra.mxu0 %v2649_v52  ;;  %v1588_v8 = vrot.slane %v3466_v57, %v4058_v9  ;;  %v3465_v57 = vld [vmem:[%s5438_s11 + $0x31] ss:$8 sm:$0x3]  ;;  %vm5654_vm10 = vcmask 801792  }
 0x5b2   : > { %v1645_v61 = vmul.f32 %v1638_v59, %v1631_v12  ;;  %v1646_v56 = vmul.f32 %v1642_v43, %v1628_v16  ;;  %v4894_v59 = vld [vmem:[%s5438_s11 + $0x62] ss:$8 sm:$0x3]  ;;  %v3504_v16 = vld [vmem:[%s5438_s11 + $0x81] ss:$8 sm:$0x3] }
 0x5b4   : > { %v2602_v52 = vpop.permute.xlu1 %2601  ;;  %2947 = vmatprep.subr.mxu1 %v1646_v56  ;;  %v1596_v30 = vpop.permute.xlu0 %1595 }
 0x5b5   : > { %v2604_v12 = vsel %vm2603_vm0, %v4567_v29, %v2602_v52  ;;  %v2608_v39 = vsel %vm2603_vm0, %v2602_v52, %v4567_v29  ;;  %v1601_v43 = vsel %vm1600_vm11, %v4577_v33, %v1596_v30  ;;  %v1604_v56 = vsel %vm1600_vm11, %v1596_v30, %v4577_v33  ;;  %2948 = vmatpush1.msra.mxu1 %v1645_v61  ;;  %v4937_v52 = vld [vmem:[%s5438_s11 + $0x77] ss:$8 sm:$0x3]  ;;  %vm5655_vm0 = vmmov %vm5654_vm10 }
 0x5b6   : > { %v2622_v31 = vmul.f32 %v2615_v3, %v2604_v12  ;;  %v2623_v54 = vmul.f32 %v2619_v63, %v2608_v39  ;;  %v1618_v55 = vmul.f32 %v1611_v7, %v1604_v56  ;;  %v1619_v14 = vmul.f32 %v1615_v18, %v1601_v43  ;;  %v4927_v3 = vld [vmem:[%s5438_s11 + $0x60] ss:$8 sm:$0x3]  ;;  %v4942_v30 = vld [vmem:[%s5438_s11 + $0x57] ss:$8 sm:$0x3] }
 0x5b7   : > { %v2588_v61 = vrot.slane %v3504_v16, %v4061_v10  ;;  %v2592_v18 = vrot.slane %v3504_v16, %v4058_v9  ;;  %v1557_v39 = vrot.slane %v3465_v57, %v4061_v10  ;;  %v1561_v43 = vrot.slane %v3465_v57, %v4058_v9  ;;  %v4955_v56 = vld [vmem:[%s5438_s11 + $0x76] ss:$8 sm:$0x3] }
 0x5b8   : > { %3006 = vmatprep.subr.mxu0 %v2623_v54  ;;  %v4929_v63 = vpop.permute.xlu1 %2181  ;;  %2949 = vmatprep.subr.mxu1 %v1619_v14  ;;  %v1569_v7 = vpop.permute.xlu0 %1568  ;;  %v2562_v16 = vrot.slane %v4917_v28, %v4061_v10  ;;  %v2566_v12 = vrot.slane %v4917_v28, %v4058_v9  ;;  %v4960_v57 = vld [vmem:[%s5438_s11 + $0x56] ss:$8 sm:$0x3]  ;;  %vm5657_vm11 = vcmask 7168  }
 0x5b9   : > { %v1574_v14 = vsel %vm1573_vm12, %v4585_v35, %v1569_v7  ;;  %v1577_v54 = vsel %vm1573_vm12, %v1569_v7, %v4585_v35  ;;  %2950 = vmatpush1.msra.mxu1 %v1618_v55  ;;  %3007 = vmatpush1.msra.mxu0 %v2622_v31  ;;  %v2345_v31 = vsel %vm853_vm4, %v4681_v50, %v4479_v62  ;;  %v4999_v55 = vld [vmem:[%s5438_s11 + $0x55] ss:$8 sm:$0x3]  ;;  %vm5658_vm12 = vmmov %vm5657_vm11 }
 0x5ba   : > { %v1591_v29 = vmul.f32 %v1584_v2, %v1577_v54  ;;  %v1592_v33 = vmul.f32 %v1588_v8, %v1574_v14 }
 0x5bc   : > { %v2576_v8 = vpop.permute.xlu1 %2575  ;;  %2951 = vmatprep.subr.mxu1 %v1592_v33  ;;  %v1541_v14 = vpop.permute.xlu0 %1540 }
 0x5bd   : > { %v2577_v2 = vsel %vm1042_vm9, %v4583_v34, %v2576_v8  ;;  %v2581_v33 = vsel %vm1042_vm9, %v2576_v8, %v4583_v34  ;;  %v1547_v54 = vsel %vm1546_vm13, %v4593_v37, %v1541_v14  ;;  %v1550_v35 = vsel %vm1546_vm13, %v1541_v14, %v4593_v37  ;;  %2952 = vmatpush1.msra.mxu1 %v1591_v29  ;;  %v5037_v14 = vld [vmem:[%s5438_s11 + $0x54] ss:$8 sm:$0x3] }
 0x5be   : > { %v2595_v28 = vmul.f32 %v2588_v61, %v2577_v2  ;;  %v2596_v7 = vmul.f32 %v2592_v18, %v2581_v33  ;;  %v1564_v25 = vmul.f32 %v1557_v39, %v1550_v35  ;;  %v1565_v11 = vmul.f32 %v1561_v43, %v1547_v54  ;;  %v5013_v61 = vld [vmem:[%s5438_s11 + $0x74] ss:$8 sm:$0x3] }
 0x5bf   : > { %v2341_v34 = vsel %vm853_vm4, %v4479_v62, %v4681_v50  ;;  %v2118_v8 = vrot.slane %v4960_v57, %v4058_v9  ;;  %v2484_v37 = vrot.slane %v4986_v42, %v4061_v10  ;;  %v2488_v29 = vrot.slane %v4986_v42, %v4058_v9 }
 0x5c0   : > { %v2319_v18 = vsel %vm826_vm5, %v4710_v0, %v4495_v4  ;;  %vm2235_vm9 = vcmask 1022976   ;;  %3008 = vmatprep.subr.mxu0 %v2596_v7  ;;  %v2550_v62 = vpop.permute.xlu1 %2549  ;;  %2953 = vmatprep.subr.mxu1 %v1565_v11  ;;  %v5018_v50 = vpop.permute.xlu0 %2151  ;;  %v2087_v39 = vrot.slane %v4999_v55, %v4061_v10  ;;  %v2091_v43 = vrot.slane %v4999_v55, %v4058_v9 }
 0x5c1   : > { %v2360_v35 = vmul.f32 %v2356_v1, %v2345_v31  ;;  %v2315_v2 = vsel %vm826_vm5, %v4495_v4, %v4710_v0  ;;  %v2551_v7 = vsel %vm1015_vm8, %v4591_v36, %v2550_v62  ;;  %v2555_v11 = vsel %vm1015_vm8, %v2550_v62, %v4591_v36  ;;  %2954 = vmatpush1.msra.mxu1 %v1564_v25 }
 0x5c2   : > { %v2359_v1 = vmul.f32 %v2352_v26, %v2341_v34  ;;  %v2293_v4 = vsel %vm799_vm2, %v4739_v13, %v4511_v15  ;;  %v2570_v0 = vmul.f32 %v2566_v12, %v2555_v11  ;;  %3009 = vmatpush1.msra.mxu0 %v2595_v28  ;;  %v2458_v31 = vrot.slane %v5013_v61, %v4061_v10 }
 0x5c3   : > { %v5633_v36 = vrot.slane %v4818_v5, %v4058_v9  ;;  %v2289_v54 = vsel %vm799_vm2, %v4511_v15, %v4739_v13  ;;  %v2569_v33 = vmul.f32 %v2562_v16, %v2551_v7  ;;  %2955 = vmatprep.subr.mxu1 %v2360_v35  ;;  %v2462_v21 = vrot.slane %v5013_v61, %v4058_v9 }
 0x5c4   : > { %v5634_v26 = vrot.slane %v4818_v5, %v4061_v10  ;;  %v2267_v28 = vsel %vm2262_vm14, %v4768_v17, %v4527_v19  ;;  %2956 = vmatpush2.msra.mxu1 %v2359_v1  ;;  %3010 = vmatprep.subr.mxu0 %v2570_v0  ;;  %v2524_v34 = vpop.permute.xlu1 %2523  ;;  %v2060_v15 = vrot.slane %v5037_v14, %v4061_v10  ;;  %vm5641_vm2 = vcmask 1031168  }
 0x5c5   : > { %v2334_v25 = vmul.f32 %v5633_v36, %v2319_v18  ;;  %v5061_v18 = vpop.permute.xlu0 %2125  ;;  %v5635_v13 = vrot.slane %v4825_v6, %v4058_v9  ;;  %v2263_v5 = vsel %vm2262_vm14, %v4527_v19, %v4768_v17  ;;  %v2525_v62 = vsel %vm988_vm7, %v4602_v40, %v2524_v34  ;;  %3011 = vmatpush1.msra.mxu0 %v2569_v33  ;;  %vm5643_vm4 = vmmov %vm5641_vm2 }
 0x5c6   : > { %v2333_v12 = vmul.f32 %v5634_v26, %v2315_v2  ;;  %v2529_v35 = vsel %vm988_vm7, %v2524_v34, %v4602_v40  ;;  %v5078_v2 = vld [vmem:[%s5438_s11 + $0x73] ss:$8 sm:$0x3]  ;;  %v5636_v7 = vrot.slane %v4825_v6, %v4061_v10  ;;  %v2240_v19 = vsel %vm2235_vm9, %v4802_v24, %v4543_v23 }
 0x5c7   : > { %v2308_v16 = vmul.f32 %v5635_v13, %v2293_v4  ;;  %2957 = vmatprep.subr.mxu1 %v2334_v25  ;;  %v5637_v17 = vrot.slane %v4937_v52, %v4058_v9  ;;  %v2064_v40 = vrot.slane %v5037_v14, %v4058_v9  ;;  %v5638_v4 = vrot.slane %v4832_v22, %v4058_v9 }
 0x5c8   : > { %v2307_v11 = vmul.f32 %v5636_v7, %v2289_v54  ;;  %2958 = vmatpush2.msra.mxu1 %v2333_v12  ;;  %v2236_v6 = vsel %vm2235_vm9, %v4543_v23, %v4802_v24  ;;  %v5639_v36 = vrot.slane %v4937_v52, %v4061_v10  ;;  %v5640_v54 = vrot.slane %v4832_v22, %v4061_v10  ;;  %v5139_v7 = vld [vmem:[%s5438_s11 + $0x72] ss:$8 sm:$0x3] }
 0x5c9   : > { %v2544_v1 = vmul.f32 %v5637_v17, %v2529_v35  ;;  %v2282_v0 = vmul.f32 %v5638_v4, %v2267_v28  ;;  %2959 = vmatprep.subr.mxu1 %v2308_v16  ;;  %v2213_v12 = vsel %vm5641_vm2, %v4870_v20, %v4559_v27  ;;  %v2498_v28 = vpop.permute.xlu1 %2497  ;;  %v5106_v34 = vpop.permute.xlu0 %2098  ;;  %v2431_v23 = vrot.slane %v5078_v2, %v4061_v10  ;;  %v5123_v16 = vld [vmem:[%s5438_s11 + $0x53] ss:$8 sm:$0x3] }
 0x5ca   : > { %v2543_v25 = vmul.f32 %v5639_v36, %v2525_v62  ;;  %v2281_v26 = vmul.f32 %v5640_v54, %v2263_v5  ;;  %2960 = vmatpush2.msra.mxu1 %v2307_v11  ;;  %v5642_v24 = vrot.slane %v4856_v38, %v4058_v9  ;;  %v2209_v22 = vsel %vm5643_vm4, %v4559_v27, %v4870_v20 }
 0x5cb   : > { %3012 = vmatprep.subr.mxu0 %v2544_v1  ;;  %vm5644_vm5 = vcmask 793600   ;;  %2961 = vmatprep.subr.mxu1 %v2282_v0  ;;  %v5646_v5 = vrot.slane %v4856_v38, %v4061_v10  ;;  %vm5647_vm8 = vcmask 1039360   ;;  %v5648_v20 = vrot.slane %v4955_v56, %v4058_v9 }
 0x5cc   : > { %v2255_v52 = vmul.f32 %v5642_v24, %v2240_v19  ;;  %v2499_v33 = vsel %vm5644_vm5, %v4613_v44, %v2498_v28  ;;  %vm5645_vm7 = vmmov %vm5644_vm5  ;;  %v2187_v27 = vsel %vm5647_vm8, %v4929_v63, %v4575_v32  ;;  %2962 = vmatpush2.msra.mxu1 %v2281_v26  ;;  %v5649_v38 = vrot.slane %v4868_v60, %v4058_v9 }
 0x5cd   : > { %v2503_v13 = vsel %vm5645_vm7, %v2498_v28, %v4613_v44  ;;  %v2254_v62 = vmul.f32 %v5646_v5, %v2236_v6  ;;  %v2435_v44 = vrot.slane %v5078_v2, %v4058_v9  ;;  %vm5650_vm15 = vmmov %vm5647_vm8  ;;  %v5651_v17 = vrot.slane %v4955_v56, %v4061_v10  ;;  %3013 = vmatpush1.msra.mxu0 %v2543_v25  ;;  %v2472_v6 = vpop.permute.xlu1 %2471  ;;  %v2072_v36 = vpop.permute.xlu0 %2071  ;;  %v5174_v28 = vld [vmem:[%s5438_s11 + $0x71] ss:$8 sm:$0x3] }
 0x5ce   : > { %v2518_v35 = vmul.f32 %v5648_v20, %v2503_v13  ;;  %v2228_v11 = vmul.f32 %v5649_v38, %v2213_v12  ;;  %v2183_v19 = vsel %vm5650_vm15, %v4575_v32, %v4929_v63  ;;  %2963 = vmatprep.subr.mxu1 %v2255_v52  ;;  %v5652_v4 = vrot.slane %v4868_v60, %v4061_v10  ;;  %v5169_v12 = vld [vmem:[%s5438_s11 + $0x52] ss:$8 sm:$0x3] }
 0x5cf   : > { %v2517_v1 = vmul.f32 %v5651_v17, %v2499_v33  ;;  %2964 = vmatpush2.msra.mxu1 %v2254_v62  ;;  %v2034_v54 = vrot.slane %v5123_v16, %v4061_v10  ;;  %v2038_v32 = vrot.slane %v5123_v16, %v4058_v9  ;;  %v5653_v63 = vrot.slane %v4894_v59, %v4058_v9 }
 0x5d0   : > { %v2227_v0 = vmul.f32 %v5652_v4, %v2209_v22  ;;  %3014 = vmatprep.subr.mxu0 %v2518_v35  ;;  %v2473_v25 = vsel %vm5654_vm10, %v4621_v46, %v2472_v6  ;;  %v2477_v60 = vsel %vm5655_vm0, %v2472_v6, %v4621_v46  ;;  %2965 = vmatprep.subr.mxu1 %v2228_v11  ;;  %vm5659_vm13 = vcmask 15360  }
 0x5d1   : > { %v2202_v56 = vmul.f32 %v5653_v63, %v2187_v27  ;;  %v2404_v26 = vrot.slane %v5139_v7, %v4061_v10  ;;  %v5656_v24 = vrot.slane %v4894_v59, %v4061_v10  ;;  %v2156_v46 = vsel %vm5657_vm11, %v4604_v41, %v5018_v50  ;;  %3015 = vmatpush1.msra.mxu0 %v2517_v1  ;;  %v2046_v62 = vpop.permute.xlu0 %2045  ;;  %vm5661_vm2 = vmmov %vm5659_vm13  ;;  %v5666_v63 = vld [vmem:[#allocation23_spill] sm:$0xff] }
 0x5d2   : > { %v2492_v22 = vmul.f32 %v2488_v29, %v2477_v60  ;;  %2966 = vmatpush2.msra.mxu1 %v2227_v0  ;;  %v2408_v33 = vrot.slane %v5139_v7, %v4058_v9  ;;  %v2159_v13 = vsel %vm5658_vm12, %v5018_v50, %v4604_v41  ;;  %v2130_v59 = vsel %vm5659_vm13, %v4615_v45, %v5061_v18  ;;  %v2445_v29 = vpop.permute.xlu1 %2444 }
 0x5d3   : > { %v2201_v52 = vmul.f32 %v5656_v24, %v2183_v19  ;;  %v2491_v5 = vmul.f32 %v2484_v37, %v2473_v25  ;;  %vm2076_vm14 = vcmask 105472   ;;  %2967 = vmatprep.subr.mxu1 %v2202_v56  ;;  %vm2419_vm9 = vcmask 891904  }
 0x5d4   : > { %3016 = vmatprep.subr.mxu0 %v2492_v22  ;;  %v2008_v27 = vrot.slane %v5169_v12, %v4061_v10  ;;  %v2012_v41 = vrot.slane %v5169_v12, %v4058_v9  ;;  %v2378_v50 = vrot.slane %v5174_v28, %v4061_v10  ;;  %v5660_v42 = vrot.slane %v4927_v3, %v4058_v9 }
 0x5d5   : > { %2968 = vmatpush2.msra.mxu1 %v2201_v52  ;;  %v2133_v20 = vsel %vm5661_vm2, %v5061_v18, %v4615_v45  ;;  %v2447_v35 = vsel %vm2446_vm3, %v4627_v48, %v2445_v29  ;;  %v2451_v38 = vsel %vm2446_vm3, %v2445_v29, %v4627_v48  ;;  %v5662_v11 = vrot.slane %v4927_v3, %v4061_v10  ;;  %v2020_v0 = vpop.permute.xlu0 %2019 }
 0x5d6   : > { %v2174_v37 = vmul.f32 %v5660_v42, %v2156_v46  ;;  %3531 = vmatprep.subr.msk.mxu1 %vm1536_vm1, %v4349_v58  ;;  %v5663_v17 = vrot.slane %v4942_v30, %v4058_v9  ;;  %v2104_v45 = vsel %vm2103_vm6, %v4623_v47, %v5106_v34  ;;  %v2466_v18 = vmul.f32 %v2462_v21, %v2451_v38  ;;  %v5239_v21 = vld [vmem:[%s5438_s11 + $0x51] ss:$8 sm:$0x3]  ;;  %v5669_v46 = vld [vmem:[#allocation25_spill] sm:$0xff] }
 0x5d7   : > { %v2173_v19 = vmul.f32 %v5662_v11, %v2159_v13  ;;  %3532 = vmatpush2.msk.msra.mxu1 %vm1536_vm1, %v4341_v53  ;;  %v2107_v58 = vsel %vm2103_vm6, %v5106_v34, %v4623_v47  ;;  %v2080_v48 = vsel %vm2076_vm14, %v2072_v36, %v4629_v49  ;;  %v2465_v3 = vmul.f32 %v2458_v31, %v2447_v35  ;;  %v2418_v34 = vpop.permute.xlu1 %2417  ;;  %v5678_v38 = vld [vmem:[#allocation26_spill] sm:$0xff] }
 0x5d8   : > { %v2148_v1 = vmul.f32 %v5663_v17, %v2130_v59  ;;  %3017 = vmatpush1.msra.mxu0 %v2491_v5  ;;  %2971 = vmatprep.subr.mxu1 %v2174_v37  ;;  %v5664_v53 = vrot.slane %v4942_v30, %v4061_v10  ;;  %v2077_v47 = vsel %vm2076_vm14, %v4629_v49, %v2072_v36  ;;  %vm5665_vm1 = vcmask 113664   ;;  %v5675_v59 = vld [vmem:[#allocation27_spill] sm:$0xff] }
 0x5d9   : > { %2972 = vmatpush2.msra.mxu1 %v2173_v19  ;;  %3018 = vmatprep.subr.mxu0 %v2466_v18  ;;  %v2382_v61 = vrot.slane %v5174_v28, %v4058_v9  ;;  %v2122_v31 = vmul.f32 %v2118_v8, %v2104_v45  ;;  %v2050_v6 = vsel %vm5665_vm1, %v4633_v51, %v2046_v62  ;;  %vm5668_vm4 = vmmov %vm5665_vm1  ;;  %vm5670_vm5 = vcmask 121856   ;;  %v1994_v2 = vpop.permute.xlu0 %1993  ;;  %v3708_v28 = vld [vmem:[%s5435_s8] sm:$0x77] }
 0x5da   : > { %v2147_v4 = vmul.f32 %v5664_v53, %v2133_v20  ;;  %v2420_v30 = vsel %vm2419_vm9, %v5666_v63, %v2418_v34  ;;  %v2424_v49 = vsel %vm2419_vm9, %v2418_v34, %v5666_v63  ;;  %2973 = vmatprep.subr.mxu1 %v2148_v1  ;;  %v5667_v36 = vrot.slane %v4960_v57, %v4061_v10  ;;  %vm5671_vm7 = vmmov %vm5670_vm5  ;;  %v3709_v53 = vld [vmem:[%s5435_s8 + $0x8] sm:$0x77] }
 0x5db   : > { %v2094_v25 = vmul.f32 %v2087_v39, %v2080_v48  ;;  %v2439_v8 = vmul.f32 %v2435_v44, %v2424_v49  ;;  %v1982_v60 = vrot.slane %v5239_v21, %v4061_v10  ;;  %v2095_v24 = vmul.f32 %v2091_v43, %v2077_v47  ;;  %3019 = vmatpush1.msra.mxu0 %v2465_v3  ;;  %v3512_v39 = vld [vmem:[%s5438_s11 + $0x91] ss:$8 sm:$0x3]  ;;  %v2392_v43 = vpop.permute.xlu1 %2391 }
 0x5dc   : > { %v2121_v56 = vmul.f32 %v5667_v36, %v2107_v58  ;;  %2974 = vmatpush2.msra.mxu1 %v2147_v4  ;;  %v2053_v57 = vsel %vm5668_vm4, %v2046_v62, %v4633_v51  ;;  %v2438_v52 = vmul.f32 %v2431_v23, %v2420_v30  ;;  %v2068_v44 = vmul.f32 %v2064_v40, %v2050_v6  ;;  %v5672_v23 = vld [vmem:[#allocation24_spill] sm:$0xff] }
 0x5dd   : > { %2975 = vmatprep.subr.mxu1 %v2122_v31  ;;  %v2024_v55 = vsel %vm5670_vm5, %v5669_v46, %v2020_v0  ;;  %v2027_v51 = vsel %vm5671_vm7, %v2020_v0, %v5669_v46  ;;  %3020 = vmatprep.subr.mxu0 %v2439_v8  ;;  %vm5673_vm8 = vcmask 900096   ;;  %vm5676_vm3 = vcmask 130048   ;;  %v3077_v8 = vld [vmem:[%s5436_s9] sm:$0xff] }
 0x5de   : > { %2976 = vmatpush2.msra.mxu1 %v2121_v56  ;;  %v2393_v22 = vsel %vm5673_vm8, %v5672_v23, %v2392_v43  ;;  %vm5674_vm15 = vmmov %vm5673_vm8  ;;  %v1998_v40 = vsel %vm5676_vm3, %v5675_v59, %v1994_v2  ;;  %v2067_v29 = vmul.f32 %v2060_v15, %v2053_v57  ;;  %v1986_v42 = vrot.slane %v5239_v21, %v4058_v9  ;;  %v3079_v57 = vld [vmem:[%s5436_s9 + $0x10] sm:$0xff] }
 0x5df   : > { %v2397_v13 = vsel %vm5674_vm15, %v2392_v43, %v5672_v23  ;;  %2977 = vmatprep.subr.mxu1 %v2095_v24  ;;  %vm5677_vm10 = vmmov %vm5676_vm3  ;;  %v2804_v37 = vrot.slane %v3512_v39, %v4061_v10  ;;  %v2042_v20 = vmul.f32 %v2038_v32, %v2024_v55  ;;  %v2411_v35 = vmul.f32 %v2404_v26, %v2393_v22  ;;  %v2366_v7 = vpop.permute.xlu1 %2365  ;;  %v1968_v26 = vpop.permute.xlu0 %1967  ;;  %v3078_v24 = vld [vmem:[%s5436_s9 + $0x8] sm:$0xff]  ;;  %v5687_v43 = vld [vmem:[#allocation18_spill] sm:$0xff] }
 0x5e0   : > { %v2001_v5 = vsel %vm5677_vm10, %v1994_v2, %v5675_v59  ;;  %v2412_v62 = vmul.f32 %v2408_v33, %v2397_v13  ;;  %2978 = vmatpush2.msra.mxu1 %v2094_v25  ;;  %3021 = vmatpush1.msra.mxu0 %v2438_v52  ;;  %v2808_v14 = vrot.slane %v3512_v39, %v4058_v9  ;;  %vm2792_vm0 = vcmask 629760   ;;  %v5688_v23 = vld [vmem:[#allocation17_spill] sm:$0xff]  ;;  %v5689_v13 = vld [vmem:[#allocation19_spill] sm:$0xff] }
 0x5e1   : > { %2979 = vmatprep.subr.mxu1 %v2068_v44  ;;  %v2041_v15 = vmul.f32 %v2034_v54, %v2027_v51  ;;  %v2015_v33 = vmul.f32 %v2008_v27, %v2001_v5  ;;  %v2016_v32 = vmul.f32 %v2012_v41, %v1998_v40  ;;  %vm5679_vm11 = vcmask 908288   ;;  %v5681_v54 = vld [vmem:[#allocation28_spill] sm:$0xff] }
 0x5e2   : > { %2980 = vmatpush2.msra.mxu1 %v2067_v29  ;;  %3022 = vmatprep.subr.mxu0 %v2412_v62  ;;  %v2367_v11 = vsel %vm5679_vm11, %v5678_v38, %v2366_v7  ;;  %vm5680_vm12 = vmmov %vm5679_vm11  ;;  %vm5682_vm13 = vcmask 138240   ;;  %vm5685_vm9 = vcmask 1042432   ;;  %v5690_v40 = vld [vmem:[#allocation20_spill] sm:$0xff]  ;;  %v5691_v29 = vld [vmem:[#allocation21_spill] sm:$0xff] }
 0x5e3   : > { %v2371_v16 = vsel %vm5680_vm12, %v2366_v7, %v5678_v38  ;;  %2981 = vmatprep.subr.mxu1 %v2042_v20  ;;  %v1972_v19 = vsel %vm5682_vm13, %v5681_v54, %v1968_v26  ;;  %vm5683_vm14 = vmmov %vm5682_vm13  ;;  %v2385_v12 = vmul.f32 %v2378_v50, %v2367_v11  ;;  %3023 = vmatpush1.msra.mxu0 %v2411_v35  ;;  %v2791_v45 = vpop.permute.xlu1 %2790  ;;  %v2789_v18 = vpop.permute.xlu0 %2788  ;;  %v5684_v50 = vmov 0.0   ;;  %v3184_v20 = vld [vmem:[%s5693_s26] sm:$0x7] }
 0x5e4   : > { %v1975_v27 = vsel %vm5683_vm14, %v1968_v26, %v5681_v54  ;;  %v2386_v41 = vmul.f32 %v2382_v61, %v2371_v16  ;;  %v1990_v1 = vmul.f32 %v1986_v42, %v1972_v19  ;;  %2982 = vmatpush2.msra.mxu1 %v2041_v15  ;;  %v2793_v58 = vsel %vm2792_vm0, %v2789_v18, %v2791_v45  ;;  %vm5686_vm2 = vmmov %vm5685_vm9  ;;  %v5692_v42 = vld [vmem:[#allocation22_spill] sm:$0xff] }
 0x5e5   : > { %v1989_v17 = vmul.f32 %v1982_v60, %v1975_v27  ;;  %2983 = vmatprep.subr.mxu1 %v2016_v32  ;;  %v2797_v48 = vsel %vm2792_vm0, %v2791_v45, %v2789_v18  ;;  %v2811_v3 = vmul.f32 %v2804_v37, %v2793_v58  ;;  %vm5695_vm1 = vmmov %vm5686_vm2 }
 0x5e6   : > { %2984 = vmatpush2.msra.mxu1 %v2015_v33  ;;  %3024 = vmatprep.subr.mxu0 %v2386_v41  ;;  %v2812_v21 = vmul.f32 %v2808_v14, %v2797_v48  ;;  %vm5696_vm4 = vmmov %vm5695_vm1 }
 0x5e7   : > { %2985 = vmatprep.subr.mxu1 %v1990_v1  ;;  %3025 = vmatpush1.msra.mxu0 %v2385_v12  ;;  %vm5697_vm5 = vmmov %vm5695_vm1 }
 0x5e8   : > { %2986 = vmatpush2.msra.mxu1 %v1989_v17  ;;  %3056 = vmatprep.subr.mxu0 %v2812_v21  ;;  %vm5698_vm7 = vmmov %vm5695_vm1 }
 0x5e9   : > { %2988 = vmatmul.mubr.f32.vlgmr.msra.gmra.mxu1 %v3708_v28  ;;  %3057 = vmatpush2.msra.mxu0 %v2811_v3 }
 0x5ea   : > { %3159 = vmatprep.mubr.f32.mxu1 %v5684_v50  ;;  %3059 = vmatmul.mubr.f32.vlgmr.msra.gmra.mxu0 %v3709_v53 }
 0x5eb   : > { %3252 = vmatprep.mubr.f32.mxu0 %v5684_v50 }
 0x6a9   : > { %v2989_v4 = vpop.f32.mrf.mxu1 }
 0x6aa   : > { %v3060_v47 = vpop.f32.mrf.mxu0 }
 0x6ab   : > { %v3061_v34 = vadd.f32 %v3060_v47, %v2989_v4  ;;  %v2991_v0 = vpop.f32.mrf.mxu1 }
 0x6ac   : > { %v3062_v61 = vpop.f32.mrf.mxu0 }
 0x6ad   : > { %v3514_v31 = vmul.f32 -1.442695, %v3061_v34  ;;  %v3063_v6 = vadd.f32 %v3062_v61, %v2991_v0 }
 0x6af   : > { %3684 = vpow2.f32 %v3514_v31  ;;  %v3515_v63 = vmul.f32 -1.442695, %v3063_v6 }
 0x6b1   : > { %3686 = vpow2.f32 %v3515_v63 }
 0x6bc   : > { %v3685_v30 = vpop.eup %3684 }
 0x6bd   : > { %v3071_v36 = vadd.f32 1.0, %v3685_v30 }
 0x6be   : > { %v3687_v49 = vpop.eup %3686 }
 0x6bf   : > { %v3072_v56 = vadd.f32 1.0, %v3687_v49 }
 0x6c1   : > { %3688 = vrcp.f32 %v3072_v56 }
 0x6c2   : > { %3690 = vrcp.f32 %v3071_v36  ;;  %v5699_v36 = vld [vmem:[#allocation16_spill] sm:$0xff] }
 0x6c3   : > { %v3321_v56 = vsub.s32 2, %v5699_v36 }
 0x6ce   : > { %v3689_v25 = vpop.eup %3688 }
 0x6cf   : > { %v3691_v60 = vpop.eup %3690  ;;  %3516 = vmatprep.subr.msk.mxu1 %vm5685_vm9, %v3689_v25 }
 0x6d0   : > { %3517 = vmatpush1.msk.msra.mxu1 %vm5686_vm2, %v3691_v60 }
 0x6d1   : > { %3518 = vmatmul.mubr.msk.f32.vlgmr.msra.gmra.mxu1 %vm2103_vm6, %v3077_v8 }
 0x6d2   : > { %3165 = vmatprep.mubr.f32.mxu1 %v5684_v50 }
 0x6d5   : > { %3519 = vmatmul.mubr.msk.f32.gmra.mxu1 %vm2103_vm6, %v3078_v24 }
 0x6d6   : > { %3171 = vmatprep.mubr.f32.mxu1 %v5684_v50 }
 0x6d9   : > { %3520 = vmatmul.mubr.msk.f32.gmra.mxu1 %vm2103_vm6, %v3079_v57  ;;  %vm5694_vm6 = vcmask 195584  }
 0x791   : > { %v3161_v52 = vpop.f32.mrf.mxu1 }
 0x792   : > { %v3178_v37 = vmul.f32 %v3161_v52, %v5692_v42 }
 0x793   : > { %v3163_v39 = vpop.f32.mrf.mxu1 }
 0x794   : > { %v5366_v62 = vmul.f32 %v3163_v39, %v5691_v29 }
 0x795   : > { %v3167_v44 = vpop.f32.mrf.mxu1 }
 0x796   : > { %v3180_v5 = vmul.f32 %v3167_v44, %v5690_v40 }
 0x797   : > { %v3169_v46 = vpop.f32.mrf.mxu1 }
 0x798   : > { %v5361_v59 = vmul.f32 %v3169_v46, %v5689_v13 }
 0x799   : > { %v3173_v55 = vpop.f32.mrf.mxu1 }
 0x79a   : > { %v3182_v22 = vmul.f32 %v3173_v55, %v5688_v23 }
 0x79b   : > { %v3175_v51 = vpop.f32.mrf.mxu1 }
 0x79c   : > { %v5357_v2 = vmul.f32 %v3175_v51, %v5687_v43 }
 0x79e   : > { %3214 = vmatprep.subr.mxu0 %v5357_v2 }
 0x79f   : > { %3215 = vmatpush1.msra.mxu0 %v3182_v22 }
 0x7a0   : > { %3216 = vmatprep.subr.mxu0 %v5361_v59 }
 0x7a1   : > { %3217 = vmatpush1.msra.mxu0 %v3180_v5 }
 0x7a2   : > { %3218 = vmatprep.subr.mxu0 %v5366_v62 }
 0x7a3   : > { %3219 = vmatpush1.msra.mxu0 %v3178_v37 }
 0x7a4   : > { %3521 = vmatmul.mubr.msk.f32.vlgmr.msra.gmra.mxu0 %vm5694_vm6, %v3184_v20 }
 0x864   : > { %v3254_v35 = vpop.f32.mrf.mxu0 }
 0x865   : > { %v3259_v14 = vsel %vm5695_vm1, %v3254_v35, -inf }
 0x866   : > { %v3260_v15 = vrot.slane %v3259_v14, 4  ;;  %v3256_v33 = vpop.f32.mrf.mxu0 }
 0x867   : > { %v3266_v32 = vsel %vm5696_vm4, %v3256_v33, -inf }
 0x868   : > { %v3261_v7 = vmax.f32 %v3259_v14, %v3260_v15  ;;  %v3267_v26 = vrot.slane %v3266_v32, 4 }
 0x86a   : > { %v3262_v38 = vrot.slane %v3261_v7, 2  ;;  %v3268_v11 = vmax.f32 %v3266_v32, %v3267_v26 }
 0x86c   : > { %v3263_v16 = vmax.f32 %v3261_v7, %v3262_v38  ;;  %v3269_v54 = vrot.slane %v3268_v11, 2 }
 0x86e   : > { %v3264_v19 = vrot.slane %v3263_v16, 1  ;;  %v3270_v27 = vmax.f32 %v3268_v11, %v3269_v54 }
 0x870   : > { %v3265_v12 = vmax.f32 %v3263_v16, %v3264_v19  ;;  %v3271_v41 = vrot.slane %v3270_v27, 1 }
 0x872   : > { %v3273_v17 = vsub.f32 %v3254_v35, %v3265_v12  ;;  %v3272_v1 = vmax.f32 %v3270_v27, %v3271_v41 }
 0x874   : > { %v3275_v45 = vmul.f32 1.442695, %v3273_v17  ;;  %v3274_v18 = vsub.f32 %v3256_v33, %v3272_v1 }
 0x876   : > { %3692 = vpow2.f32 %v3275_v45  ;;  %v3277_v58 = vmul.f32 1.442695, %v3274_v18 }
 0x878   : > { %3694 = vpow2.f32 %v3277_v58 }
 0x883   : > { %v3693_v48 = vpop.eup %3692 }
 0x884   : > { %v3279_v3 = vsel %vm5697_vm5, %v3693_v48, 0.0 }
 0x885   : > { %v3695_v21 = vpop.eup %3694  ;;  %v3280_v28 = vrot.slane %v3279_v3, 4 }
 0x886   : > { %v3286_v50 = vsel %vm5698_vm7, %v3695_v21, 0.0 }
 0x887   : > { %v3281_v53 = vadd.f32 %v3280_v28, %v3279_v3  ;;  %v3287_v4 = vrot.slane %v3286_v50, 4 }
 0x889   : > { %v3282_v47 = vrot.slane %v3281_v53, 2  ;;  %v3288_v34 = vadd.f32 %v3287_v4, %v3286_v50 }
 0x88b   : > { %v3283_v0 = vadd.f32 %v3282_v47, %v3281_v53  ;;  %v3289_v61 = vrot.slane %v3288_v34, 2 }
 0x88d   : > { %v3284_v31 = vrot.slane %v3283_v0, 1  ;;  %v3290_v6 = vadd.f32 %v3289_v61, %v3288_v34 }
 0x88f   : > { %v3285_v63 = vadd.f32 %v3284_v31, %v3283_v0  ;;  %v3291_v30 = vrot.slane %v3290_v6, 1 }
 0x891   : > { %3696 = vrcp.f32 %v3285_v63  ;;  %v3292_v49 = vadd.f32 %v3291_v30, %v3290_v6 }
 0x893   : > { %3698 = vrcp.f32 %v3292_v49 }
 0x89e   : > { %v3697_v25 = vpop.eup %3696 }
 0x89f   : > { %v3294_v8 = vmul.f32 %v3697_v25, %v3693_v48 }
 0x8a0   : > { %v3699_v60 = vpop.eup %3698 }
 0x8a1   : > { %v3300_v24 = vrot.slane %v3294_v8, %v4061_v10  ;;  %v3310_v57 = vrot.slane %v3294_v8, %v4058_v9  ;;  %v3322_v52 = vrot.slane %v3294_v8, %v3321_v56  ;;  %v3296_v39 = vmul.f32 %v3699_v60, %v3695_v21 }
 0x8a3   : > { %v3305_v44 = vmul.f32 %v3300_v24, %v3182_v22  ;;  %v3315_v46 = vmul.f32 %v3310_v57, %v3180_v5  ;;  %v3304_v55 = vrot.slane %v3296_v39, %v4061_v10  ;;  %v3314_v51 = vrot.slane %v3296_v39, %v4058_v9 }
 0x8a4   : > { %v3326_v43 = vrot.slane %v3296_v39, %v3321_v56  ;;  %v3327_v13 = vmul.f32 %v3322_v52, %v3178_v37 }
 0x8a5   : > { %v3317_v23 = vadd.f32 %v3315_v46, %v3305_v44  ;;  %v3306_v40 = vmul.f32 %v3304_v55, %v5357_v2  ;;  %v3316_v29 = vmul.f32 %v3314_v51, %v5361_v59 }
 0x8a6   : > { %v3328_v35 = vmul.f32 %v3326_v43, %v5366_v62 }
 0x8a7   : > { %v3329_v42 = vadd.f32 %v3327_v13, %v3317_v23  ;;  %v3318_v20 = vadd.f32 %v3316_v29, %v3306_v40 }
 0x8a9   : > { %v3522_v14 = vmul.f32 -1.442695, %v3329_v42  ;;  %v3330_v22 = vadd.f32 %v3328_v35, %v3318_v20 }
 0x8ab   : > { %3700 = vpow2.f32 %v3522_v14  ;;  %v3523_v5 = vmul.f32 -1.442695, %v3330_v22 }
 0x8ad   : > { %3702 = vpow2.f32 %v3523_v5 }
 0x8b8   : > { %v3701_v10 = vpop.eup %3700 }
 0x8b9   : > { %v3337_v9 = vadd.f32 1.0, %v3701_v10 }
 0x8ba   : > { %v3703_v15 = vpop.eup %3702 }
 0x8bb   : > { %3704 = vrcp.f32 %v3337_v9  ;;  %v3338_v37 = vadd.f32 1.0, %v3703_v15 }
 0x8bd   : > { %3706 = vrcp.f32 %v3338_v37 }
 0x8c8   : > { %v3705_v2 = vpop.eup %3704 }
 0x8c9   : > { %3343 = vst [vmem:[%s406_s16] sm:$0xff] %v3705_v2 }
 0x8ca   : > { %v3707_v59 = vpop.eup %3706 }
 0x8cb   : > { %3344 = vst [vmem:[%s406_s16 + $0x8] sm:$0xff] %v3707_v59 }
 0x8cc   : > { %3723 = shalt.err (!%p3720_p3)
}
 0x8cd   : > { %s3724_s19 = scalar_lea.hbm %s5392_s28, 256  ;;  %s3728_s22 = scalar_lea.hbm %s5704_s23, 512 }
 0x8ce   : > { %p3725_p4 = scmp.ne.s32.totalorder %s5392_s28, %s3724_s19  ;;  %p3729_p9 = scmp.lt.s32.totalorder %s5392_s28, %s5704_s23 }
 0x8cf   : > { %p3730_p10 = scmp.lt.s32.totalorder %s3728_s22, %s3724_s19 }
 0x8d0   : > { %p3726_p7 = pnand %p3725_p4, %p3927_p5 }
 0x8d1   : > { %p3731_p11 = por %p3730_p10, %p3729_p9 }
 0x8d2   : > { %p3727_p8 = pneg %p3726_p7 }
 0x8d4   : > { %p3732_p12 = pnand %p3731_p11, %p3727_p8 }
 0x8d6   : > { %3735 = shalt.err (!%p3732_p12)
}
 0x8d7   : > { %3554 = dma.vmem_to_hbm [thread:$0]  (%p3927_p5), %s3361_s17, 256, %s5392_s28, %s3346_s29  }
 0x8d8 PF: > { %s5705_s4 = sld [smem:[#allocation10_spill]] }
 0x8d9   : > { %s5706_s1 = sld [smem:[#allocation7_spill]] }
 0x8de   : > { %p3560_p13 = scmp.ge.s32.totalorder %s5705_s4, 2 }
 0x8df   : > { %s3372_s26 = sand.u32 1, %s5706_s1  }
 0x8e0   : > { %p3557_p0 = pnand %p3560_p13, %p3931_p6  ;;  %s3373_s25 = scalar_lea.sflag [#allocation5], %s3372_s26 }
 0x8e2   : > { %p3558_p1 = pneg %p3557_p0 }
 0x8e4   : > { %3753 = dma.done.wait (%p3558_p1), %s3373_s25, 256  }
 0x8e5   : > { %3755 = vsyncadd (%p3558_p1), %s3373_s25, 4294967040  ;;  %s5708_s22 = sld [smem:[#allocation12_spill]] }
 0x8e6   : > { %s5709_s6 = sld [smem:[#allocation8_spill]] }
 0x8e7   : > { %s5710_s20 = sld [smem:[#allocation9_spill]] }
 0x8e8   : > { %s5711_s21 = sld [smem:[#allocation13_spill]] }
 0x8eb   : > { %p22_p2 = scmp.ge.s32.totalorder %s5708_s22, 4  }
 0x8ed   :  { %24 = sbr.rel (!%p22_p2) target bundleno = 12 (0xc), region = 174 }
 0x8f2   :  { %3378 = vsyncpa [#allocation5], 1 }
 0x8f3   :  { %3380 = vsyncpa [#allocation5 + $0x1], 1 }

</bundles_post_ra>
